<compile_context>
chip_gen: v7x
topology: tpu7x:2x2x1
jax: 0.10.0
libtpu: 0.0.40
codegen_flags: <defaults>
</compile_context>

<pallas_src>
import jax
import jax.numpy as jnp
from jax.experimental import pallas as pl
from jax.experimental.pallas import tpu as pltpu

SELU_ALPHA = 1.6732632423543772
SELU_SCALE = 1.0507009873554805
BN_EPS = 1e-5


def _selu(x):
    return SELU_SCALE * jnp.where(x > 0, x, SELU_ALPHA * (jnp.exp(x) - 1.0))


def _conv3x3_cm(x_cm, w_ref, masks, shifts, m):
    """3x3 SAME conv of one image in channels-major (C, H*W) layout.

    For each of the 9 taps the image is lane-rotated by the flat pixel offset
    (pltpu.roll -> XLU), border contributions are zeroed with a (1, M) mask
    (VPU select), and a (Cout, Cin) @ (Cin, M) matmul is accumulated in f32
    (MXU).  Output (C, M) is fully lane-dense.
    """
    acc = None
    for k in range(9):
        s = shifts[k]
        xs = x_cm if s == 0 else pltpu.roll(x_cm, shift=(-s) % m, axis=1)
        if masks[k] is not None:
            xs = jnp.where(masks[k], xs, 0.0)
        t = jnp.dot(w_ref[k], xs, preferred_element_type=jnp.float32)
        acc = t if acc is None else acc + t
    return acc


def _make_kernel(n, c, h, w):
    m = h * w
    offs = [(dr, dc) for dr in (-1, 0, 1) for dc in (-1, 0, 1)]
    shifts = [dr * w + dc for dr, dc in offs]
    inv = 1.0 / float(n * m)

    def kernel(hw_ref, x_ref, w1_ref, g1_ref, b1_ref, w2_ref, g2_ref, b2_ref,
               o_ref):
        # Border masks for the 9 taps (center tap needs none).
        hw = hw_ref[...]                       # (2, M) int32
        hh = hw[0:1, :]                        # flat-pixel row index
        ww = hw[1:2, :]                        # flat-pixel col index
        masks = []
        for dr, dc in offs:
            mk = None
            if dr == -1:
                mk = hh >= 1
            elif dr == 1:
                mk = hh <= h - 2
            if dc == -1:
                mk = (ww >= 1) if mk is None else (mk & (ww >= 1))
            elif dc == 1:
                mk = (ww <= w - 2) if mk is None else (mk & (ww <= w - 2))
            masks.append(mk)

        def conv_all(imgs, w_ref_):
            return [_conv3x3_cm(im, w_ref_, masks, shifts, m) for im in imgs]

        def bn_fold(ys, g_ref_, b_ref_):
            # Training-mode BN: biased batch variance over (N, H, W).
            ssum = sum(jnp.sum(y, axis=1, keepdims=True) for y in ys)     # (C,1)
            ssq = sum(jnp.sum(y * y, axis=1, keepdims=True) for y in ys)  # (C,1)
            mean = ssum * inv
            var = ssq * inv - mean * mean
            scale = g_ref_[...] * jax.lax.rsqrt(var + BN_EPS)
            shift = b_ref_[...] - mean * scale
            return scale, shift

        xs = [x_ref[i] for i in range(n)]                 # N x (C, M)

        y1 = conv_all(xs, w1_ref)                         # conv1 (no bias: BN)
        sc1, sh1 = bn_fold(y1, g1_ref, b1_ref)
        h1 = [_selu(y * sc1 + sh1) for y in y1]           # bn1 + SELU
        y2 = conv_all(h1, w2_ref)                         # conv2
        sc2, sh2 = bn_fold(y2, g2_ref, b2_ref)
        for i in range(n):                                # bn2 + residual + SELU
            o_ref[i] = _selu(y2[i] * sc2 + sh2 + xs[i])

    return kernel


def residual_block_pallas(x_nchw, params):
    """Forward pass of ResidualBlock.  x_nchw: (N, C, H, W) float32.

    params = (w1, b1, g1, be1, w2, b2, g2, be2) in PyTorch layout.  The conv
    biases b1/b2 are accepted but unused: a per-channel constant added before
    training-mode BatchNorm is exactly cancelled by the mean subtraction.
    """
    w1, _b1, g1, be1, w2, _b2, g2, be2 = params
    n, c, h, w = x_nchw.shape
    m = h * w
    x_cm = x_nchw.reshape(n, c, m)                        # free: no transpose

    def taps(wt):  # PyTorch (Cout, Cin, 3, 3) -> (9, Cout, Cin), k = kh*3+kw
        return jnp.transpose(wt, (2, 3, 0, 1)).reshape(9, c, c)

    idx = jnp.arange(m, dtype=jnp.int32)
    hw = jnp.stack([idx // w, idx % w], axis=0)           # (2, M) int32

    def full(shp):
        return pl.BlockSpec(shp, lambda i: (0,) * len(shp))

    out = pl.pallas_call(
        _make_kernel(n, c, h, w),
        grid=(1,),
        in_specs=[
            full((2, m)),                                  # hh / ww indices
            full((n, c, m)),                               # x (residual too)
            full((9, c, c)), full((c, 1)), full((c, 1)),   # w1, gamma1, beta1
            full((9, c, c)), full((c, 1)), full((c, 1)),   # w2, gamma2, beta2
        ],
        out_specs=full((n, c, m)),
        out_shape=jax.ShapeDtypeStruct((n, c, m), jnp.float32),
        compiler_params=pltpu.CompilerParams(
            dimension_semantics=("arbitrary",)),
    )(hw, x_cm,
      taps(w1), g1.reshape(c, 1), be1.reshape(c, 1),
      taps(w2), g2.reshape(c, 1), be2.reshape(c, 1))

    return out.reshape(n, c, h, w)


# --------------------------- pure-JAX reference -----------------------------

def _reference(x, params):
    w1, b1, g1, be1, w2, b2, g2, be2 = params

    def conv(x, wt, bias):
        y = jax.lax.conv_general_dilated(
            x, wt, window_strides=(1, 1), padding="SAME",
            dimension_numbers=("NCHW", "OIHW", "NCHW"))
        return y + bias[None, :, None, None]

    def bn(x, g, be):
        mean = jnp.mean(x, axis=(0, 2, 3), keepdims=True)
        var = jnp.mean((x - mean) ** 2, axis=(0, 2, 3), keepdims=True)
        return (x - mean) / jnp.sqrt(var + BN_EPS) * g[None, :, None, None] \
            + be[None, :, None, None]

    h = jax.nn.selu(bn(conv(x, w1, b1), g1, be1))
    h = bn(conv(h, w2, b2), g2, be2) + x
    return jax.nn.selu(h)


# ----------------------------------- main -----------------------------------

if __name__ == "__main__":
    N, C, H, W = 2, 32, 16, 16       # hidden_size = 32

    key = jax.random.PRNGKey(0)
    ks = jax.random.split(key, 9)
    x = jax.random.normal(ks[0], (N, C, H, W), jnp.float32)

    w1 = 0.1 * jax.random.normal(ks[1], (C, C, 3, 3), jnp.float32)
    b1 = 0.1 * jax.random.normal(ks[2], (C,), jnp.float32)
    g1 = 1.0 + 0.1 * jax.random.normal(ks[3], (C,), jnp.float32)
    be1 = 0.1 * jax.random.normal(ks[4], (C,), jnp.float32)
    w2 = 0.1 * jax.random.normal(ks[5], (C, C, 3, 3), jnp.float32)
    b2 = 0.1 * jax.random.normal(ks[6], (C,), jnp.float32)
    g2 = 1.0 + 0.1 * jax.random.normal(ks[7], (C,), jnp.float32)
    be2 = 0.1 * jax.random.normal(ks[8], (C,), jnp.float32)
    params = (w1, b1, g1, be1, w2, b2, g2, be2)

    out = jax.jit(residual_block_pallas)(x, params)
    out = jax.block_until_ready(out)

    ref = jax.block_until_ready(_reference(x, params))
    assert out.shape == (N, C, H, W)
    assert jnp.allclose(out, ref, rtol=5e-4, atol=5e-4), \
        f"max abs err {jnp.max(jnp.abs(out - ref))}"

    print("KERNEL_OK")
</pallas_src>

<mosaic_0001>
module attributes {stable_mosaic.version = 11 : i64} {
  func.func @kernel(%arg0: i32, %arg1: memref<2x256xi32, #tpu.memory_space<vmem>>, %arg2: memref<2x32x256xf32, #tpu.memory_space<vmem>>, %arg3: memref<9x32x32xf32, #tpu.memory_space<vmem>>, %arg4: memref<32x1xf32, #tpu.memory_space<vmem>>, %arg5: memref<32x1xf32, #tpu.memory_space<vmem>>, %arg6: memref<9x32x32xf32, #tpu.memory_space<vmem>>, %arg7: memref<32x1xf32, #tpu.memory_space<vmem>>, %arg8: memref<32x1xf32, #tpu.memory_space<vmem>>, %arg9: memref<2x32x256xf32, #tpu.memory_space<vmem>>) attributes {dimension_semantics = [#tpu.dimension_semantics<arbitrary>], iteration_bounds = array<i64: 1>, scalar_prefetch = 0 : i64, scratch_operands = 0 : i64, tpu.core_type = #tpu.core_type<tc>, window_params = [{pipeline_mode = #tpu.pipeline_mode<synchronous>, transform_indices = @transform_0, window_bounds = array<i64: 2, 256>}, {pipeline_mode = #tpu.pipeline_mode<synchronous>, transform_indices = @transform_1, window_bounds = array<i64: 2, 32, 256>}, {pipeline_mode = #tpu.pipeline_mode<synchronous>, transform_indices = @transform_2, window_bounds = array<i64: 9, 32, 32>}, {pipeline_mode = #tpu.pipeline_mode<synchronous>, transform_indices = @transform_3, window_bounds = array<i64: 32, 1>}, {pipeline_mode = #tpu.pipeline_mode<synchronous>, transform_indices = @transform_4, window_bounds = array<i64: 32, 1>}, {pipeline_mode = #tpu.pipeline_mode<synchronous>, transform_indices = @transform_5, window_bounds = array<i64: 9, 32, 32>}, {pipeline_mode = #tpu.pipeline_mode<synchronous>, transform_indices = @transform_6, window_bounds = array<i64: 32, 1>}, {pipeline_mode = #tpu.pipeline_mode<synchronous>, transform_indices = @transform_7, window_bounds = array<i64: 32, 1>}, {pipeline_mode = #tpu.pipeline_mode<synchronous>, transform_indices = @transform_8, window_bounds = array<i64: 2, 32, 256>}]} {
    %c0 = arith.constant 0 : index
    %c0_0 = arith.constant 0 : index
    %0 = vector.load %arg1[%c0, %c0_0] : memref<2x256xi32, #tpu.memory_space<vmem>>, vector<2x256xi32>
    %1 = vector.extract_strided_slice %0 {offsets = [0, 0], sizes = [1, 256], strides = [1, 1]} : vector<2x256xi32> to vector<1x256xi32>
    %2 = vector.extract_strided_slice %0 {offsets = [1, 0], sizes = [1, 256], strides = [1, 1]} : vector<2x256xi32> to vector<1x256xi32>
    %c1_i32 = arith.constant 1 : i32
    %3 = vector.broadcast %c1_i32 : i32 to vector<1x256xi32>
    %4 = arith.cmpi sge, %1, %3 : vector<1x256xi32>
    %c1_i32_1 = arith.constant 1 : i32
    %5 = vector.broadcast %c1_i32_1 : i32 to vector<1x256xi32>
    %6 = arith.cmpi sge, %2, %5 : vector<1x256xi32>
    %7 = arith.andi %4, %6 : vector<1x256xi1>
    %c1_i32_2 = arith.constant 1 : i32
    %8 = vector.broadcast %c1_i32_2 : i32 to vector<1x256xi32>
    %9 = arith.cmpi sge, %1, %8 : vector<1x256xi32>
    %c1_i32_3 = arith.constant 1 : i32
    %10 = vector.broadcast %c1_i32_3 : i32 to vector<1x256xi32>
    %11 = arith.cmpi sge, %1, %10 : vector<1x256xi32>
    %c14_i32 = arith.constant 14 : i32
    %12 = vector.broadcast %c14_i32 : i32 to vector<1x256xi32>
    %13 = arith.cmpi sle, %2, %12 : vector<1x256xi32>
    %14 = arith.andi %11, %13 : vector<1x256xi1>
    %c1_i32_4 = arith.constant 1 : i32
    %15 = vector.broadcast %c1_i32_4 : i32 to vector<1x256xi32>
    %16 = arith.cmpi sge, %2, %15 : vector<1x256xi32>
    %c14_i32_5 = arith.constant 14 : i32
    %17 = vector.broadcast %c14_i32_5 : i32 to vector<1x256xi32>
    %18 = arith.cmpi sle, %2, %17 : vector<1x256xi32>
    %c14_i32_6 = arith.constant 14 : i32
    %19 = vector.broadcast %c14_i32_6 : i32 to vector<1x256xi32>
    %20 = arith.cmpi sle, %1, %19 : vector<1x256xi32>
    %c1_i32_7 = arith.constant 1 : i32
    %21 = vector.broadcast %c1_i32_7 : i32 to vector<1x256xi32>
    %22 = arith.cmpi sge, %2, %21 : vector<1x256xi32>
    %23 = arith.andi %20, %22 : vector<1x256xi1>
    %c14_i32_8 = arith.constant 14 : i32
    %24 = vector.broadcast %c14_i32_8 : i32 to vector<1x256xi32>
    %25 = arith.cmpi sle, %1, %24 : vector<1x256xi32>
    %c14_i32_9 = arith.constant 14 : i32
    %26 = vector.broadcast %c14_i32_9 : i32 to vector<1x256xi32>
    %27 = arith.cmpi sle, %1, %26 : vector<1x256xi32>
    %c14_i32_10 = arith.constant 14 : i32
    %28 = vector.broadcast %c14_i32_10 : i32 to vector<1x256xi32>
    %29 = arith.cmpi sle, %2, %28 : vector<1x256xi32>
    %30 = arith.andi %27, %29 : vector<1x256xi1>
    %c0_11 = arith.constant 0 : index
    %c0_12 = arith.constant 0 : index
    %c0_13 = arith.constant 0 : index
    %31 = vector.load %arg2[%c0_11, %c0_12, %c0_13] : memref<2x32x256xf32, #tpu.memory_space<vmem>>, vector<1x32x256xf32>
    %32 = vector.shape_cast %31 : vector<1x32x256xf32> to vector<32x256xf32>
    %c1 = arith.constant 1 : index
    %c0_14 = arith.constant 0 : index
    %c0_15 = arith.constant 0 : index
    %33 = vector.load %arg2[%c1, %c0_14, %c0_15] : memref<2x32x256xf32, #tpu.memory_space<vmem>>, vector<1x32x256xf32>
    %34 = vector.shape_cast %33 : vector<1x32x256xf32> to vector<32x256xf32>
    %c17_i32 = arith.constant 17 : i32
    %35 = tpu.dynamic_rotate %32 by %c17_i32 dim 1 : vector<32x256xf32>, i32 -> vector<32x256xf32>
    %cst = arith.constant 0.000000e+00 : f32
    %36 = vector.shape_cast %7 : vector<1x256xi1> to vector<1x256xi1>
    %37 = vector.broadcast %36 : vector<1x256xi1> to vector<32x256xi1>
    %38 = vector.broadcast %cst : f32 to vector<32x256xf32>
    %39 = arith.select %37, %35, %38 : vector<32x256xi1>, vector<32x256xf32>
    %c0_16 = arith.constant 0 : index
    %c0_17 = arith.constant 0 : index
    %c0_18 = arith.constant 0 : index
    %40 = vector.load %arg3[%c0_16, %c0_17, %c0_18] : memref<9x32x32xf32, #tpu.memory_space<vmem>>, vector<1x32x32xf32>
    %41 = vector.shape_cast %40 : vector<1x32x32xf32> to vector<32x32xf32>
    %cst_19 = arith.constant dense<0.000000e+00> : vector<32x256xf32>
    %42 = tpu.matmul %41, %39, %cst_19 {dimension_numbers = #tpu.dot_dimension_numbers<[1], [0], [0], [1], [0, 0, 1, 1], [], []>} : vector<32x32xf32>, vector<32x256xf32>, vector<32x256xf32> -> vector<32x256xf32>
    %c16_i32 = arith.constant 16 : i32
    %43 = tpu.dynamic_rotate %32 by %c16_i32 dim 1 : vector<32x256xf32>, i32 -> vector<32x256xf32>
    %cst_20 = arith.constant 0.000000e+00 : f32
    %44 = vector.shape_cast %9 : vector<1x256xi1> to vector<1x256xi1>
    %45 = vector.broadcast %44 : vector<1x256xi1> to vector<32x256xi1>
    %46 = vector.broadcast %cst_20 : f32 to vector<32x256xf32>
    %47 = arith.select %45, %43, %46 : vector<32x256xi1>, vector<32x256xf32>
    %c1_21 = arith.constant 1 : index
    %c0_22 = arith.constant 0 : index
    %c0_23 = arith.constant 0 : index
    %48 = vector.load %arg3[%c1_21, %c0_22, %c0_23] : memref<9x32x32xf32, #tpu.memory_space<vmem>>, vector<1x32x32xf32>
    %49 = vector.shape_cast %48 : vector<1x32x32xf32> to vector<32x32xf32>
    %cst_24 = arith.constant dense<0.000000e+00> : vector<32x256xf32>
    %50 = tpu.matmul %49, %47, %cst_24 {dimension_numbers = #tpu.dot_dimension_numbers<[1], [0], [0], [1], [0, 0, 1, 1], [], []>} : vector<32x32xf32>, vector<32x256xf32>, vector<32x256xf32> -> vector<32x256xf32>
    %51 = arith.addf %42, %50 : vector<32x256xf32>
    %c15_i32 = arith.constant 15 : i32
    %52 = tpu.dynamic_rotate %32 by %c15_i32 dim 1 : vector<32x256xf32>, i32 -> vector<32x256xf32>
    %cst_25 = arith.constant 0.000000e+00 : f32
    %53 = vector.shape_cast %14 : vector<1x256xi1> to vector<1x256xi1>
    %54 = vector.broadcast %53 : vector<1x256xi1> to vector<32x256xi1>
    %55 = vector.broadcast %cst_25 : f32 to vector<32x256xf32>
    %56 = arith.select %54, %52, %55 : vector<32x256xi1>, vector<32x256xf32>
    %c2 = arith.constant 2 : index
    %c0_26 = arith.constant 0 : index
    %c0_27 = arith.constant 0 : index
    %57 = vector.load %arg3[%c2, %c0_26, %c0_27] : memref<9x32x32xf32, #tpu.memory_space<vmem>>, vector<1x32x32xf32>
    %58 = vector.shape_cast %57 : vector<1x32x32xf32> to vector<32x32xf32>
    %cst_28 = arith.constant dense<0.000000e+00> : vector<32x256xf32>
    %59 = tpu.matmul %58, %56, %cst_28 {dimension_numbers = #tpu.dot_dimension_numbers<[1], [0], [0], [1], [0, 0, 1, 1], [], []>} : vector<32x32xf32>, vector<32x256xf32>, vector<32x256xf32> -> vector<32x256xf32>
    %60 = arith.addf %51, %59 : vector<32x256xf32>
    %c1_i32_29 = arith.constant 1 : i32
    %61 = tpu.dynamic_rotate %32 by %c1_i32_29 dim 1 : vector<32x256xf32>, i32 -> vector<32x256xf32>
    %cst_30 = arith.constant 0.000000e+00 : f32
    %62 = vector.shape_cast %16 : vector<1x256xi1> to vector<1x256xi1>
    %63 = vector.broadcast %62 : vector<1x256xi1> to vector<32x256xi1>
    %64 = vector.broadcast %cst_30 : f32 to vector<32x256xf32>
    %65 = arith.select %63, %61, %64 : vector<32x256xi1>, vector<32x256xf32>
    %c3 = arith.constant 3 : index
    %c0_31 = arith.constant 0 : index
    %c0_32 = arith.constant 0 : index
    %66 = vector.load %arg3[%c3, %c0_31, %c0_32] : memref<9x32x32xf32, #tpu.memory_space<vmem>>, vector<1x32x32xf32>
    %67 = vector.shape_cast %66 : vector<1x32x32xf32> to vector<32x32xf32>
    %cst_33 = arith.constant dense<0.000000e+00> : vector<32x256xf32>
    %68 = tpu.matmul %67, %65, %cst_33 {dimension_numbers = #tpu.dot_dimension_numbers<[1], [0], [0], [1], [0, 0, 1, 1], [], []>} : vector<32x32xf32>, vector<32x256xf32>, vector<32x256xf32> -> vector<32x256xf32>
    %69 = arith.addf %60, %68 : vector<32x256xf32>
    %c4 = arith.constant 4 : index
    %c0_34 = arith.constant 0 : index
    %c0_35 = arith.constant 0 : index
    %70 = vector.load %arg3[%c4, %c0_34, %c0_35] : memref<9x32x32xf32, #tpu.memory_space<vmem>>, vector<1x32x32xf32>
    %71 = vector.shape_cast %70 : vector<1x32x32xf32> to vector<32x32xf32>
    %cst_36 = arith.constant dense<0.000000e+00> : vector<32x256xf32>
    %72 = tpu.matmul %71, %32, %cst_36 {dimension_numbers = #tpu.dot_dimension_numbers<[1], [0], [0], [1], [0, 0, 1, 1], [], []>} : vector<32x32xf32>, vector<32x256xf32>, vector<32x256xf32> -> vector<32x256xf32>
    %73 = arith.addf %69, %72 : vector<32x256xf32>
    %c255_i32 = arith.constant 255 : i32
    %74 = tpu.dynamic_rotate %32 by %c255_i32 dim 1 : vector<32x256xf32>, i32 -> vector<32x256xf32>
    %cst_37 = arith.constant 0.000000e+00 : f32
    %75 = vector.shape_cast %18 : vector<1x256xi1> to vector<1x256xi1>
    %76 = vector.broadcast %75 : vector<1x256xi1> to vector<32x256xi1>
    %77 = vector.broadcast %cst_37 : f32 to vector<32x256xf32>
    %78 = arith.select %76, %74, %77 : vector<32x256xi1>, vector<32x256xf32>
    %c5 = arith.constant 5 : index
    %c0_38 = arith.constant 0 : index
    %c0_39 = arith.constant 0 : index
    %79 = vector.load %arg3[%c5, %c0_38, %c0_39] : memref<9x32x32xf32, #tpu.memory_space<vmem>>, vector<1x32x32xf32>
    %80 = vector.shape_cast %79 : vector<1x32x32xf32> to vector<32x32xf32>
    %cst_40 = arith.constant dense<0.000000e+00> : vector<32x256xf32>
    %81 = tpu.matmul %80, %78, %cst_40 {dimension_numbers = #tpu.dot_dimension_numbers<[1], [0], [0], [1], [0, 0, 1, 1], [], []>} : vector<32x32xf32>, vector<32x256xf32>, vector<32x256xf32> -> vector<32x256xf32>
    %82 = arith.addf %73, %81 : vector<32x256xf32>
    %c241_i32 = arith.constant 241 : i32
    %83 = tpu.dynamic_rotate %32 by %c241_i32 dim 1 : vector<32x256xf32>, i32 -> vector<32x256xf32>
    %cst_41 = arith.constant 0.000000e+00 : f32
    %84 = vector.shape_cast %23 : vector<1x256xi1> to vector<1x256xi1>
    %85 = vector.broadcast %84 : vector<1x256xi1> to vector<32x256xi1>
    %86 = vector.broadcast %cst_41 : f32 to vector<32x256xf32>
    %87 = arith.select %85, %83, %86 : vector<32x256xi1>, vector<32x256xf32>
    %c6 = arith.constant 6 : index
    %c0_42 = arith.constant 0 : index
    %c0_43 = arith.constant 0 : index
    %88 = vector.load %arg3[%c6, %c0_42, %c0_43] : memref<9x32x32xf32, #tpu.memory_space<vmem>>, vector<1x32x32xf32>
    %89 = vector.shape_cast %88 : vector<1x32x32xf32> to vector<32x32xf32>
    %cst_44 = arith.constant dense<0.000000e+00> : vector<32x256xf32>
    %90 = tpu.matmul %89, %87, %cst_44 {dimension_numbers = #tpu.dot_dimension_numbers<[1], [0], [0], [1], [0, 0, 1, 1], [], []>} : vector<32x32xf32>, vector<32x256xf32>, vector<32x256xf32> -> vector<32x256xf32>
    %91 = arith.addf %82, %90 : vector<32x256xf32>
    %c240_i32 = arith.constant 240 : i32
    %92 = tpu.dynamic_rotate %32 by %c240_i32 dim 1 : vector<32x256xf32>, i32 -> vector<32x256xf32>
    %cst_45 = arith.constant 0.000000e+00 : f32
    %93 = vector.shape_cast %25 : vector<1x256xi1> to vector<1x256xi1>
    %94 = vector.broadcast %93 : vector<1x256xi1> to vector<32x256xi1>
    %95 = vector.broadcast %cst_45 : f32 to vector<32x256xf32>
    %96 = arith.select %94, %92, %95 : vector<32x256xi1>, vector<32x256xf32>
    %c7 = arith.constant 7 : index
    %c0_46 = arith.constant 0 : index
    %c0_47 = arith.constant 0 : index
    %97 = vector.load %arg3[%c7, %c0_46, %c0_47] : memref<9x32x32xf32, #tpu.memory_space<vmem>>, vector<1x32x32xf32>
    %98 = vector.shape_cast %97 : vector<1x32x32xf32> to vector<32x32xf32>
    %cst_48 = arith.constant dense<0.000000e+00> : vector<32x256xf32>
    %99 = tpu.matmul %98, %96, %cst_48 {dimension_numbers = #tpu.dot_dimension_numbers<[1], [0], [0], [1], [0, 0, 1, 1], [], []>} : vector<32x32xf32>, vector<32x256xf32>, vector<32x256xf32> -> vector<32x256xf32>
    %100 = arith.addf %91, %99 : vector<32x256xf32>
    %c239_i32 = arith.constant 239 : i32
    %101 = tpu.dynamic_rotate %32 by %c239_i32 dim 1 : vector<32x256xf32>, i32 -> vector<32x256xf32>
    %cst_49 = arith.constant 0.000000e+00 : f32
    %102 = vector.shape_cast %30 : vector<1x256xi1> to vector<1x256xi1>
    %103 = vector.broadcast %102 : vector<1x256xi1> to vector<32x256xi1>
    %104 = vector.broadcast %cst_49 : f32 to vector<32x256xf32>
    %105 = arith.select %103, %101, %104 : vector<32x256xi1>, vector<32x256xf32>
    %c8 = arith.constant 8 : index
    %c0_50 = arith.constant 0 : index
    %c0_51 = arith.constant 0 : index
    %106 = vector.load %arg3[%c8, %c0_50, %c0_51] : memref<9x32x32xf32, #tpu.memory_space<vmem>>, vector<1x32x32xf32>
    %107 = vector.shape_cast %106 : vector<1x32x32xf32> to vector<32x32xf32>
    %cst_52 = arith.constant dense<0.000000e+00> : vector<32x256xf32>
    %108 = tpu.matmul %107, %105, %cst_52 {dimension_numbers = #tpu.dot_dimension_numbers<[1], [0], [0], [1], [0, 0, 1, 1], [], []>} : vector<32x32xf32>, vector<32x256xf32>, vector<32x256xf32> -> vector<32x256xf32>
    %109 = arith.addf %100, %108 : vector<32x256xf32>
    %c17_i32_53 = arith.constant 17 : i32
    %110 = tpu.dynamic_rotate %34 by %c17_i32_53 dim 1 : vector<32x256xf32>, i32 -> vector<32x256xf32>
    %cst_54 = arith.constant 0.000000e+00 : f32
    %111 = vector.shape_cast %7 : vector<1x256xi1> to vector<1x256xi1>
    %112 = vector.broadcast %111 : vector<1x256xi1> to vector<32x256xi1>
    %113 = vector.broadcast %cst_54 : f32 to vector<32x256xf32>
    %114 = arith.select %112, %110, %113 : vector<32x256xi1>, vector<32x256xf32>
    %c0_55 = arith.constant 0 : index
    %c0_56 = arith.constant 0 : index
    %c0_57 = arith.constant 0 : index
    %115 = vector.load %arg3[%c0_55, %c0_56, %c0_57] : memref<9x32x32xf32, #tpu.memory_space<vmem>>, vector<1x32x32xf32>
    %116 = vector.shape_cast %115 : vector<1x32x32xf32> to vector<32x32xf32>
    %cst_58 = arith.constant dense<0.000000e+00> : vector<32x256xf32>
    %117 = tpu.matmul %116, %114, %cst_58 {dimension_numbers = #tpu.dot_dimension_numbers<[1], [0], [0], [1], [0, 0, 1, 1], [], []>} : vector<32x32xf32>, vector<32x256xf32>, vector<32x256xf32> -> vector<32x256xf32>
    %c16_i32_59 = arith.constant 16 : i32
    %118 = tpu.dynamic_rotate %34 by %c16_i32_59 dim 1 : vector<32x256xf32>, i32 -> vector<32x256xf32>
    %cst_60 = arith.constant 0.000000e+00 : f32
    %119 = vector.shape_cast %9 : vector<1x256xi1> to vector<1x256xi1>
    %120 = vector.broadcast %119 : vector<1x256xi1> to vector<32x256xi1>
    %121 = vector.broadcast %cst_60 : f32 to vector<32x256xf32>
    %122 = arith.select %120, %118, %121 : vector<32x256xi1>, vector<32x256xf32>
    %c1_61 = arith.constant 1 : index
    %c0_62 = arith.constant 0 : index
    %c0_63 = arith.constant 0 : index
    %123 = vector.load %arg3[%c1_61, %c0_62, %c0_63] : memref<9x32x32xf32, #tpu.memory_space<vmem>>, vector<1x32x32xf32>
    %124 = vector.shape_cast %123 : vector<1x32x32xf32> to vector<32x32xf32>
    %cst_64 = arith.constant dense<0.000000e+00> : vector<32x256xf32>
    %125 = tpu.matmul %124, %122, %cst_64 {dimension_numbers = #tpu.dot_dimension_numbers<[1], [0], [0], [1], [0, 0, 1, 1], [], []>} : vector<32x32xf32>, vector<32x256xf32>, vector<32x256xf32> -> vector<32x256xf32>
    %126 = arith.addf %117, %125 : vector<32x256xf32>
    %c15_i32_65 = arith.constant 15 : i32
    %127 = tpu.dynamic_rotate %34 by %c15_i32_65 dim 1 : vector<32x256xf32>, i32 -> vector<32x256xf32>
    %cst_66 = arith.constant 0.000000e+00 : f32
    %128 = vector.shape_cast %14 : vector<1x256xi1> to vector<1x256xi1>
    %129 = vector.broadcast %128 : vector<1x256xi1> to vector<32x256xi1>
    %130 = vector.broadcast %cst_66 : f32 to vector<32x256xf32>
    %131 = arith.select %129, %127, %130 : vector<32x256xi1>, vector<32x256xf32>
    %c2_67 = arith.constant 2 : index
    %c0_68 = arith.constant 0 : index
    %c0_69 = arith.constant 0 : index
    %132 = vector.load %arg3[%c2_67, %c0_68, %c0_69] : memref<9x32x32xf32, #tpu.memory_space<vmem>>, vector<1x32x32xf32>
    %133 = vector.shape_cast %132 : vector<1x32x32xf32> to vector<32x32xf32>
    %cst_70 = arith.constant dense<0.000000e+00> : vector<32x256xf32>
    %134 = tpu.matmul %133, %131, %cst_70 {dimension_numbers = #tpu.dot_dimension_numbers<[1], [0], [0], [1], [0, 0, 1, 1], [], []>} : vector<32x32xf32>, vector<32x256xf32>, vector<32x256xf32> -> vector<32x256xf32>
    %135 = arith.addf %126, %134 : vector<32x256xf32>
    %c1_i32_71 = arith.constant 1 : i32
    %136 = tpu.dynamic_rotate %34 by %c1_i32_71 dim 1 : vector<32x256xf32>, i32 -> vector<32x256xf32>
    %cst_72 = arith.constant 0.000000e+00 : f32
    %137 = vector.shape_cast %16 : vector<1x256xi1> to vector<1x256xi1>
    %138 = vector.broadcast %137 : vector<1x256xi1> to vector<32x256xi1>
    %139 = vector.broadcast %cst_72 : f32 to vector<32x256xf32>
    %140 = arith.select %138, %136, %139 : vector<32x256xi1>, vector<32x256xf32>
    %c3_73 = arith.constant 3 : index
    %c0_74 = arith.constant 0 : index
    %c0_75 = arith.constant 0 : index
    %141 = vector.load %arg3[%c3_73, %c0_74, %c0_75] : memref<9x32x32xf32, #tpu.memory_space<vmem>>, vector<1x32x32xf32>
    %142 = vector.shape_cast %141 : vector<1x32x32xf32> to vector<32x32xf32>
    %cst_76 = arith.constant dense<0.000000e+00> : vector<32x256xf32>
    %143 = tpu.matmul %142, %140, %cst_76 {dimension_numbers = #tpu.dot_dimension_numbers<[1], [0], [0], [1], [0, 0, 1, 1], [], []>} : vector<32x32xf32>, vector<32x256xf32>, vector<32x256xf32> -> vector<32x256xf32>
    %144 = arith.addf %135, %143 : vector<32x256xf32>
    %c4_77 = arith.constant 4 : index
    %c0_78 = arith.constant 0 : index
    %c0_79 = arith.constant 0 : index
    %145 = vector.load %arg3[%c4_77, %c0_78, %c0_79] : memref<9x32x32xf32, #tpu.memory_space<vmem>>, vector<1x32x32xf32>
    %146 = vector.shape_cast %145 : vector<1x32x32xf32> to vector<32x32xf32>
    %cst_80 = arith.constant dense<0.000000e+00> : vector<32x256xf32>
    %147 = tpu.matmul %146, %34, %cst_80 {dimension_numbers = #tpu.dot_dimension_numbers<[1], [0], [0], [1], [0, 0, 1, 1], [], []>} : vector<32x32xf32>, vector<32x256xf32>, vector<32x256xf32> -> vector<32x256xf32>
    %148 = arith.addf %144, %147 : vector<32x256xf32>
    %c255_i32_81 = arith.constant 255 : i32
    %149 = tpu.dynamic_rotate %34 by %c255_i32_81 dim 1 : vector<32x256xf32>, i32 -> vector<32x256xf32>
    %cst_82 = arith.constant 0.000000e+00 : f32
    %150 = vector.shape_cast %18 : vector<1x256xi1> to vector<1x256xi1>
    %151 = vector.broadcast %150 : vector<1x256xi1> to vector<32x256xi1>
    %152 = vector.broadcast %cst_82 : f32 to vector<32x256xf32>
    %153 = arith.select %151, %149, %152 : vector<32x256xi1>, vector<32x256xf32>
    %c5_83 = arith.constant 5 : index
    %c0_84 = arith.constant 0 : index
    %c0_85 = arith.constant 0 : index
    %154 = vector.load %arg3[%c5_83, %c0_84, %c0_85] : memref<9x32x32xf32, #tpu.memory_space<vmem>>, vector<1x32x32xf32>
    %155 = vector.shape_cast %154 : vector<1x32x32xf32> to vector<32x32xf32>
    %cst_86 = arith.constant dense<0.000000e+00> : vector<32x256xf32>
    %156 = tpu.matmul %155, %153, %cst_86 {dimension_numbers = #tpu.dot_dimension_numbers<[1], [0], [0], [1], [0, 0, 1, 1], [], []>} : vector<32x32xf32>, vector<32x256xf32>, vector<32x256xf32> -> vector<32x256xf32>
    %157 = arith.addf %148, %156 : vector<32x256xf32>
    %c241_i32_87 = arith.constant 241 : i32
    %158 = tpu.dynamic_rotate %34 by %c241_i32_87 dim 1 : vector<32x256xf32>, i32 -> vector<32x256xf32>
    %cst_88 = arith.constant 0.000000e+00 : f32
    %159 = vector.shape_cast %23 : vector<1x256xi1> to vector<1x256xi1>
    %160 = vector.broadcast %159 : vector<1x256xi1> to vector<32x256xi1>
    %161 = vector.broadcast %cst_88 : f32 to vector<32x256xf32>
    %162 = arith.select %160, %158, %161 : vector<32x256xi1>, vector<32x256xf32>
    %c6_89 = arith.constant 6 : index
    %c0_90 = arith.constant 0 : index
    %c0_91 = arith.constant 0 : index
    %163 = vector.load %arg3[%c6_89, %c0_90, %c0_91] : memref<9x32x32xf32, #tpu.memory_space<vmem>>, vector<1x32x32xf32>
    %164 = vector.shape_cast %163 : vector<1x32x32xf32> to vector<32x32xf32>
    %cst_92 = arith.constant dense<0.000000e+00> : vector<32x256xf32>
    %165 = tpu.matmul %164, %162, %cst_92 {dimension_numbers = #tpu.dot_dimension_numbers<[1], [0], [0], [1], [0, 0, 1, 1], [], []>} : vector<32x32xf32>, vector<32x256xf32>, vector<32x256xf32> -> vector<32x256xf32>
    %166 = arith.addf %157, %165 : vector<32x256xf32>
    %c240_i32_93 = arith.constant 240 : i32
    %167 = tpu.dynamic_rotate %34 by %c240_i32_93 dim 1 : vector<32x256xf32>, i32 -> vector<32x256xf32>
    %cst_94 = arith.constant 0.000000e+00 : f32
    %168 = vector.shape_cast %25 : vector<1x256xi1> to vector<1x256xi1>
    %169 = vector.broadcast %168 : vector<1x256xi1> to vector<32x256xi1>
    %170 = vector.broadcast %cst_94 : f32 to vector<32x256xf32>
    %171 = arith.select %169, %167, %170 : vector<32x256xi1>, vector<32x256xf32>
    %c7_95 = arith.constant 7 : index
    %c0_96 = arith.constant 0 : index
    %c0_97 = arith.constant 0 : index
    %172 = vector.load %arg3[%c7_95, %c0_96, %c0_97] : memref<9x32x32xf32, #tpu.memory_space<vmem>>, vector<1x32x32xf32>
    %173 = vector.shape_cast %172 : vector<1x32x32xf32> to vector<32x32xf32>
    %cst_98 = arith.constant dense<0.000000e+00> : vector<32x256xf32>
    %174 = tpu.matmul %173, %171, %cst_98 {dimension_numbers = #tpu.dot_dimension_numbers<[1], [0], [0], [1], [0, 0, 1, 1], [], []>} : vector<32x32xf32>, vector<32x256xf32>, vector<32x256xf32> -> vector<32x256xf32>
    %175 = arith.addf %166, %174 : vector<32x256xf32>
    %c239_i32_99 = arith.constant 239 : i32
    %176 = tpu.dynamic_rotate %34 by %c239_i32_99 dim 1 : vector<32x256xf32>, i32 -> vector<32x256xf32>
    %cst_100 = arith.constant 0.000000e+00 : f32
    %177 = vector.shape_cast %30 : vector<1x256xi1> to vector<1x256xi1>
    %178 = vector.broadcast %177 : vector<1x256xi1> to vector<32x256xi1>
    %179 = vector.broadcast %cst_100 : f32 to vector<32x256xf32>
    %180 = arith.select %178, %176, %179 : vector<32x256xi1>, vector<32x256xf32>
    %c8_101 = arith.constant 8 : index
    %c0_102 = arith.constant 0 : index
    %c0_103 = arith.constant 0 : index
    %181 = vector.load %arg3[%c8_101, %c0_102, %c0_103] : memref<9x32x32xf32, #tpu.memory_space<vmem>>, vector<1x32x32xf32>
    %182 = vector.shape_cast %181 : vector<1x32x32xf32> to vector<32x32xf32>
    %cst_104 = arith.constant dense<0.000000e+00> : vector<32x256xf32>
    %183 = tpu.matmul %182, %180, %cst_104 {dimension_numbers = #tpu.dot_dimension_numbers<[1], [0], [0], [1], [0, 0, 1, 1], [], []>} : vector<32x32xf32>, vector<32x256xf32>, vector<32x256xf32> -> vector<32x256xf32>
    %184 = arith.addf %175, %183 : vector<32x256xf32>
    %cst_105 = arith.constant dense<0.000000e+00> : vector<32xf32>
    %185 = vector.multi_reduction <add>, %109, %cst_105 [1] : vector<32x256xf32> to vector<32xf32>
    %186 = vector.shape_cast %185 : vector<32xf32> to vector<32x1xf32>
    %cst_106 = arith.constant 0.000000e+00 : f32
    %187 = vector.broadcast %cst_106 : f32 to vector<32x1xf32>
    %188 = arith.addf %187, %186 : vector<32x1xf32>
    %cst_107 = arith.constant dense<0.000000e+00> : vector<32xf32>
    %189 = vector.multi_reduction <add>, %184, %cst_107 [1] : vector<32x256xf32> to vector<32xf32>
    %190 = vector.shape_cast %189 : vector<32xf32> to vector<32x1xf32>
    %191 = arith.addf %188, %190 : vector<32x1xf32>
    %192 = arith.mulf %109, %109 : vector<32x256xf32>
    %cst_108 = arith.constant dense<0.000000e+00> : vector<32xf32>
    %193 = vector.multi_reduction <add>, %192, %cst_108 [1] : vector<32x256xf32> to vector<32xf32>
    %194 = vector.shape_cast %193 : vector<32xf32> to vector<32x1xf32>
    %cst_109 = arith.constant 0.000000e+00 : f32
    %195 = vector.broadcast %cst_109 : f32 to vector<32x1xf32>
    %196 = arith.addf %195, %194 : vector<32x1xf32>
    %197 = arith.mulf %184, %184 : vector<32x256xf32>
    %cst_110 = arith.constant dense<0.000000e+00> : vector<32xf32>
    %198 = vector.multi_reduction <add>, %197, %cst_110 [1] : vector<32x256xf32> to vector<32xf32>
    %199 = vector.shape_cast %198 : vector<32xf32> to vector<32x1xf32>
    %200 = arith.addf %196, %199 : vector<32x1xf32>
    %cst_111 = arith.constant 0.001953125 : f32
    %201 = vector.broadcast %cst_111 : f32 to vector<32x1xf32>
    %202 = arith.mulf %191, %201 : vector<32x1xf32>
    %cst_112 = arith.constant 0.001953125 : f32
    %203 = vector.broadcast %cst_112 : f32 to vector<32x1xf32>
    %204 = arith.mulf %200, %203 : vector<32x1xf32>
    %205 = arith.mulf %202, %202 : vector<32x1xf32>
    %206 = arith.subf %204, %205 : vector<32x1xf32>
    %c0_113 = arith.constant 0 : index
    %c0_114 = arith.constant 0 : index
    %207 = vector.load %arg4[%c0_113, %c0_114] : memref<32x1xf32, #tpu.memory_space<vmem>>, vector<32x1xf32>
    %cst_115 = arith.constant 9.99999974E-6 : f32
    %208 = vector.broadcast %cst_115 : f32 to vector<32x1xf32>
    %209 = arith.addf %206, %208 : vector<32x1xf32>
    %210 = math.rsqrt %209 : vector<32x1xf32>
    %211 = arith.mulf %207, %210 : vector<32x1xf32>
    %c0_116 = arith.constant 0 : index
    %c0_117 = arith.constant 0 : index
    %212 = vector.load %arg5[%c0_116, %c0_117] : memref<32x1xf32, #tpu.memory_space<vmem>>, vector<32x1xf32>
    %213 = arith.mulf %202, %211 : vector<32x1xf32>
    %214 = arith.subf %212, %213 : vector<32x1xf32>
    %215 = vector.broadcast %211 : vector<32x1xf32> to vector<32x256xf32>
    %216 = arith.mulf %109, %215 : vector<32x256xf32>
    %217 = vector.broadcast %214 : vector<32x1xf32> to vector<32x256xf32>
    %218 = arith.addf %216, %217 : vector<32x256xf32>
    %cst_118 = arith.constant 0.000000e+00 : f32
    %219 = vector.broadcast %cst_118 : f32 to vector<32x256xf32>
    %220 = arith.cmpf ogt, %218, %219 : vector<32x256xf32>
    %221 = math.exp %218 : vector<32x256xf32>
    %cst_119 = arith.constant 1.000000e+00 : f32
    %222 = vector.broadcast %cst_119 : f32 to vector<32x256xf32>
    %223 = arith.subf %221, %222 : vector<32x256xf32>
    %cst_120 = arith.constant 1.67326319 : f32
    %224 = vector.broadcast %cst_120 : f32 to vector<32x256xf32>
    %225 = arith.mulf %224, %223 : vector<32x256xf32>
    %226 = arith.select %220, %218, %225 : vector<32x256xi1>, vector<32x256xf32>
    %cst_121 = arith.constant 1.05070102 : f32
    %227 = vector.broadcast %cst_121 : f32 to vector<32x256xf32>
    %228 = arith.mulf %227, %226 : vector<32x256xf32>
    %229 = vector.broadcast %211 : vector<32x1xf32> to vector<32x256xf32>
    %230 = arith.mulf %184, %229 : vector<32x256xf32>
    %231 = vector.broadcast %214 : vector<32x1xf32> to vector<32x256xf32>
    %232 = arith.addf %230, %231 : vector<32x256xf32>
    %cst_122 = arith.constant 0.000000e+00 : f32
    %233 = vector.broadcast %cst_122 : f32 to vector<32x256xf32>
    %234 = arith.cmpf ogt, %232, %233 : vector<32x256xf32>
    %235 = math.exp %232 : vector<32x256xf32>
    %cst_123 = arith.constant 1.000000e+00 : f32
    %236 = vector.broadcast %cst_123 : f32 to vector<32x256xf32>
    %237 = arith.subf %235, %236 : vector<32x256xf32>
    %cst_124 = arith.constant 1.67326319 : f32
    %238 = vector.broadcast %cst_124 : f32 to vector<32x256xf32>
    %239 = arith.mulf %238, %237 : vector<32x256xf32>
    %240 = arith.select %234, %232, %239 : vector<32x256xi1>, vector<32x256xf32>
    %cst_125 = arith.constant 1.05070102 : f32
    %241 = vector.broadcast %cst_125 : f32 to vector<32x256xf32>
    %242 = arith.mulf %241, %240 : vector<32x256xf32>
    %c17_i32_126 = arith.constant 17 : i32
    %243 = tpu.dynamic_rotate %228 by %c17_i32_126 dim 1 : vector<32x256xf32>, i32 -> vector<32x256xf32>
    %cst_127 = arith.constant 0.000000e+00 : f32
    %244 = vector.shape_cast %7 : vector<1x256xi1> to vector<1x256xi1>
    %245 = vector.broadcast %244 : vector<1x256xi1> to vector<32x256xi1>
    %246 = vector.broadcast %cst_127 : f32 to vector<32x256xf32>
    %247 = arith.select %245, %243, %246 : vector<32x256xi1>, vector<32x256xf32>
    %c0_128 = arith.constant 0 : index
    %c0_129 = arith.constant 0 : index
    %c0_130 = arith.constant 0 : index
    %248 = vector.load %arg6[%c0_128, %c0_129, %c0_130] : memref<9x32x32xf32, #tpu.memory_space<vmem>>, vector<1x32x32xf32>
    %249 = vector.shape_cast %248 : vector<1x32x32xf32> to vector<32x32xf32>
    %cst_131 = arith.constant dense<0.000000e+00> : vector<32x256xf32>
    %250 = tpu.matmul %249, %247, %cst_131 {dimension_numbers = #tpu.dot_dimension_numbers<[1], [0], [0], [1], [0, 0, 1, 1], [], []>} : vector<32x32xf32>, vector<32x256xf32>, vector<32x256xf32> -> vector<32x256xf32>
    %c16_i32_132 = arith.constant 16 : i32
    %251 = tpu.dynamic_rotate %228 by %c16_i32_132 dim 1 : vector<32x256xf32>, i32 -> vector<32x256xf32>
    %cst_133 = arith.constant 0.000000e+00 : f32
    %252 = vector.shape_cast %9 : vector<1x256xi1> to vector<1x256xi1>
    %253 = vector.broadcast %252 : vector<1x256xi1> to vector<32x256xi1>
    %254 = vector.broadcast %cst_133 : f32 to vector<32x256xf32>
    %255 = arith.select %253, %251, %254 : vector<32x256xi1>, vector<32x256xf32>
    %c1_134 = arith.constant 1 : index
    %c0_135 = arith.constant 0 : index
    %c0_136 = arith.constant 0 : index
    %256 = vector.load %arg6[%c1_134, %c0_135, %c0_136] : memref<9x32x32xf32, #tpu.memory_space<vmem>>, vector<1x32x32xf32>
    %257 = vector.shape_cast %256 : vector<1x32x32xf32> to vector<32x32xf32>
    %cst_137 = arith.constant dense<0.000000e+00> : vector<32x256xf32>
    %258 = tpu.matmul %257, %255, %cst_137 {dimension_numbers = #tpu.dot_dimension_numbers<[1], [0], [0], [1], [0, 0, 1, 1], [], []>} : vector<32x32xf32>, vector<32x256xf32>, vector<32x256xf32> -> vector<32x256xf32>
    %259 = arith.addf %250, %258 : vector<32x256xf32>
    %c15_i32_138 = arith.constant 15 : i32
    %260 = tpu.dynamic_rotate %228 by %c15_i32_138 dim 1 : vector<32x256xf32>, i32 -> vector<32x256xf32>
    %cst_139 = arith.constant 0.000000e+00 : f32
    %261 = vector.shape_cast %14 : vector<1x256xi1> to vector<1x256xi1>
    %262 = vector.broadcast %261 : vector<1x256xi1> to vector<32x256xi1>
    %263 = vector.broadcast %cst_139 : f32 to vector<32x256xf32>
    %264 = arith.select %262, %260, %263 : vector<32x256xi1>, vector<32x256xf32>
    %c2_140 = arith.constant 2 : index
    %c0_141 = arith.constant 0 : index
    %c0_142 = arith.constant 0 : index
    %265 = vector.load %arg6[%c2_140, %c0_141, %c0_142] : memref<9x32x32xf32, #tpu.memory_space<vmem>>, vector<1x32x32xf32>
    %266 = vector.shape_cast %265 : vector<1x32x32xf32> to vector<32x32xf32>
    %cst_143 = arith.constant dense<0.000000e+00> : vector<32x256xf32>
    %267 = tpu.matmul %266, %264, %cst_143 {dimension_numbers = #tpu.dot_dimension_numbers<[1], [0], [0], [1], [0, 0, 1, 1], [], []>} : vector<32x32xf32>, vector<32x256xf32>, vector<32x256xf32> -> vector<32x256xf32>
    %268 = arith.addf %259, %267 : vector<32x256xf32>
    %c1_i32_144 = arith.constant 1 : i32
    %269 = tpu.dynamic_rotate %228 by %c1_i32_144 dim 1 : vector<32x256xf32>, i32 -> vector<32x256xf32>
    %cst_145 = arith.constant 0.000000e+00 : f32
    %270 = vector.shape_cast %16 : vector<1x256xi1> to vector<1x256xi1>
    %271 = vector.broadcast %270 : vector<1x256xi1> to vector<32x256xi1>
    %272 = vector.broadcast %cst_145 : f32 to vector<32x256xf32>
    %273 = arith.select %271, %269, %272 : vector<32x256xi1>, vector<32x256xf32>
    %c3_146 = arith.constant 3 : index
    %c0_147 = arith.constant 0 : index
    %c0_148 = arith.constant 0 : index
    %274 = vector.load %arg6[%c3_146, %c0_147, %c0_148] : memref<9x32x32xf32, #tpu.memory_space<vmem>>, vector<1x32x32xf32>
    %275 = vector.shape_cast %274 : vector<1x32x32xf32> to vector<32x32xf32>
    %cst_149 = arith.constant dense<0.000000e+00> : vector<32x256xf32>
    %276 = tpu.matmul %275, %273, %cst_149 {dimension_numbers = #tpu.dot_dimension_numbers<[1], [0], [0], [1], [0, 0, 1, 1], [], []>} : vector<32x32xf32>, vector<32x256xf32>, vector<32x256xf32> -> vector<32x256xf32>
    %277 = arith.addf %268, %276 : vector<32x256xf32>
    %c4_150 = arith.constant 4 : index
    %c0_151 = arith.constant 0 : index
    %c0_152 = arith.constant 0 : index
    %278 = vector.load %arg6[%c4_150, %c0_151, %c0_152] : memref<9x32x32xf32, #tpu.memory_space<vmem>>, vector<1x32x32xf32>
    %279 = vector.shape_cast %278 : vector<1x32x32xf32> to vector<32x32xf32>
    %cst_153 = arith.constant dense<0.000000e+00> : vector<32x256xf32>
    %280 = tpu.matmul %279, %228, %cst_153 {dimension_numbers = #tpu.dot_dimension_numbers<[1], [0], [0], [1], [0, 0, 1, 1], [], []>} : vector<32x32xf32>, vector<32x256xf32>, vector<32x256xf32> -> vector<32x256xf32>
    %281 = arith.addf %277, %280 : vector<32x256xf32>
    %c255_i32_154 = arith.constant 255 : i32
    %282 = tpu.dynamic_rotate %228 by %c255_i32_154 dim 1 : vector<32x256xf32>, i32 -> vector<32x256xf32>
    %cst_155 = arith.constant 0.000000e+00 : f32
    %283 = vector.shape_cast %18 : vector<1x256xi1> to vector<1x256xi1>
    %284 = vector.broadcast %283 : vector<1x256xi1> to vector<32x256xi1>
    %285 = vector.broadcast %cst_155 : f32 to vector<32x256xf32>
    %286 = arith.select %284, %282, %285 : vector<32x256xi1>, vector<32x256xf32>
    %c5_156 = arith.constant 5 : index
    %c0_157 = arith.constant 0 : index
    %c0_158 = arith.constant 0 : index
    %287 = vector.load %arg6[%c5_156, %c0_157, %c0_158] : memref<9x32x32xf32, #tpu.memory_space<vmem>>, vector<1x32x32xf32>
    %288 = vector.shape_cast %287 : vector<1x32x32xf32> to vector<32x32xf32>
    %cst_159 = arith.constant dense<0.000000e+00> : vector<32x256xf32>
    %289 = tpu.matmul %288, %286, %cst_159 {dimension_numbers = #tpu.dot_dimension_numbers<[1], [0], [0], [1], [0, 0, 1, 1], [], []>} : vector<32x32xf32>, vector<32x256xf32>, vector<32x256xf32> -> vector<32x256xf32>
    %290 = arith.addf %281, %289 : vector<32x256xf32>
    %c241_i32_160 = arith.constant 241 : i32
    %291 = tpu.dynamic_rotate %228 by %c241_i32_160 dim 1 : vector<32x256xf32>, i32 -> vector<32x256xf32>
    %cst_161 = arith.constant 0.000000e+00 : f32
    %292 = vector.shape_cast %23 : vector<1x256xi1> to vector<1x256xi1>
    %293 = vector.broadcast %292 : vector<1x256xi1> to vector<32x256xi1>
    %294 = vector.broadcast %cst_161 : f32 to vector<32x256xf32>
    %295 = arith.select %293, %291, %294 : vector<32x256xi1>, vector<32x256xf32>
    %c6_162 = arith.constant 6 : index
    %c0_163 = arith.constant 0 : index
    %c0_164 = arith.constant 0 : index
    %296 = vector.load %arg6[%c6_162, %c0_163, %c0_164] : memref<9x32x32xf32, #tpu.memory_space<vmem>>, vector<1x32x32xf32>
    %297 = vector.shape_cast %296 : vector<1x32x32xf32> to vector<32x32xf32>
    %cst_165 = arith.constant dense<0.000000e+00> : vector<32x256xf32>
    %298 = tpu.matmul %297, %295, %cst_165 {dimension_numbers = #tpu.dot_dimension_numbers<[1], [0], [0], [1], [0, 0, 1, 1], [], []>} : vector<32x32xf32>, vector<32x256xf32>, vector<32x256xf32> -> vector<32x256xf32>
    %299 = arith.addf %290, %298 : vector<32x256xf32>
    %c240_i32_166 = arith.constant 240 : i32
    %300 = tpu.dynamic_rotate %228 by %c240_i32_166 dim 1 : vector<32x256xf32>, i32 -> vector<32x256xf32>
    %cst_167 = arith.constant 0.000000e+00 : f32
    %301 = vector.shape_cast %25 : vector<1x256xi1> to vector<1x256xi1>
    %302 = vector.broadcast %301 : vector<1x256xi1> to vector<32x256xi1>
    %303 = vector.broadcast %cst_167 : f32 to vector<32x256xf32>
    %304 = arith.select %302, %300, %303 : vector<32x256xi1>, vector<32x256xf32>
    %c7_168 = arith.constant 7 : index
    %c0_169 = arith.constant 0 : index
    %c0_170 = arith.constant 0 : index
    %305 = vector.load %arg6[%c7_168, %c0_169, %c0_170] : memref<9x32x32xf32, #tpu.memory_space<vmem>>, vector<1x32x32xf32>
    %306 = vector.shape_cast %305 : vector<1x32x32xf32> to vector<32x32xf32>
    %cst_171 = arith.constant dense<0.000000e+00> : vector<32x256xf32>
    %307 = tpu.matmul %306, %304, %cst_171 {dimension_numbers = #tpu.dot_dimension_numbers<[1], [0], [0], [1], [0, 0, 1, 1], [], []>} : vector<32x32xf32>, vector<32x256xf32>, vector<32x256xf32> -> vector<32x256xf32>
    %308 = arith.addf %299, %307 : vector<32x256xf32>
    %c239_i32_172 = arith.constant 239 : i32
    %309 = tpu.dynamic_rotate %228 by %c239_i32_172 dim 1 : vector<32x256xf32>, i32 -> vector<32x256xf32>
    %cst_173 = arith.constant 0.000000e+00 : f32
    %310 = vector.shape_cast %30 : vector<1x256xi1> to vector<1x256xi1>
    %311 = vector.broadcast %310 : vector<1x256xi1> to vector<32x256xi1>
    %312 = vector.broadcast %cst_173 : f32 to vector<32x256xf32>
    %313 = arith.select %311, %309, %312 : vector<32x256xi1>, vector<32x256xf32>
    %c8_174 = arith.constant 8 : index
    %c0_175 = arith.constant 0 : index
    %c0_176 = arith.constant 0 : index
    %314 = vector.load %arg6[%c8_174, %c0_175, %c0_176] : memref<9x32x32xf32, #tpu.memory_space<vmem>>, vector<1x32x32xf32>
    %315 = vector.shape_cast %314 : vector<1x32x32xf32> to vector<32x32xf32>
    %cst_177 = arith.constant dense<0.000000e+00> : vector<32x256xf32>
    %316 = tpu.matmul %315, %313, %cst_177 {dimension_numbers = #tpu.dot_dimension_numbers<[1], [0], [0], [1], [0, 0, 1, 1], [], []>} : vector<32x32xf32>, vector<32x256xf32>, vector<32x256xf32> -> vector<32x256xf32>
    %317 = arith.addf %308, %316 : vector<32x256xf32>
    %c17_i32_178 = arith.constant 17 : i32
    %318 = tpu.dynamic_rotate %242 by %c17_i32_178 dim 1 : vector<32x256xf32>, i32 -> vector<32x256xf32>
    %cst_179 = arith.constant 0.000000e+00 : f32
    %319 = vector.shape_cast %7 : vector<1x256xi1> to vector<1x256xi1>
    %320 = vector.broadcast %319 : vector<1x256xi1> to vector<32x256xi1>
    %321 = vector.broadcast %cst_179 : f32 to vector<32x256xf32>
    %322 = arith.select %320, %318, %321 : vector<32x256xi1>, vector<32x256xf32>
    %c0_180 = arith.constant 0 : index
    %c0_181 = arith.constant 0 : index
    %c0_182 = arith.constant 0 : index
    %323 = vector.load %arg6[%c0_180, %c0_181, %c0_182] : memref<9x32x32xf32, #tpu.memory_space<vmem>>, vector<1x32x32xf32>
    %324 = vector.shape_cast %323 : vector<1x32x32xf32> to vector<32x32xf32>
    %cst_183 = arith.constant dense<0.000000e+00> : vector<32x256xf32>
    %325 = tpu.matmul %324, %322, %cst_183 {dimension_numbers = #tpu.dot_dimension_numbers<[1], [0], [0], [1], [0, 0, 1, 1], [], []>} : vector<32x32xf32>, vector<32x256xf32>, vector<32x256xf32> -> vector<32x256xf32>
    %c16_i32_184 = arith.constant 16 : i32
    %326 = tpu.dynamic_rotate %242 by %c16_i32_184 dim 1 : vector<32x256xf32>, i32 -> vector<32x256xf32>
    %cst_185 = arith.constant 0.000000e+00 : f32
    %327 = vector.shape_cast %9 : vector<1x256xi1> to vector<1x256xi1>
    %328 = vector.broadcast %327 : vector<1x256xi1> to vector<32x256xi1>
    %329 = vector.broadcast %cst_185 : f32 to vector<32x256xf32>
    %330 = arith.select %328, %326, %329 : vector<32x256xi1>, vector<32x256xf32>
    %c1_186 = arith.constant 1 : index
    %c0_187 = arith.constant 0 : index
    %c0_188 = arith.constant 0 : index
    %331 = vector.load %arg6[%c1_186, %c0_187, %c0_188] : memref<9x32x32xf32, #tpu.memory_space<vmem>>, vector<1x32x32xf32>
    %332 = vector.shape_cast %331 : vector<1x32x32xf32> to vector<32x32xf32>
    %cst_189 = arith.constant dense<0.000000e+00> : vector<32x256xf32>
    %333 = tpu.matmul %332, %330, %cst_189 {dimension_numbers = #tpu.dot_dimension_numbers<[1], [0], [0], [1], [0, 0, 1, 1], [], []>} : vector<32x32xf32>, vector<32x256xf32>, vector<32x256xf32> -> vector<32x256xf32>
    %334 = arith.addf %325, %333 : vector<32x256xf32>
    %c15_i32_190 = arith.constant 15 : i32
    %335 = tpu.dynamic_rotate %242 by %c15_i32_190 dim 1 : vector<32x256xf32>, i32 -> vector<32x256xf32>
    %cst_191 = arith.constant 0.000000e+00 : f32
    %336 = vector.shape_cast %14 : vector<1x256xi1> to vector<1x256xi1>
    %337 = vector.broadcast %336 : vector<1x256xi1> to vector<32x256xi1>
    %338 = vector.broadcast %cst_191 : f32 to vector<32x256xf32>
    %339 = arith.select %337, %335, %338 : vector<32x256xi1>, vector<32x256xf32>
    %c2_192 = arith.constant 2 : index
    %c0_193 = arith.constant 0 : index
    %c0_194 = arith.constant 0 : index
    %340 = vector.load %arg6[%c2_192, %c0_193, %c0_194] : memref<9x32x32xf32, #tpu.memory_space<vmem>>, vector<1x32x32xf32>
    %341 = vector.shape_cast %340 : vector<1x32x32xf32> to vector<32x32xf32>
    %cst_195 = arith.constant dense<0.000000e+00> : vector<32x256xf32>
    %342 = tpu.matmul %341, %339, %cst_195 {dimension_numbers = #tpu.dot_dimension_numbers<[1], [0], [0], [1], [0, 0, 1, 1], [], []>} : vector<32x32xf32>, vector<32x256xf32>, vector<32x256xf32> -> vector<32x256xf32>
    %343 = arith.addf %334, %342 : vector<32x256xf32>
    %c1_i32_196 = arith.constant 1 : i32
    %344 = tpu.dynamic_rotate %242 by %c1_i32_196 dim 1 : vector<32x256xf32>, i32 -> vector<32x256xf32>
    %cst_197 = arith.constant 0.000000e+00 : f32
    %345 = vector.shape_cast %16 : vector<1x256xi1> to vector<1x256xi1>
    %346 = vector.broadcast %345 : vector<1x256xi1> to vector<32x256xi1>
    %347 = vector.broadcast %cst_197 : f32 to vector<32x256xf32>
    %348 = arith.select %346, %344, %347 : vector<32x256xi1>, vector<32x256xf32>
    %c3_198 = arith.constant 3 : index
    %c0_199 = arith.constant 0 : index
    %c0_200 = arith.constant 0 : index
    %349 = vector.load %arg6[%c3_198, %c0_199, %c0_200] : memref<9x32x32xf32, #tpu.memory_space<vmem>>, vector<1x32x32xf32>
    %350 = vector.shape_cast %349 : vector<1x32x32xf32> to vector<32x32xf32>
    %cst_201 = arith.constant dense<0.000000e+00> : vector<32x256xf32>
    %351 = tpu.matmul %350, %348, %cst_201 {dimension_numbers = #tpu.dot_dimension_numbers<[1], [0], [0], [1], [0, 0, 1, 1], [], []>} : vector<32x32xf32>, vector<32x256xf32>, vector<32x256xf32> -> vector<32x256xf32>
    %352 = arith.addf %343, %351 : vector<32x256xf32>
    %c4_202 = arith.constant 4 : index
    %c0_203 = arith.constant 0 : index
    %c0_204 = arith.constant 0 : index
    %353 = vector.load %arg6[%c4_202, %c0_203, %c0_204] : memref<9x32x32xf32, #tpu.memory_space<vmem>>, vector<1x32x32xf32>
    %354 = vector.shape_cast %353 : vector<1x32x32xf32> to vector<32x32xf32>
    %cst_205 = arith.constant dense<0.000000e+00> : vector<32x256xf32>
    %355 = tpu.matmul %354, %242, %cst_205 {dimension_numbers = #tpu.dot_dimension_numbers<[1], [0], [0], [1], [0, 0, 1, 1], [], []>} : vector<32x32xf32>, vector<32x256xf32>, vector<32x256xf32> -> vector<32x256xf32>
    %356 = arith.addf %352, %355 : vector<32x256xf32>
    %c255_i32_206 = arith.constant 255 : i32
    %357 = tpu.dynamic_rotate %242 by %c255_i32_206 dim 1 : vector<32x256xf32>, i32 -> vector<32x256xf32>
    %cst_207 = arith.constant 0.000000e+00 : f32
    %358 = vector.shape_cast %18 : vector<1x256xi1> to vector<1x256xi1>
    %359 = vector.broadcast %358 : vector<1x256xi1> to vector<32x256xi1>
    %360 = vector.broadcast %cst_207 : f32 to vector<32x256xf32>
    %361 = arith.select %359, %357, %360 : vector<32x256xi1>, vector<32x256xf32>
    %c5_208 = arith.constant 5 : index
    %c0_209 = arith.constant 0 : index
    %c0_210 = arith.constant 0 : index
    %362 = vector.load %arg6[%c5_208, %c0_209, %c0_210] : memref<9x32x32xf32, #tpu.memory_space<vmem>>, vector<1x32x32xf32>
    %363 = vector.shape_cast %362 : vector<1x32x32xf32> to vector<32x32xf32>
    %cst_211 = arith.constant dense<0.000000e+00> : vector<32x256xf32>
    %364 = tpu.matmul %363, %361, %cst_211 {dimension_numbers = #tpu.dot_dimension_numbers<[1], [0], [0], [1], [0, 0, 1, 1], [], []>} : vector<32x32xf32>, vector<32x256xf32>, vector<32x256xf32> -> vector<32x256xf32>
    %365 = arith.addf %356, %364 : vector<32x256xf32>
    %c241_i32_212 = arith.constant 241 : i32
    %366 = tpu.dynamic_rotate %242 by %c241_i32_212 dim 1 : vector<32x256xf32>, i32 -> vector<32x256xf32>
    %cst_213 = arith.constant 0.000000e+00 : f32
    %367 = vector.shape_cast %23 : vector<1x256xi1> to vector<1x256xi1>
    %368 = vector.broadcast %367 : vector<1x256xi1> to vector<32x256xi1>
    %369 = vector.broadcast %cst_213 : f32 to vector<32x256xf32>
    %370 = arith.select %368, %366, %369 : vector<32x256xi1>, vector<32x256xf32>
    %c6_214 = arith.constant 6 : index
    %c0_215 = arith.constant 0 : index
    %c0_216 = arith.constant 0 : index
    %371 = vector.load %arg6[%c6_214, %c0_215, %c0_216] : memref<9x32x32xf32, #tpu.memory_space<vmem>>, vector<1x32x32xf32>
    %372 = vector.shape_cast %371 : vector<1x32x32xf32> to vector<32x32xf32>
    %cst_217 = arith.constant dense<0.000000e+00> : vector<32x256xf32>
    %373 = tpu.matmul %372, %370, %cst_217 {dimension_numbers = #tpu.dot_dimension_numbers<[1], [0], [0], [1], [0, 0, 1, 1], [], []>} : vector<32x32xf32>, vector<32x256xf32>, vector<32x256xf32> -> vector<32x256xf32>
    %374 = arith.addf %365, %373 : vector<32x256xf32>
    %c240_i32_218 = arith.constant 240 : i32
    %375 = tpu.dynamic_rotate %242 by %c240_i32_218 dim 1 : vector<32x256xf32>, i32 -> vector<32x256xf32>
    %cst_219 = arith.constant 0.000000e+00 : f32
    %376 = vector.shape_cast %25 : vector<1x256xi1> to vector<1x256xi1>
    %377 = vector.broadcast %376 : vector<1x256xi1> to vector<32x256xi1>
    %378 = vector.broadcast %cst_219 : f32 to vector<32x256xf32>
    %379 = arith.select %377, %375, %378 : vector<32x256xi1>, vector<32x256xf32>
    %c7_220 = arith.constant 7 : index
    %c0_221 = arith.constant 0 : index
    %c0_222 = arith.constant 0 : index
    %380 = vector.load %arg6[%c7_220, %c0_221, %c0_222] : memref<9x32x32xf32, #tpu.memory_space<vmem>>, vector<1x32x32xf32>
    %381 = vector.shape_cast %380 : vector<1x32x32xf32> to vector<32x32xf32>
    %cst_223 = arith.constant dense<0.000000e+00> : vector<32x256xf32>
    %382 = tpu.matmul %381, %379, %cst_223 {dimension_numbers = #tpu.dot_dimension_numbers<[1], [0], [0], [1], [0, 0, 1, 1], [], []>} : vector<32x32xf32>, vector<32x256xf32>, vector<32x256xf32> -> vector<32x256xf32>
    %383 = arith.addf %374, %382 : vector<32x256xf32>
    %c239_i32_224 = arith.constant 239 : i32
    %384 = tpu.dynamic_rotate %242 by %c239_i32_224 dim 1 : vector<32x256xf32>, i32 -> vector<32x256xf32>
    %cst_225 = arith.constant 0.000000e+00 : f32
    %385 = vector.shape_cast %30 : vector<1x256xi1> to vector<1x256xi1>
    %386 = vector.broadcast %385 : vector<1x256xi1> to vector<32x256xi1>
    %387 = vector.broadcast %cst_225 : f32 to vector<32x256xf32>
    %388 = arith.select %386, %384, %387 : vector<32x256xi1>, vector<32x256xf32>
    %c8_226 = arith.constant 8 : index
    %c0_227 = arith.constant 0 : index
    %c0_228 = arith.constant 0 : index
    %389 = vector.load %arg6[%c8_226, %c0_227, %c0_228] : memref<9x32x32xf32, #tpu.memory_space<vmem>>, vector<1x32x32xf32>
    %390 = vector.shape_cast %389 : vector<1x32x32xf32> to vector<32x32xf32>
    %cst_229 = arith.constant dense<0.000000e+00> : vector<32x256xf32>
    %391 = tpu.matmul %390, %388, %cst_229 {dimension_numbers = #tpu.dot_dimension_numbers<[1], [0], [0], [1], [0, 0, 1, 1], [], []>} : vector<32x32xf32>, vector<32x256xf32>, vector<32x256xf32> -> vector<32x256xf32>
    %392 = arith.addf %383, %391 : vector<32x256xf32>
    %cst_230 = arith.constant dense<0.000000e+00> : vector<32xf32>
    %393 = vector.multi_reduction <add>, %317, %cst_230 [1] : vector<32x256xf32> to vector<32xf32>
    %394 = vector.shape_cast %393 : vector<32xf32> to vector<32x1xf32>
    %cst_231 = arith.constant 0.000000e+00 : f32
    %395 = vector.broadcast %cst_231 : f32 to vector<32x1xf32>
    %396 = arith.addf %395, %394 : vector<32x1xf32>
    %cst_232 = arith.constant dense<0.000000e+00> : vector<32xf32>
    %397 = vector.multi_reduction <add>, %392, %cst_232 [1] : vector<32x256xf32> to vector<32xf32>
    %398 = vector.shape_cast %397 : vector<32xf32> to vector<32x1xf32>
    %399 = arith.addf %396, %398 : vector<32x1xf32>
    %400 = arith.mulf %317, %317 : vector<32x256xf32>
    %cst_233 = arith.constant dense<0.000000e+00> : vector<32xf32>
    %401 = vector.multi_reduction <add>, %400, %cst_233 [1] : vector<32x256xf32> to vector<32xf32>
    %402 = vector.shape_cast %401 : vector<32xf32> to vector<32x1xf32>
    %cst_234 = arith.constant 0.000000e+00 : f32
    %403 = vector.broadcast %cst_234 : f32 to vector<32x1xf32>
    %404 = arith.addf %403, %402 : vector<32x1xf32>
    %405 = arith.mulf %392, %392 : vector<32x256xf32>
    %cst_235 = arith.constant dense<0.000000e+00> : vector<32xf32>
    %406 = vector.multi_reduction <add>, %405, %cst_235 [1] : vector<32x256xf32> to vector<32xf32>
    %407 = vector.shape_cast %406 : vector<32xf32> to vector<32x1xf32>
    %408 = arith.addf %404, %407 : vector<32x1xf32>
    %cst_236 = arith.constant 0.001953125 : f32
    %409 = vector.broadcast %cst_236 : f32 to vector<32x1xf32>
    %410 = arith.mulf %399, %409 : vector<32x1xf32>
    %cst_237 = arith.constant 0.001953125 : f32
    %411 = vector.broadcast %cst_237 : f32 to vector<32x1xf32>
    %412 = arith.mulf %408, %411 : vector<32x1xf32>
    %413 = arith.mulf %410, %410 : vector<32x1xf32>
    %414 = arith.subf %412, %413 : vector<32x1xf32>
    %c0_238 = arith.constant 0 : index
    %c0_239 = arith.constant 0 : index
    %415 = vector.load %arg7[%c0_238, %c0_239] : memref<32x1xf32, #tpu.memory_space<vmem>>, vector<32x1xf32>
    %cst_240 = arith.constant 9.99999974E-6 : f32
    %416 = vector.broadcast %cst_240 : f32 to vector<32x1xf32>
    %417 = arith.addf %414, %416 : vector<32x1xf32>
    %418 = math.rsqrt %417 : vector<32x1xf32>
    %419 = arith.mulf %415, %418 : vector<32x1xf32>
    %c0_241 = arith.constant 0 : index
    %c0_242 = arith.constant 0 : index
    %420 = vector.load %arg8[%c0_241, %c0_242] : memref<32x1xf32, #tpu.memory_space<vmem>>, vector<32x1xf32>
    %421 = arith.mulf %410, %419 : vector<32x1xf32>
    %422 = arith.subf %420, %421 : vector<32x1xf32>
    %423 = vector.broadcast %419 : vector<32x1xf32> to vector<32x256xf32>
    %424 = arith.mulf %317, %423 : vector<32x256xf32>
    %425 = vector.broadcast %422 : vector<32x1xf32> to vector<32x256xf32>
    %426 = arith.addf %424, %425 : vector<32x256xf32>
    %427 = arith.addf %426, %32 : vector<32x256xf32>
    %cst_243 = arith.constant 0.000000e+00 : f32
    %428 = vector.broadcast %cst_243 : f32 to vector<32x256xf32>
    %429 = arith.cmpf ogt, %427, %428 : vector<32x256xf32>
    %430 = math.exp %427 : vector<32x256xf32>
    %cst_244 = arith.constant 1.000000e+00 : f32
    %431 = vector.broadcast %cst_244 : f32 to vector<32x256xf32>
    %432 = arith.subf %430, %431 : vector<32x256xf32>
    %cst_245 = arith.constant 1.67326319 : f32
    %433 = vector.broadcast %cst_245 : f32 to vector<32x256xf32>
    %434 = arith.mulf %433, %432 : vector<32x256xf32>
    %435 = arith.select %429, %427, %434 : vector<32x256xi1>, vector<32x256xf32>
    %cst_246 = arith.constant 1.05070102 : f32
    %436 = vector.broadcast %cst_246 : f32 to vector<32x256xf32>
    %437 = arith.mulf %436, %435 : vector<32x256xf32>
    %c0_247 = arith.constant 0 : index
    %c0_248 = arith.constant 0 : index
    %c0_249 = arith.constant 0 : index
    %438 = vector.load %arg9[%c0_247, %c0_248, %c0_249] : memref<2x32x256xf32, #tpu.memory_space<vmem>>, vector<1x32x256xf32>
    %439 = vector.shape_cast %438 : vector<1x32x256xf32> to vector<32x256xf32>
    %440 = vector.shape_cast %437 : vector<32x256xf32> to vector<1x32x256xf32>
    tpu.vector_store %arg9[%c0_247, %c0_248, %c0_249], %440 {strides = array<i32>} : memref<2x32x256xf32, #tpu.memory_space<vmem>>, vector<1x32x256xf32>,
    %441 = vector.broadcast %419 : vector<32x1xf32> to vector<32x256xf32>
    %442 = arith.mulf %392, %441 : vector<32x256xf32>
    %443 = vector.broadcast %422 : vector<32x1xf32> to vector<32x256xf32>
    %444 = arith.addf %442, %443 : vector<32x256xf32>
    %445 = arith.addf %444, %34 : vector<32x256xf32>
    %cst_250 = arith.constant 0.000000e+00 : f32
    %446 = vector.broadcast %cst_250 : f32 to vector<32x256xf32>
    %447 = arith.cmpf ogt, %445, %446 : vector<32x256xf32>
    %448 = math.exp %445 : vector<32x256xf32>
    %cst_251 = arith.constant 1.000000e+00 : f32
    %449 = vector.broadcast %cst_251 : f32 to vector<32x256xf32>
    %450 = arith.subf %448, %449 : vector<32x256xf32>
    %cst_252 = arith.constant 1.67326319 : f32
    %451 = vector.broadcast %cst_252 : f32 to vector<32x256xf32>
    %452 = arith.mulf %451, %450 : vector<32x256xf32>
    %453 = arith.select %447, %445, %452 : vector<32x256xi1>, vector<32x256xf32>
    %cst_253 = arith.constant 1.05070102 : f32
    %454 = vector.broadcast %cst_253 : f32 to vector<32x256xf32>
    %455 = arith.mulf %454, %453 : vector<32x256xf32>
    %c1_254 = arith.constant 1 : index
    %c0_255 = arith.constant 0 : index
    %c0_256 = arith.constant 0 : index
    %456 = vector.load %arg9[%c1_254, %c0_255, %c0_256] : memref<2x32x256xf32, #tpu.memory_space<vmem>>, vector<1x32x256xf32>
    %457 = vector.shape_cast %456 : vector<1x32x256xf32> to vector<32x256xf32>
    %458 = vector.shape_cast %455 : vector<32x256xf32> to vector<1x32x256xf32>
    tpu.vector_store %arg9[%c1_254, %c0_255, %c0_256], %458 {strides = array<i32>} : memref<2x32x256xf32, #tpu.memory_space<vmem>>, vector<1x32x256xf32>,
    return
  }
  func.func @transform_0(%arg0: i32) -> (i32, i32) {
    %c0_i32 = arith.constant 0 : i32
    %c0_i32_0 = arith.constant 0 : i32
    %c0_i32_1 = arith.constant 0 : i32
    return %c0_i32, %c0_i32_0 : i32, i32
  }
  func.func @transform_1(%arg0: i32) -> (i32, i32, i32) {
    %c0_i32 = arith.constant 0 : i32
    %c0_i32_0 = arith.constant 0 : i32
    %c0_i32_1 = arith.constant 0 : i32
    %c0_i32_2 = arith.constant 0 : i32
    return %c0_i32, %c0_i32_0, %c0_i32_1 : i32, i32, i32
  }
  func.func @transform_2(%arg0: i32) -> (i32, i32, i32) {
    %c0_i32 = arith.constant 0 : i32
    %c0_i32_0 = arith.constant 0 : i32
    %c0_i32_1 = arith.constant 0 : i32
    %c0_i32_2 = arith.constant 0 : i32
    return %c0_i32, %c0_i32_0, %c0_i32_1 : i32, i32, i32
  }
  func.func @transform_3(%arg0: i32) -> (i32, i32) {
    %c0_i32 = arith.constant 0 : i32
    %c0_i32_0 = arith.constant 0 : i32
    %c0_i32_1 = arith.constant 0 : i32
    return %c0_i32, %c0_i32_0 : i32, i32
  }
  func.func @transform_4(%arg0: i32) -> (i32, i32) {
    %c0_i32 = arith.constant 0 : i32
    %c0_i32_0 = arith.constant 0 : i32
    %c0_i32_1 = arith.constant 0 : i32
    return %c0_i32, %c0_i32_0 : i32, i32
  }
  func.func @transform_5(%arg0: i32) -> (i32, i32, i32) {
    %c0_i32 = arith.constant 0 : i32
    %c0_i32_0 = arith.constant 0 : i32
    %c0_i32_1 = arith.constant 0 : i32
    %c0_i32_2 = arith.constant 0 : i32
    return %c0_i32, %c0_i32_0, %c0_i32_1 : i32, i32, i32
  }
  func.func @transform_6(%arg0: i32) -> (i32, i32) {
    %c0_i32 = arith.constant 0 : i32
    %c0_i32_0 = arith.constant 0 : i32
    %c0_i32_1 = arith.constant 0 : i32
    return %c0_i32, %c0_i32_0 : i32, i32
  }
  func.func @transform_7(%arg0: i32) -> (i32, i32) {
    %c0_i32 = arith.constant 0 : i32
    %c0_i32_0 = arith.constant 0 : i32
    %c0_i32_1 = arith.constant 0 : i32
    return %c0_i32, %c0_i32_0 : i32, i32
  }
  func.func @transform_8(%arg0: i32) -> (i32, i32, i32) {
    %c0_i32 = arith.constant 0 : i32
    %c0_i32_0 = arith.constant 0 : i32
    %c0_i32_1 = arith.constant 0 : i32
    %c0_i32_2 = arith.constant 0 : i32
    return %c0_i32, %c0_i32_0, %c0_i32_1 : i32, i32, i32
  }
}

</mosaic_0001>

<bundles_post_ra>
// kernel: residual_block_pallas.1
= control target key start
LH: loop header
LB: loop body
LE: loop exit
PB: predicated region body
PF: predicated region fallthrough
CT: control target
= control target key end

     0   :  { %v7569_v3 = vmov 0   ;;  %s7570_s21 = smov 16   ;;  %s7571_s16 = smov 17   ;;  %v7572_v25 = vmov 0.0   ;;  %v77_v26 = vlaneseq  ;;  %vm10507_vm11 = vcmask 261120   ;;  %s10491_s1 = inlined_call_operand.vmem [shape: f32[2,32,256], index: 1, kind: input, shape index: {}]   ;;  %s10492_s0 = inlined_call_operand.vmem [shape: s32[2,256], index: 0, kind: input, shape index: {}]   ;;  %s10493_s2 = inlined_call_operand.vmem [shape: f32[9,32,32], index: 2, kind: input, shape index: {}]   ;;  %s10494_s3 = inlined_call_operand.vmem [shape: f32[32,1], index: 3, kind: input, shape index: {}]   ;;  %s10495_s4 = inlined_call_operand.vmem [shape: f32[32,1], index: 4, kind: input, shape index: {}]   ;;  %s10496_s5 = inlined_call_operand.vmem [shape: f32[9,32,32], index: 5, kind: input, shape index: {}]   ;;  %s10497_s6 = inlined_call_operand.vmem [shape: f32[32,1], index: 6, kind: input, shape index: {}]   ;;  %s10498_s7 = inlined_call_operand.vmem [shape: f32[32,1], index: 7, kind: input, shape index: {}]   ;;  %s10499_s8 = inlined_call_operand.vmem [shape: f32[2,32,256], index: 8, kind: output, shape index: {}]  }
   0x1   :  { %v5631_v0 = vld [vmem:[%s10491_s1 + $0x40] sm:$0xff]  ;;  %v5633_v1 = vld [vmem:[%s10491_s1 + $0x50] sm:$0xff]  ;;  %7145 = vset.pattern.permute.xlu1 %v7569_v3  ;;  %7146 = vset.pattern.permute.xlu0 %v7569_v3  ;;  %v7647_v6 = vld [vmem:[%s10491_s1 + $0x48] sm:$0xff]  ;;  %s7573_s17 = smov 15   ;;  %s7574_s18 = smov 1  }
   0x2   :  { %v7633_v2 = vld [vmem:[%s10491_s1] sm:$0xff]  ;;  %v7637_v4 = vpack.i.bf16 %v5633_v1, %v5631_v0  ;;  %v7642_v5 = vld [vmem:[%s10491_s1 + $0x10] sm:$0xff]  ;;  %v7652_v7 = vld [vmem:[%s10491_s1 + $0x58] sm:$0xff]  ;;  %252 = vmatprep.mubr.f32.mxu0 %v7572_v25  ;;  %1613 = vmatprep.mubr.f32.mxu1 %v7572_v25  ;;  %s7575_s19 = smov 127   ;;  %s7576_s20 = smov 113   ;;  %v7832_v28 = vshrl.u32 %v77_v26, 7 }
   0x3   :  { %v7656_v8 = vpack.i.bf16 %v7642_v5, %v7633_v2  ;;  %v7661_v9 = vld [vmem:[%s10491_s1 + $0x8] sm:$0xff]  ;;  %v7666_v10 = vld [vmem:[%s10491_s1 + $0x18] sm:$0xff]  ;;  %v7672_v11 = vpack.i.bf16 %v7652_v7, %v7647_v6  ;;  %v48_v15 = vld [vmem:[%s10491_s1 + $0x20] sm:$0xff]  ;;  %s7577_s22 = smov 112   ;;  %v7869_v36 = vand.u32 127, %v77_v26 }
   0x4   :  { %6836 = vrot.lane.b32.xlu1 %v7637_v4, %s7570_s21  ;;  %v7678_v12 = vpack.i.bf16 %v7666_v10, %v7661_v9  ;;  %v7683_v13 = vld [vmem:[%s10491_s1 + $0x28] sm:$0xff]  ;;  %v7688_v14 = vld [vmem:[%s10491_s1 + $0x38] sm:$0xff]  ;;  %v50_v16 = vld [vmem:[%s10491_s1 + $0x30] sm:$0xff]  ;;  %v7845_v31 = vsub.s32 0, %v7832_v28  ;;  %v7848_v32 = vsub.s32 2, %v7832_v28 }
   0x5   :  { %6826 = vrot.lane.b32.xlu0 %v7656_v8, %s7570_s21  ;;  %v7700_v17 = vpack.i.bf16 %v7688_v14, %v7683_v13  ;;  %v7704_v18 = vpack.i.bf16 %v50_v16, %v48_v15  ;;  %v7709_v19 = vld [vmem:[%s10491_s1 + $0x68] sm:$0xff]  ;;  %v7714_v20 = vld [vmem:[%s10491_s1 + $0x78] sm:$0xff]  ;;  %v5635_v21 = vld [vmem:[%s10491_s1 + $0x60] sm:$0xff]  ;;  %vm10503_vm4 = vcmp.lt.s32.totalorder %v7869_v36, 16  ;;  %vm10502_vm10 = vcmp.lt.s32.totalorder %v7869_v36, 17 }
   0x6   :  { %v5637_v22 = vld [vmem:[%s10491_s1 + $0x70] sm:$0xff]  ;;  %v7726_v23 = vpack.i.bf16 %v7714_v20, %v7709_v19  ;;  %v7825_v27 = vld [vmem:[%s10492_s0] sm:$0xf]  ;;  %s7578_s0 = smov 111   ;;  %v5888_v55 = vld [vmem:[%s10496_s5 + $0x28] sm:$0xff] }
   0x7   :  { %v7730_v24 = vpack.i.bf16 %v5637_v22, %v5635_v21  ;;  %vm30_vm0 = vcmp.ge.s32.totalorder %v7825_v27, 1  ;;  %vm10505_vm2 = vcmp.le.s32.totalorder %v7825_v27, 14 }
   0x8   :  { %6841 = vrot.lane.b32.xlu1 %v7672_v11, %s7570_s21  ;;  %v7839_v29 = vsel %vm30_vm0, 1, %v7569_v3  ;;  %v7881_v42 = vsel %vm10505_vm2, 1, %v7569_v3 }
   0x9   :  { %6831 = vrot.lane.b32.xlu0 %v7678_v12, %s7570_s21  ;;  %v5629_v30 = vrot.slane %v7839_v29, 9  ;;  %v151_v34 = vrot.slane %v7839_v29, %v7848_v32  ;;  %v147_v35 = vrot.slane %v7839_v29, %v7845_v31  ;;  %v5630_v45 = vrot.slane %v7881_v42, 9 }
   0xb   :  { %vm7854_vm1 = vcmp.ne.s32.totalorder %v5629_v30, 0  ;;  %v159_v38 = vrot.slane %v151_v34, %v7845_v31  ;;  %v155_v39 = vrot.slane %v147_v35, %v7845_v31  ;;  %vm7932_vm9 = vcmp.ne.s32.totalorder %v5630_v45, 0 }
   0xc   :  { %6851 = vrot.lane.b32.xlu1 %v7700_v17, %s7570_s21  ;;  %vm35_vm3 = vmand %vm30_vm0, %vm7854_vm1 }
   0xd   :  { %6846 = vrot.lane.b32.xlu0 %v7704_v18, %s7570_s21  ;;  %v7876_v41 = vsel %vm35_vm3, 1, %v7569_v3  ;;  %vm161_vm5 = vcmp.eq.s32.totalorder %v159_v38, 1  ;;  %vm160_vm6 = vcmp.eq.s32.totalorder %v155_v39, 1  ;;  %vm41_vm13 = vmand %vm30_vm0, %vm7932_vm9  ;;  %vm10500_vm3 = vcmp.lt.s32.totalorder %v7869_v36, 15 }
   0xe   :  { %v96_v44 = vrot.slane %v7876_v41, %v7848_v32  ;;  %vm7893_vm7 = vmpackc.low %vm161_vm5, %vm161_vm5  ;;  %v92_v26 = vrot.slane %v7876_v41, %v7845_v31 }
   0xf   :  { %vm7917_vm8 = vmpackc.low %vm160_vm6, %vm160_vm6 }
  0x10   :  { %6861 = vrot.lane.b32.xlu1 %v7726_v23, %s7570_s21  ;;  %v104_v22 = vrot.slane %v96_v44, %v7845_v31 }
  0x11   :  { %6856 = vrot.lane.b32.xlu0 %v7730_v24, %s7570_s21 }
  0x12   :  { %vm106_vm12 = vcmp.eq.s32.totalorder %v104_v22, 1 }
  0x13   :  { %vm7990_vm15 = vmpackc.low %vm106_vm12, %vm106_vm12 }
  0x14   :  { %6871 = vrot.lane.b32.xlu1 %v7678_v12, %s7571_s16 }
  0x15   :  { %6866 = vrot.lane.b32.xlu0 %v7656_v8, %s7571_s16 }
  0x18   :  { %6881 = vrot.lane.b32.xlu1 %v7672_v11, %s7571_s16 }
  0x19   :  { %6876 = vrot.lane.b32.xlu0 %v7637_v4, %s7571_s16 }
  0x1c   :  { %6891 = vrot.lane.b32.xlu1 %v7700_v17, %s7571_s16 }
  0x1d   :  { %6886 = vrot.lane.b32.xlu0 %v7704_v18, %s7571_s16 }
  0x20   :  { %6901 = vrot.lane.b32.xlu1 %v7726_v23, %s7571_s16 }
  0x21   :  { %6896 = vrot.lane.b32.xlu0 %v7730_v24, %s7571_s16 }
  0x24   :  { %6911 = vrot.lane.b32.xlu1 %v7678_v12, %s7573_s17 }
  0x25   :  { %6906 = vrot.lane.b32.xlu0 %v7656_v8, %s7573_s17 }
  0x28   :  { %6921 = vrot.lane.b32.xlu1 %v7672_v11, %s7573_s17 }
  0x29   :  { %6916 = vrot.lane.b32.xlu0 %v7637_v4, %s7573_s17 }
  0x2c   :  { %6931 = vrot.lane.b32.xlu1 %v7700_v17, %s7573_s17 }
  0x2d   :  { %6926 = vrot.lane.b32.xlu0 %v7704_v18, %s7573_s17 }
  0x30   :  { %6941 = vrot.lane.b32.xlu1 %v7726_v23, %s7573_s17 }
  0x31   :  { %6936 = vrot.lane.b32.xlu0 %v7730_v24, %s7573_s17 }
  0x34   :  { %6951 = vrot.lane.b32.xlu1 %v7678_v12, %s7574_s18 }
  0x35   :  { %6946 = vrot.lane.b32.xlu0 %v7656_v8, %s7574_s18 }
  0x38   :  { %6961 = vrot.lane.b32.xlu1 %v7672_v11, %s7574_s18 }
  0x39   :  { %6956 = vrot.lane.b32.xlu0 %v7637_v4, %s7574_s18 }
  0x3c   :  { %6971 = vrot.lane.b32.xlu1 %v7700_v17, %s7574_s18 }
  0x3d   :  { %6966 = vrot.lane.b32.xlu0 %v7704_v18, %s7574_s18 }
  0x40   :  { %6981 = vrot.lane.b32.xlu1 %v7726_v23, %s7574_s18 }
  0x41   :  { %6976 = vrot.lane.b32.xlu0 %v7730_v24, %s7574_s18 }
  0x44   :  { %6991 = vrot.lane.b32.xlu1 %v7678_v12, %s7575_s19 }
  0x45   :  { %6986 = vrot.lane.b32.xlu0 %v7656_v8, %s7575_s19 }
  0x48   :  { %7001 = vrot.lane.b32.xlu1 %v7672_v11, %s7575_s19 }
  0x49   :  { %6996 = vrot.lane.b32.xlu0 %v7637_v4, %s7575_s19 }
  0x4c   :  { %7011 = vrot.lane.b32.xlu1 %v7700_v17, %s7575_s19 }
  0x4d   :  { %7006 = vrot.lane.b32.xlu0 %v7704_v18, %s7575_s19 }
  0x50   :  { %7021 = vrot.lane.b32.xlu1 %v7726_v23, %s7575_s19 }
  0x51   :  { %7016 = vrot.lane.b32.xlu0 %v7730_v24, %s7575_s19 }
  0x54   :  { %7031 = vrot.lane.b32.xlu1 %v7678_v12, %s7576_s20 }
  0x55   :  { %7026 = vrot.lane.b32.xlu0 %v7656_v8, %s7576_s20 }
  0x58   :  { %7041 = vrot.lane.b32.xlu1 %v7672_v11, %s7576_s20 }
  0x59   :  { %7036 = vrot.lane.b32.xlu0 %v7637_v4, %s7576_s20 }
  0x5c   :  { %7051 = vrot.lane.b32.xlu1 %v7700_v17, %s7576_s20 }
  0x5d   :  { %7046 = vrot.lane.b32.xlu0 %v7704_v18, %s7576_s20 }
  0x60   :  { %7061 = vrot.lane.b32.xlu1 %v7726_v23, %s7576_s20 }
  0x61   :  { %7056 = vrot.lane.b32.xlu0 %v7730_v24, %s7576_s20 }
  0x64   :  { %7071 = vrot.lane.b32.xlu1 %v7678_v12, %s7577_s22 }
  0x65   :  { %7066 = vrot.lane.b32.xlu0 %v7656_v8, %s7577_s22 }
  0x68   :  { %7081 = vrot.lane.b32.xlu1 %v7672_v11, %s7577_s22 }
  0x69   :  { %7076 = vrot.lane.b32.xlu0 %v7637_v4, %s7577_s22 }
  0x6c   :  { %7091 = vrot.lane.b32.xlu1 %v7700_v17, %s7577_s22 }
  0x6d   :  { %7086 = vrot.lane.b32.xlu0 %v7704_v18, %s7577_s22 }
  0x70   :  { %7101 = vrot.lane.b32.xlu1 %v7726_v23, %s7577_s22 }
  0x71   :  { %7096 = vrot.lane.b32.xlu0 %v7730_v24, %s7577_s22 }
  0x74   :  { %7111 = vrot.lane.b32.xlu1 %v7678_v12, %s7578_s0 }
  0x75   :  { %7106 = vrot.lane.b32.xlu0 %v7656_v8, %s7578_s0 }
  0x76   :  { %v6837_v37 = vpop.permute.xlu1 %6836 }
  0x77   :  { %v6827_v40 = vpop.permute.xlu0 %6826  ;;  %v6839_v46 = vunpack.i.h.bf16 %v6837_v37  ;;  %v6838_v47 = vunpack.i.l.bf16 %v6837_v37 }
  0x78   :  { %7121 = vrot.lane.b32.xlu1 %v7672_v11, %s7578_s0  ;;  %v6829_v51 = vunpack.i.h.bf16 %v6827_v40  ;;  %v6828_v52 = vunpack.i.l.bf16 %v6827_v40 }
  0x79   :  { %7116 = vrot.lane.b32.xlu0 %v7637_v4, %s7578_s0 }
  0x7a   :  { %v6842_v43 = vpop.permute.xlu1 %6841 }
  0x7b   :  { %v6844_v48 = vunpack.i.h.bf16 %v6842_v43  ;;  %v6843_v49 = vunpack.i.l.bf16 %v6842_v43  ;;  %v6832_v50 = vpop.permute.xlu0 %6831 }
  0x7c   :  { %v6834_v53 = vunpack.i.h.bf16 %v6832_v50  ;;  %v6833_v54 = vunpack.i.l.bf16 %v6832_v50  ;;  %7131 = vrot.lane.b32.xlu1 %v7700_v17, %s7578_s0 }
  0x7d   :  { %v1533_v56 = vsel %vm10503_vm4, %v6838_v47, %v6843_v49  ;;  %v1534_v57 = vsel %vm10503_vm4, %v6839_v46, %v6844_v48  ;;  %v1537_v58 = vsel %vm10503_vm4, %v6843_v49, %v6838_v47  ;;  %v1538_v59 = vsel %vm10503_vm4, %v6844_v48, %v6839_v46  ;;  %7126 = vrot.lane.b32.xlu0 %v7704_v18, %s7578_s0 }
  0x7e   :  { %v6852_v60 = vpop.permute.xlu1 %6851  ;;  %v136_v61 = vsel %vm10503_vm4, %v6828_v52, %v6833_v54  ;;  %v137_v62 = vsel %vm10503_vm4, %v6829_v51, %v6834_v53  ;;  %v6247_v63 = vpack.c.bf16 %v1534_v57, %v1533_v56  ;;  %v140_v0 = vsel %vm10503_vm4, %v6833_v54, %v6828_v52  ;;  %v5639_v52 = vld [vmem:[%s10493_s2 + $0x20] sm:$0xff] }
  0x7f   :  { %v6854_v1 = vunpack.i.h.bf16 %v6852_v60  ;;  %v6853_v4 = vunpack.i.l.bf16 %v6852_v60  ;;  %v6847_v8 = vpop.permute.xlu0 %6846  ;;  %v6143_v11 = vpack.c.bf16 %v137_v62, %v136_v61  ;;  %v141_v12 = vsel %vm10503_vm4, %v6834_v53, %v6829_v51 }
  0x80   :  { %v6849_v16 = vunpack.i.h.bf16 %v6847_v8  ;;  %v6848_v17 = vunpack.i.l.bf16 %v6847_v8  ;;  %6249 = vmatprep.subr.msk.bf16.mxu1 %vm7893_vm7, %v6247_v63  ;;  %v6146_v18 = vpack.c.bf16 %v141_v12, %v140_v0  ;;  %v6250_v21 = vpack.c.bf16 %v1538_v59, %v1537_v58  ;;  %7141 = vrot.lane.b32.xlu1 %v7726_v23, %s7578_s0  ;;  %v5640_v8 = vld [vmem:[%s10493_s2 + $0x28] sm:$0xff] }
  0x81   :  { %6145 = vmatprep.subr.msk.bf16.mxu0 %vm7893_vm7, %v6143_v11  ;;  %7136 = vrot.lane.b32.xlu0 %v7730_v24, %s7578_s0  ;;  %v100_v46 = vrot.slane %v92_v26, %v7845_v31  ;;  %v7973_v61 = vsel %vm41_vm13, 1, %v7569_v3 }
  0x82   :  { %v139_v34 = vsel %vm10503_vm4, %v6849_v16, %v6854_v1  ;;  %v143_v23 = vsel %vm10503_vm4, %v6854_v1, %v6849_v16  ;;  %v138_v35 = vsel %vm10503_vm4, %v6848_v17, %v6853_v4  ;;  %v142_v37 = vsel %vm10503_vm4, %v6853_v4, %v6848_v17  ;;  %6148 = vmatpush1.bf16.msk.msra.mxu0 %vm7917_vm8, %v6146_v18  ;;  %v6862_v24 = vpop.permute.xlu1 %6861 }
  0x83   :  { %6252 = vmatpush1.bf16.msk.msra.mxu1 %vm7917_vm8, %v6250_v21  ;;  %v6864_v38 = vunpack.i.h.bf16 %v6862_v24  ;;  %v6863_v39 = vunpack.i.l.bf16 %v6862_v24  ;;  %v6857_v40 = vpop.permute.xlu0 %6856  ;;  %v6149_v41 = vpack.c.bf16 %v139_v34, %v138_v35  ;;  %v6152_v43 = vpack.c.bf16 %v143_v23, %v142_v37 }
  0x84   :  { %v6859_v44 = vunpack.i.h.bf16 %v6857_v40  ;;  %v6858_v45 = vunpack.i.l.bf16 %v6857_v40  ;;  %vm105_vm14 = vcmp.eq.s32.totalorder %v100_v46, 1  ;;  %v411_v22 = vrot.slane %v7973_v61, %v7848_v32  ;;  %v5641_v40 = vld [vmem:[%s10493_s2 + $0x30] sm:$0xff] }
  0x85   :  { %6151 = vmatprep.subr.msk.bf16.mxu0 %vm7893_vm7, %v6149_v41  ;;  %vm7997_vm0 = vmpackc.low %vm105_vm14, %vm105_vm14  ;;  %vm10501_vm14 = vcmp.lt.s32.totalorder %v7869_v36, 1 }
  0x86   :  { %v1536_v47 = vsel %vm10503_vm4, %v6859_v44, %v6864_v38  ;;  %v1540_v48 = vsel %vm10503_vm4, %v6864_v38, %v6859_v44  ;;  %v1535_v49 = vsel %vm10503_vm4, %v6858_v45, %v6863_v39  ;;  %v1539_v50 = vsel %vm10503_vm4, %v6863_v39, %v6858_v45  ;;  %6154 = vmatpush1.bf16.msk.msra.mxu0 %vm7917_vm8, %v6152_v43  ;;  %v6872_v51 = vpop.permute.xlu1 %6871 }
  0x87   :  { %v6874_v53 = vunpack.i.h.bf16 %v6872_v51  ;;  %v6873_v54 = vunpack.i.l.bf16 %v6872_v51  ;;  %v6867_v56 = vpop.permute.xlu0 %6866  ;;  %v6253_v57 = vpack.c.bf16 %v1536_v47, %v1535_v49  ;;  %v6256_v58 = vpack.c.bf16 %v1540_v48, %v1539_v50 }
  0x88   :  { %v6869_v59 = vunpack.i.h.bf16 %v6867_v56  ;;  %v6868_v60 = vunpack.i.l.bf16 %v6867_v56  ;;  %v419_v49 = vrot.slane %v411_v22, %v7845_v31  ;;  %v407_v50 = vrot.slane %v7973_v61, %v7845_v31 }
  0x89   :  { %5651 = vmatmul.mubr.msk.f32.vlgmr.msra.gmra.mrb[0].mxu0 %vm10507_vm11, %v5639_v52  ;;  %6255 = vmatprep.subr.msk.bf16.mxu1 %vm7893_vm7, %v6253_v57  ;;  %v5642_v57 = vld [vmem:[%s10493_s2 + $0x38] sm:$0xff] }
  0x8a   :  { %v81_v62 = vsel %vm10502_vm10, %v6869_v59, %v6874_v53  ;;  %v85_v63 = vsel %vm10502_vm10, %v6874_v53, %v6869_v59  ;;  %v80_v0 = vsel %vm10502_vm10, %v6868_v60, %v6873_v54  ;;  %v84_v1 = vsel %vm10502_vm10, %v6873_v54, %v6868_v60  ;;  %6258 = vmatpush1.bf16.msk.msra.mxu1 %vm7917_vm8, %v6256_v58  ;;  %v6882_v4 = vpop.permute.xlu1 %6881 }
  0x8b   :  { %v6158_v12 = vpack.c.bf16 %v85_v63, %v84_v1  ;;  %v6884_v16 = vunpack.i.h.bf16 %v6882_v4  ;;  %v6883_v17 = vunpack.i.l.bf16 %v6882_v4  ;;  %v6877_v18 = vpop.permute.xlu0 %6876  ;;  %258 = vmatprep.mubr.f32.mxu0 %v7572_v25  ;;  %v6155_v21 = vpack.c.bf16 %v81_v62, %v80_v0 }
  0x8c   :  { %v6879_v26 = vunpack.i.h.bf16 %v6877_v18  ;;  %v6878_v34 = vunpack.i.l.bf16 %v6877_v18  ;;  %v415_v1 = vrot.slane %v407_v50, %v7845_v31  ;;  %vm421_vm5 = vcmp.eq.s32.totalorder %v419_v49, 1  ;;  %v116_v50 = vld [vmem:[%s10493_s2 + $0x8] sm:$0xff] }
  0x8d   :  { %5652 = vmatmul.mubr.msk.f32.gmra.mrb[2].mxu0 %vm10507_vm11, %v5640_v8  ;;  %6157 = vmatprep.subr.msk.bf16.mxu0 %vm7990_vm15, %v6155_v21  ;;  %vm8077_vm12 = vmpackc.low %vm421_vm5, %vm421_vm5 }
  0x8e   :  { %v1502_v35 = vsel %vm10502_vm10, %v6879_v26, %v6884_v16  ;;  %v1506_v37 = vsel %vm10502_vm10, %v6884_v16, %v6879_v26  ;;  %v1501_v24 = vsel %vm10502_vm10, %v6878_v34, %v6883_v17  ;;  %v1505_v38 = vsel %vm10502_vm10, %v6883_v17, %v6878_v34  ;;  %5779 = vmatmul.mubr.msk.f32.vlgmr.msra.gmra.mrb[0].mxu1 %vm10507_vm11, %v5639_v52  ;;  %v6892_v39 = vpop.permute.xlu1 %6891  ;;  %v115_v34 = vld [vmem:[%s10493_s2] sm:$0xff] }
  0x8f   :  { %v6262_v41 = vpack.c.bf16 %v1506_v37, %v1505_v38  ;;  %6160 = vmatpush1.bf16.msk.msra.mxu0 %vm7997_vm0, %v6158_v12  ;;  %v6894_v43 = vunpack.i.h.bf16 %v6892_v39  ;;  %v6893_v44 = vunpack.i.l.bf16 %v6892_v39  ;;  %v6887_v45 = vpop.permute.xlu0 %6886  ;;  %264 = vmatprep.mubr.f32.mxu0 %v7572_v25  ;;  %v6259_v46 = vpack.c.bf16 %v1502_v35, %v1501_v24 }
  0x90   :  { %v6889_v47 = vunpack.i.h.bf16 %v6887_v45  ;;  %v6888_v48 = vunpack.i.l.bf16 %v6887_v45  ;;  %1619 = vmatprep.mubr.f32.mxu1 %v7572_v25  ;;  %vm420_vm6 = vcmp.eq.s32.totalorder %v415_v1, 1  ;;  %v575_v38 = vsub.s32 3, %v7832_v28 }
  0x91   :  { %5653 = vmatmul.mubr.msk.f32.gmra.mrb[4].mxu0 %vm10507_vm11, %v5641_v40  ;;  %6261 = vmatprep.subr.msk.bf16.mxu1 %vm7990_vm15, %v6259_v46  ;;  %vm8091_vm13 = vmpackc.low %vm420_vm6, %vm420_vm6 }
  0x92   :  { %v83_v51 = vsel %vm10502_vm10, %v6889_v47, %v6894_v43  ;;  %v87_v52 = vsel %vm10502_vm10, %v6894_v43, %v6889_v47  ;;  %v82_v53 = vsel %vm10502_vm10, %v6888_v48, %v6893_v44  ;;  %v86_v54 = vsel %vm10502_vm10, %v6893_v44, %v6888_v48  ;;  %5780 = vmatmul.mubr.msk.f32.gmra.mrb[2].mxu1 %vm10507_vm11, %v5640_v8  ;;  %v6902_v56 = vpop.permute.xlu1 %6901 }
  0x93   :  { %v6164_v58 = vpack.c.bf16 %v87_v52, %v86_v54  ;;  %6264 = vmatpush1.bf16.msk.msra.mxu1 %vm7997_vm0, %v6262_v41  ;;  %v6904_v59 = vunpack.i.h.bf16 %v6902_v56  ;;  %v6903_v60 = vunpack.i.l.bf16 %v6902_v56  ;;  %v6897_v61 = vpop.permute.xlu0 %6896  ;;  %270 = vmatprep.mubr.f32.mxu0 %v7572_v25  ;;  %v6161_v62 = vpack.c.bf16 %v83_v51, %v82_v53 }
  0x94   :  { %v6899_v63 = vunpack.i.h.bf16 %v6897_v61  ;;  %v6898_v0 = vunpack.i.l.bf16 %v6897_v61  ;;  %1625 = vmatprep.mubr.f32.mxu1 %v7572_v25  ;;  %v8098_v56 = vsub.s32 1, %v7832_v28 }
  0x95   :  { %5654 = vmatmul.mubr.msk.f32.gmra.mrb[6].mxu0 %vm10507_vm11, %v5642_v57  ;;  %6163 = vmatprep.subr.msk.bf16.mxu0 %vm7990_vm15, %v6161_v62 }
  0x96   :  { %v1504_v4 = vsel %vm10502_vm10, %v6899_v63, %v6904_v59  ;;  %v1508_v8 = vsel %vm10502_vm10, %v6904_v59, %v6899_v63  ;;  %v1503_v12 = vsel %vm10502_vm10, %v6898_v0, %v6903_v60  ;;  %v1507_v16 = vsel %vm10502_vm10, %v6903_v60, %v6898_v0  ;;  %5781 = vmatmul.mubr.msk.f32.gmra.mrb[4].mxu1 %vm10507_vm11, %v5641_v40  ;;  %v6912_v17 = vpop.permute.xlu1 %6911  ;;  %vm8325_vm10 = vmand %vm10505_vm2, %vm7854_vm1 }
  0x97   :  { %6166 = vmatpush1.bf16.msk.msra.mxu0 %vm7997_vm0, %v6164_v58  ;;  %v6914_v18 = vunpack.i.h.bf16 %v6912_v17  ;;  %v6913_v21 = vunpack.i.l.bf16 %v6912_v17  ;;  %v6907_v26 = vpop.permute.xlu0 %6906  ;;  %353 = vmatprep.mubr.f32.mxu0 %v7572_v25  ;;  %v6265_v22 = vpack.c.bf16 %v1504_v4, %v1503_v12  ;;  %v6268_v35 = vpack.c.bf16 %v1508_v8, %v1507_v16  ;;  %v117_v4 = vld [vmem:[%s10493_s2 + $0x10] sm:$0xff] }
  0x98   :  { %v6909_v37 = vunpack.i.h.bf16 %v6907_v26  ;;  %v6908_v24 = vunpack.i.l.bf16 %v6907_v26  ;;  %1631 = vmatprep.mubr.f32.mxu1 %v7572_v25 }
  0x99   :  { %6267 = vmatprep.subr.msk.bf16.mxu1 %vm7990_vm15, %v6265_v22 }
  0x9a   :  { %v396_v39 = vsel %vm10500_vm3, %v6909_v37, %v6914_v18  ;;  %v400_v40 = vsel %vm10500_vm3, %v6914_v18, %v6909_v37  ;;  %v395_v41 = vsel %vm10500_vm3, %v6908_v24, %v6913_v21  ;;  %v399_v43 = vsel %vm10500_vm3, %v6913_v21, %v6908_v24  ;;  %5663 = vmatmul.mubr.msk.f32.vlgmr.msra.gmra.mrb[0].mxu0 %vm10507_vm11, %v115_v34  ;;  %v6922_v44 = vpop.permute.xlu1 %6921 }
  0x9b   :  { %v6170_v46 = vpack.c.bf16 %v400_v40, %v399_v43  ;;  %5782 = vmatmul.mubr.msk.f32.gmra.mrb[6].mxu1 %vm10507_vm11, %v5642_v57  ;;  %v6924_v47 = vunpack.i.h.bf16 %v6922_v44  ;;  %v6923_v48 = vunpack.i.l.bf16 %v6922_v44  ;;  %v6917_v49 = vpop.permute.xlu0 %6916  ;;  %359 = vmatprep.mubr.f32.mxu0 %v7572_v25  ;;  %v6167_v51 = vpack.c.bf16 %v396_v39, %v395_v41  ;;  %v118_v41 = vld [vmem:[%s10493_s2 + $0x18] sm:$0xff] }
  0x9c   :  { %6270 = vmatpush1.bf16.msk.msra.mxu1 %vm7997_vm0, %v6268_v35  ;;  %v6919_v52 = vunpack.i.h.bf16 %v6917_v49  ;;  %v6918_v53 = vunpack.i.l.bf16 %v6917_v49  ;;  %1702 = vmatprep.mubr.f32.mxu1 %v7572_v25  ;;  %v576_v57 = vrot.slane %v7839_v29, %v575_v38  ;;  %v572_v21 = vrot.slane %v7839_v29, %v8098_v56 }
  0x9d   :  { %6169 = vmatprep.subr.msk.bf16.mxu0 %vm8077_vm12, %v6167_v51 }
  0x9e   :  { %v1744_v58 = vsel %vm10500_vm3, %v6919_v52, %v6924_v47  ;;  %v1748_v59 = vsel %vm10500_vm3, %v6924_v47, %v6919_v52  ;;  %v1743_v60 = vsel %vm10500_vm3, %v6918_v53, %v6923_v48  ;;  %v1747_v61 = vsel %vm10500_vm3, %v6923_v48, %v6918_v53  ;;  %5664 = vmatmul.mubr.msk.f32.gmra.mrb[2].mxu0 %vm10507_vm11, %v116_v50  ;;  %v6932_v62 = vpop.permute.xlu1 %6931 }
  0x9f   :  { %5791 = vmatmul.mubr.msk.f32.vlgmr.msra.gmra.mrb[0].mxu1 %vm10507_vm11, %v115_v34  ;;  %6172 = vmatpush1.bf16.msk.msra.mxu0 %vm8091_vm13, %v6170_v46  ;;  %v6934_v63 = vunpack.i.h.bf16 %v6932_v62  ;;  %v6933_v0 = vunpack.i.l.bf16 %v6932_v62  ;;  %v6927_v1 = vpop.permute.xlu0 %6926  ;;  %v6271_v8 = vpack.c.bf16 %v1744_v58, %v1743_v60  ;;  %v6274_v12 = vpack.c.bf16 %v1748_v59, %v1747_v61  ;;  %v5667_v59 = vld [vmem:[%s10493_s2 + $0x40] sm:$0xff] }
  0xa0   :  { %v6929_v16 = vunpack.i.h.bf16 %v6927_v1  ;;  %v6928_v17 = vunpack.i.l.bf16 %v6927_v1  ;;  %365 = vmatprep.mubr.f32.mxu0 %v7572_v25  ;;  %1708 = vmatprep.mubr.f32.mxu1 %v7572_v25  ;;  %v584_v18 = vrot.slane %v576_v57, %v8098_v56  ;;  %v580_v47 = vrot.slane %v572_v21, %v8098_v56 }
  0xa1   :  { %6273 = vmatprep.subr.msk.bf16.mxu1 %vm8077_vm12, %v6271_v8 }
  0xa2   :  { %v398_v26 = vsel %vm10500_vm3, %v6929_v16, %v6934_v63  ;;  %v402_v34 = vsel %vm10500_vm3, %v6934_v63, %v6929_v16  ;;  %v397_v22 = vsel %vm10500_vm3, %v6928_v17, %v6933_v0  ;;  %v401_v35 = vsel %vm10500_vm3, %v6933_v0, %v6928_v17  ;;  %5665 = vmatmul.mubr.msk.f32.gmra.mrb[4].mxu0 %vm10507_vm11, %v117_v4  ;;  %v6942_v37 = vpop.permute.xlu1 %6941 }
  0xa3   :  { %v6176_v24 = vpack.c.bf16 %v402_v34, %v401_v35  ;;  %5792 = vmatmul.mubr.msk.f32.gmra.mrb[2].mxu1 %vm10507_vm11, %v116_v50  ;;  %v6944_v39 = vunpack.i.h.bf16 %v6942_v37  ;;  %v6943_v29 = vunpack.i.l.bf16 %v6942_v37  ;;  %v6937_v40 = vpop.permute.xlu0 %6936  ;;  %371 = vmatprep.mubr.f32.mxu0 %v7572_v25  ;;  %v6173_v43 = vpack.c.bf16 %v398_v26, %v397_v22  ;;  %v5668_v34 = vld [vmem:[%s10493_s2 + $0x48] sm:$0xff] }
  0xa4   :  { %6276 = vmatpush1.bf16.msk.msra.mxu1 %vm8091_vm13, %v6274_v12  ;;  %v6939_v44 = vunpack.i.h.bf16 %v6937_v40  ;;  %v6938_v46 = vunpack.i.l.bf16 %v6937_v40  ;;  %1714 = vmatprep.mubr.f32.mxu1 %v7572_v25  ;;  %vm586_vm5 = vcmp.eq.s32.totalorder %v584_v18, 1  ;;  %vm585_vm6 = vcmp.eq.s32.totalorder %v580_v47, 1 }
  0xa5   :  { %6175 = vmatprep.subr.msk.bf16.mxu0 %vm8077_vm12, %v6173_v43 }
  0xa6   :  { %v1746_v48 = vsel %vm10500_vm3, %v6939_v44, %v6944_v39  ;;  %v1750_v49 = vsel %vm10500_vm3, %v6944_v39, %v6939_v44  ;;  %v1745_v50 = vsel %vm10500_vm3, %v6938_v46, %v6943_v29  ;;  %v1749_v51 = vsel %vm10500_vm3, %v6943_v29, %v6938_v46  ;;  %5666 = vmatmul.mubr.msk.f32.gmra.mrb[6].mxu0 %vm10507_vm11, %v118_v41  ;;  %v6952_v52 = vpop.permute.xlu1 %6951  ;;  %vm8174_vm3 = vmpackc.low %vm586_vm5, %vm586_vm5 }
  0xa7   :  { %5793 = vmatmul.mubr.msk.f32.gmra.mrb[4].mxu1 %vm10507_vm11, %v117_v4  ;;  %6178 = vmatpush1.bf16.msk.msra.mxu0 %vm8091_vm13, %v6176_v24  ;;  %v6954_v53 = vunpack.i.h.bf16 %v6952_v52  ;;  %v6953_v57 = vunpack.i.l.bf16 %v6952_v52  ;;  %v6947_v58 = vpop.permute.xlu0 %6946  ;;  %v6277_v60 = vpack.c.bf16 %v1746_v48, %v1745_v50  ;;  %v6280_v61 = vpack.c.bf16 %v1750_v49, %v1749_v51  ;;  %vm8188_vm5 = vmpackc.low %vm585_vm6, %vm585_vm6  ;;  %v5669_v48 = vld [vmem:[%s10493_s2 + $0x50] sm:$0xff] }
  0xa8   :  { %v6949_v62 = vunpack.i.h.bf16 %v6947_v58  ;;  %v6948_v63 = vunpack.i.l.bf16 %v6947_v58  ;;  %511 = vmatprep.mubr.f32.mxu0 %v7572_v25  ;;  %1720 = vmatprep.mubr.f32.mxu1 %v7572_v25  ;;  %v10542_v24 = vmov 0  ;;  %vm10504_vm6 = vcmp.lt.s32.totalorder %v7869_v36, 127 }
  0xa9   :  { %6279 = vmatprep.subr.msk.bf16.mxu1 %vm8077_vm12, %v6277_v60  ;;  %v10543_v24 = vsel %vm8188_vm5, 4294967295, %v10542_v24 }
  0xaa   :  { %v562_v0 = vsel %vm10501_vm14, %v6949_v62, %v6954_v53  ;;  %v566_v1 = vsel %vm10501_vm14, %v6954_v53, %v6949_v62  ;;  %v561_v4 = vsel %vm10501_vm14, %v6948_v63, %v6953_v57  ;;  %v565_v8 = vsel %vm10501_vm14, %v6953_v57, %v6948_v63  ;;  %5679 = vmatmul.mubr.msk.f32.vlgmr.msra.gmra.mrb[0].mxu0 %vm10507_vm11, %v5667_v59  ;;  %v6962_v12 = vpop.permute.xlu1 %6961 }
  0xab   :  { %v6182_v17 = vpack.c.bf16 %v566_v1, %v565_v8  ;;  %5794 = vmatmul.mubr.msk.f32.gmra.mrb[6].mxu1 %vm10507_vm11, %v118_v41  ;;  %v6964_v18 = vunpack.i.h.bf16 %v6962_v12  ;;  %v6963_v21 = vunpack.i.l.bf16 %v6962_v12  ;;  %v6957_v26 = vpop.permute.xlu0 %6956  ;;  %517 = vmatprep.mubr.f32.mxu0 %v7572_v25  ;;  %v6179_v22 = vpack.c.bf16 %v562_v0, %v561_v4  ;;  %v5670_v1 = vld [vmem:[%s10493_s2 + $0x58] sm:$0xff] }
  0xac   :  { %6282 = vmatpush1.bf16.msk.msra.mxu1 %vm8091_vm13, %v6280_v61  ;;  %v6959_v35 = vunpack.i.h.bf16 %v6957_v26  ;;  %v6958_v37 = vunpack.i.l.bf16 %v6957_v26  ;;  %1823 = vmatprep.mubr.f32.mxu1 %v7572_v25 }
  0xad   :  { %6181 = vmatprep.subr.msk.bf16.mxu0 %vm8174_vm3, %v6179_v22 }
  0xae   :  { %v1873_v39 = vsel %vm10501_vm14, %v6959_v35, %v6964_v18  ;;  %v1877_v29 = vsel %vm10501_vm14, %v6964_v18, %v6959_v35  ;;  %v1872_v40 = vsel %vm10501_vm14, %v6958_v37, %v6963_v21  ;;  %v1876_v41 = vsel %vm10501_vm14, %v6963_v21, %v6958_v37  ;;  %5680 = vmatmul.mubr.msk.f32.gmra.mrb[2].mxu0 %vm10507_vm11, %v5668_v34  ;;  %v6972_v43 = vpop.permute.xlu1 %6971 }
  0xaf   :  { %5803 = vmatmul.mubr.msk.f32.vlgmr.msra.gmra.mrb[0].mxu1 %vm10507_vm11, %v5667_v59  ;;  %6184 = vmatpush1.bf16.msk.msra.mxu0 %vm8188_vm5, %v6182_v17  ;;  %v6974_v44 = vunpack.i.h.bf16 %v6972_v43  ;;  %v6973_v46 = vunpack.i.l.bf16 %v6972_v43  ;;  %v6967_v47 = vpop.permute.xlu0 %6966  ;;  %v6283_v49 = vpack.c.bf16 %v1873_v39, %v1872_v40  ;;  %v6286_v50 = vpack.c.bf16 %v1877_v29, %v1876_v41 }
  0xb0   :  { %v6969_v51 = vunpack.i.h.bf16 %v6967_v47  ;;  %v6968_v52 = vunpack.i.l.bf16 %v6967_v47  ;;  %523 = vmatprep.mubr.f32.mxu0 %v7572_v25  ;;  %1829 = vmatprep.mubr.f32.mxu1 %v7572_v25  ;;  %v855_v17 = vrot.slane %v7881_v42, %v575_v38  ;;  %v6191_v18 = vpack.c.bf16 %v7666_v10, %v7661_v9  ;;  %v5683_v9 = vld [vmem:[%s10493_s2 + $0x60] sm:$0xff] }
  0xb1   :  { %6285 = vmatprep.subr.msk.bf16.mxu1 %vm8174_vm3, %v6283_v49  ;;  %v6193_v29 = vpack.c.bf16 %v7642_v5, %v7633_v2  ;;  %v7547_v2 = vld [vmem:[%s10491_s1 + $0x40] sm:$0xff]  ;;  %v7548_v5 = vld [vmem:[%s10491_s1 + $0x50] sm:$0xff] }
  0xb2   :  { %v564_v53 = vsel %vm10501_vm14, %v6969_v51, %v6974_v44  ;;  %v568_v57 = vsel %vm10501_vm14, %v6974_v44, %v6969_v51  ;;  %v563_v58 = vsel %vm10501_vm14, %v6968_v52, %v6973_v46  ;;  %v567_v59 = vsel %vm10501_vm14, %v6973_v46, %v6968_v52  ;;  %5681 = vmatmul.mubr.msk.f32.gmra.mrb[4].mxu0 %vm10507_vm11, %v5669_v48  ;;  %v6982_v60 = vpop.permute.xlu1 %6981 }
  0xb3   :  { %v6188_v61 = vpack.c.bf16 %v568_v57, %v567_v59  ;;  %5804 = vmatmul.mubr.msk.f32.gmra.mrb[2].mxu1 %vm10507_vm11, %v5668_v34  ;;  %v6984_v62 = vunpack.i.h.bf16 %v6982_v60  ;;  %v6983_v63 = vunpack.i.l.bf16 %v6982_v60  ;;  %v6977_v0 = vpop.permute.xlu0 %6976  ;;  %529 = vmatprep.mubr.f32.mxu0 %v7572_v25  ;;  %v6185_v4 = vpack.c.bf16 %v564_v53, %v563_v58  ;;  %v7549_v58 = vld [vmem:[%s10491_s1 + $0x20] sm:$0xff]  ;;  %v7550_v59 = vld [vmem:[%s10491_s1 + $0x30] sm:$0xff] }
  0xb4   :  { %6288 = vmatpush1.bf16.msk.msra.mxu1 %vm8188_vm5, %v6286_v50  ;;  %v6979_v8 = vunpack.i.h.bf16 %v6977_v0  ;;  %v6978_v12 = vunpack.i.l.bf16 %v6977_v0  ;;  %1835 = vmatprep.mubr.f32.mxu1 %v7572_v25  ;;  %v863_v43 = vrot.slane %v855_v17, %v8098_v56  ;;  %v6295_v44 = vpack.c.bf16 %v7652_v7, %v7647_v6  ;;  %v5684_v6 = vld [vmem:[%s10493_s2 + $0x68] sm:$0xff]  ;;  %v5685_v0 = vld [vmem:[%s10493_s2 + $0x70] sm:$0xff] }
  0xb5   :  { %6187 = vmatprep.subr.msk.bf16.mxu0 %vm8174_vm3, %v6185_v4  ;;  %v6195_v46 = vpack.c.bf16 %v7688_v14, %v7683_v13  ;;  %v6297_v47 = vpack.c.bf16 %v7548_v5, %v7547_v2  ;;  %v851_v57 = vrot.slane %v7881_v42, %v8098_v56  ;;  %v6197_v60 = vpack.c.bf16 %v7550_v59, %v7549_v58 }
  0xb6   :  { %v1875_v21 = vsel %vm10501_vm14, %v6979_v8, %v6984_v62  ;;  %v1879_v26 = vsel %vm10501_vm14, %v6984_v62, %v6979_v8  ;;  %v1874_v34 = vsel %vm10501_vm14, %v6978_v12, %v6983_v63  ;;  %v1878_v28 = vsel %vm10501_vm14, %v6983_v63, %v6978_v12  ;;  %5682 = vmatmul.mubr.msk.f32.gmra.mrb[6].mxu0 %vm10507_vm11, %v5670_v1  ;;  %v8247_v38 = vpop.permute.xlu1 %6991  ;;  %v7551_v8 = vld [vmem:[%s10491_s1 + $0x60] sm:$0xff]  ;;  %v7552_v12 = vld [vmem:[%s10491_s1 + $0x70] sm:$0xff] }
  0xb7   :  { %v6292_v22 = vpack.c.bf16 %v1879_v26, %v1878_v28  ;;  %5805 = vmatmul.mubr.msk.f32.gmra.mrb[4].mxu1 %vm10507_vm11, %v5669_v48  ;;  %6190 = vmatpush1.bf16.msk.msra.mxu0 %vm8188_vm5, %v6188_v61  ;;  %v6289_v10 = vpack.c.bf16 %v1875_v21, %v1874_v34  ;;  %v6994_v35 = vunpack.i.h.bf16 %v8247_v38  ;;  %v6993_v37 = vunpack.i.l.bf16 %v8247_v38  ;;  %v8257_v39 = vpop.permute.xlu0 %6986 }
  0xb8   :  { %676 = vmatprep.mubr.f32.mxu0 %v7572_v25  ;;  %1841 = vmatprep.mubr.f32.mxu1 %v7572_v25  ;;  %v6989_v40 = vunpack.i.h.bf16 %v8257_v39  ;;  %v6988_v41 = vunpack.i.l.bf16 %v8257_v39  ;;  %vm8307_vm14 = vcmp.eq.s32.totalorder %v863_v43, 1  ;;  %v6299_v61 = vpack.c.bf16 %v7714_v20, %v7709_v19 }
  0xb9   :  { %6291 = vmatprep.subr.msk.bf16.mxu1 %vm8174_vm3, %v6289_v10  ;;  %6192 = vmatprep.subr.bf16.mxu0 %v6191_v18  ;;  %vm8352_vm1 = vmpackc.low %vm8307_vm14, %vm8307_vm14  ;;  %v6301_v17 = vpack.c.bf16 %v7552_v12, %v7551_v8  ;;  %v859_v18 = vrot.slane %v851_v57, %v8098_v56  ;;  %v8368_v26 = vsel %vm8325_vm10, 1, %v7569_v3  ;;  %v5686_v10 = vld [vmem:[%s10493_s2 + $0x78] sm:$0xff]  ;;  %vm10506_vm14 = vcmp.lt.s32.totalorder %v7869_v36, 113 }
  0xba   :  { %5695 = vmatmul.mubr.msk.f32.vlgmr.msra.gmra.mrb[0].mxu0 %vm10507_vm11, %v5683_v9  ;;  %6294 = vmatpush1.bf16.msk.msra.mxu1 %vm8188_vm5, %v6292_v22  ;;  %v8281_v48 = vpop.permute.xlu1 %7001  ;;  %v845_v7 = vsel %vm10504_vm6, %v6994_v35, %v6989_v40  ;;  %v844_v13 = vsel %vm10504_vm6, %v6993_v37, %v6988_v41  ;;  %v1021_v43 = vrot.slane %v8368_v26, %v7848_v32  ;;  %vm10563_vm5 = vcmask 261120  }
  0xbb   :  { %5806 = vmatmul.mubr.msk.f32.gmra.mrb[6].mxu1 %vm10507_vm11, %v5670_v1  ;;  %682 = vmatprep.mubr.f32.mxu0 %v7572_v25  ;;  %v7004_v14 = vunpack.i.h.bf16 %v8281_v48  ;;  %v7003_v49 = vunpack.i.l.bf16 %v8281_v48  ;;  %v8302_v50 = vpop.permute.xlu0 %6996  ;;  %v6199_v20 = vpack.c.bf16 %v845_v7, %v844_v13  ;;  %v10548_v1 = vmov 0 }
  0xbc   :  { %1952 = vmatprep.mubr.f32.mxu1 %v7572_v25  ;;  %6194 = vmatpush1.bf16.msra.mxu0 %v6193_v29  ;;  %v6999_v51 = vunpack.i.h.bf16 %v8302_v50  ;;  %v6998_v52 = vunpack.i.l.bf16 %v8302_v50  ;;  %v10549_v1 = vsel %vm8352_vm1, 4294967295, %v10548_v1  ;;  %vm864_vm10 = vcmp.eq.s32.totalorder %v859_v18, 1 }
  0xbd   :  { %6296 = vmatprep.subr.bf16.mxu1 %v6295_v44  ;;  %6196 = vmatprep.subr.bf16.mxu0 %v6195_v46  ;;  %v841_v44 = vsel %vm10504_vm6, %v6989_v40, %v6994_v35  ;;  %v840_v46 = vsel %vm10504_vm6, %v6988_v41, %v6993_v37  ;;  %v5699_v37 = vld [vmem:[%s10493_s2 + $0x80] sm:$0xff]  ;;  %v1029_v58 = vrot.slane %v1021_v43, %v7845_v31  ;;  %vm8431_vm4 = vmpackc.low %vm864_vm10, %vm864_vm10 }
  0xbe   :  { %5696 = vmatmul.mubr.msk.f32.gmra.mrb[2].mxu0 %vm10507_vm11, %v5684_v6  ;;  %v2103_v63 = vsel %vm10504_vm6, %v7004_v14, %v6999_v51  ;;  %v2102_v19 = vsel %vm10504_vm6, %v7003_v49, %v6998_v52  ;;  %v8342_v33 = vpop.permute.xlu1 %7011  ;;  %v6202_v13 = vpack.c.bf16 %v841_v44, %v840_v46  ;;  %v2099_v59 = vsel %vm10504_vm6, %v6999_v51, %v7004_v14 }
  0xbf   :  { %5815 = vmatmul.mubr.msk.f32.vlgmr.msra.gmra.mrb[0].mxu1 %vm10507_vm11, %v5683_v9  ;;  %688 = vmatprep.mubr.f32.mxu0 %v7572_v25  ;;  %v7007_v4 = vpop.permute.xlu0 %7006  ;;  %v7014_v21 = vunpack.i.h.bf16 %v8342_v33  ;;  %v7013_v34 = vunpack.i.l.bf16 %v8342_v33  ;;  %v6303_v9 = vpack.c.bf16 %v2103_v63, %v2102_v19  ;;  %v1017_v63 = vrot.slane %v8368_v26, %v7845_v31 }
  0xc0   :  { %1958 = vmatprep.mubr.f32.mxu1 %v7572_v25  ;;  %6298 = vmatpush1.bf16.msra.mxu1 %v6297_v47  ;;  %v7009_v28 = vunpack.i.h.bf16 %v7007_v4  ;;  %v7008_v22 = vunpack.i.l.bf16 %v7007_v4  ;;  %vm1031_vm10 = vcmp.eq.s32.totalorder %v1029_v58, 1  ;;  %v1186_v58 = vrot.slane %v7881_v42, %v7848_v32 }
  0xc1   :  { %6198 = vmatpush1.bf16.msra.mxu0 %v6197_v60  ;;  %6300 = vmatprep.subr.bf16.mxu1 %v6299_v61  ;;  %v2098_v60 = vsel %vm10504_vm6, %v6998_v52, %v7003_v49  ;;  %v10550_v61 = vmov 0  ;;  %v5700_v52 = vld [vmem:[%s10493_s2 + $0x88] sm:$0xff]  ;;  %v1025_v46 = vrot.slane %v1017_v63, %v7845_v31 }
  0xc2   :  { %5697 = vmatmul.mubr.msk.f32.gmra.mrb[4].mxu0 %vm10507_vm11, %v5685_v0  ;;  %6201 = vmatprep.subr.msk.bf16.mxu0 %vm8352_vm1, %v6199_v20  ;;  %v7022_v56 = vpop.permute.xlu1 %7021  ;;  %v847_v2 = vsel %vm10504_vm6, %v7014_v21, %v7009_v28  ;;  %v846_v5 = vsel %vm10504_vm6, %v7013_v34, %v7008_v22  ;;  %v10551_v61 = vsel %vm8431_vm4, 4294967295, %v10550_v61  ;;  %v843_v48 = vsel %vm10504_vm6, %v7009_v28, %v7014_v21 }
  0xc3   :  { %5816 = vmatmul.mubr.msk.f32.gmra.mrb[2].mxu1 %vm10507_vm11, %v5684_v6  ;;  %694 = vmatprep.mubr.f32.mxu0 %v7572_v25  ;;  %v7017_v29 = vpop.permute.xlu0 %7016  ;;  %v7024_v47 = vunpack.i.h.bf16 %v7022_v56  ;;  %v7023_v35 = vunpack.i.l.bf16 %v7022_v56  ;;  %v6205_v62 = vpack.c.bf16 %v847_v2, %v846_v5  ;;  %v842_v14 = vsel %vm10504_vm6, %v7008_v22, %v7013_v34 }
  0xc4   :  { %1964 = vmatprep.mubr.f32.mxu1 %v7572_v25  ;;  %6302 = vmatpush1.bf16.msra.mxu1 %v6301_v17  ;;  %v7019_v40 = vunpack.i.h.bf16 %v7017_v29  ;;  %v7018_v38 = vunpack.i.l.bf16 %v7017_v29  ;;  %v6306_v8 = vpack.c.bf16 %v2099_v59, %v2098_v60  ;;  %v6208_v18 = vpack.c.bf16 %v843_v48, %v842_v14 }
  0xc5   :  { %6305 = vmatprep.subr.msk.bf16.mxu1 %vm8352_vm1, %v6303_v9  ;;  %v10552_v29 = vmov 0 }
  0xc6   :  { %5698 = vmatmul.mubr.msk.f32.gmra.mrb[6].mxu0 %vm10507_vm11, %v5686_v10  ;;  %v8401_v6 = vpop.permute.xlu1 %7031  ;;  %v2105_v49 = vsel %vm10504_vm6, %v7024_v47, %v7019_v40  ;;  %v2104_v50 = vsel %vm10504_vm6, %v7023_v35, %v7018_v38  ;;  %v2101_v21 = vsel %vm10504_vm6, %v7019_v40, %v7024_v47  ;;  %v2100_v26 = vsel %vm10504_vm6, %v7018_v38, %v7023_v35  ;;  %vm8498_vm6 = vmpackc.low %vm1031_vm10, %vm1031_vm10 }
  0xc7   :  { %5817 = vmatmul.mubr.msk.f32.gmra.mrb[4].mxu1 %vm10507_vm11, %v5685_v0  ;;  %790 = vmatprep.mubr.f32.mxu0 %v7572_v25  ;;  %v7034_v39 = vunpack.i.h.bf16 %v8401_v6  ;;  %v7033_v41 = vunpack.i.l.bf16 %v8401_v6  ;;  %v8411_v7 = vpop.permute.xlu0 %7026  ;;  %v6309_v34 = vpack.c.bf16 %v2105_v49, %v2104_v50  ;;  %v10553_v29 = vsel %vm8498_vm6, 4294967295, %v10552_v29 }
  0xc8   :  { %1970 = vmatprep.mubr.f32.mxu1 %v7572_v25  ;;  %v7029_v53 = vunpack.i.h.bf16 %v8411_v7  ;;  %v7028_v57 = vunpack.i.l.bf16 %v8411_v7  ;;  %v6312_v44 = vpack.c.bf16 %v2101_v21, %v2100_v26  ;;  %vm1030_vm10 = vcmp.eq.s32.totalorder %v1025_v46, 1 }
  0xc9   :  { %vm8572_vm2 = vmpackc.low %vm1030_vm10, %vm1030_vm10  ;;  %v10554_v21 = vmov 0  ;;  %vm10556_vm10 = vcmp.lt.s32.totalorder %v7869_v36, 112 }
  0xca   :  { %5703 = vmatmul.mubr.msk.f32.vlgmr.msra.gmra.mrb[0].mxu0 %vm10507_vm11, %v5699_v37  ;;  %v8446_v51 = vpop.permute.xlu1 %7041  ;;  %v1010_v19 = vsel %vm10506_vm14, %v7034_v39, %v7029_v53  ;;  %v1009_v20 = vsel %vm10506_vm14, %v7033_v41, %v7028_v57  ;;  %v1006_v59 = vsel %vm10506_vm14, %v7029_v53, %v7034_v39  ;;  %v1005_v60 = vsel %vm10506_vm14, %v7028_v57, %v7033_v41  ;;  %v5707_v41 = vld [vmem:[%s10493_s2 + $0xa0] sm:$0xff] }
  0xcb   :  { %5818 = vmatmul.mubr.msk.f32.gmra.mrb[6].mxu1 %vm10507_vm11, %v5686_v10  ;;  %796 = vmatprep.mubr.f32.mxu0 %v7572_v25  ;;  %v7044_v33 = vunpack.i.h.bf16 %v8446_v51  ;;  %v7043_v0 = vunpack.i.l.bf16 %v8446_v51  ;;  %v8467_v4 = vpop.permute.xlu0 %7036  ;;  %v6211_v9 = vpack.c.bf16 %v1010_v19, %v1009_v20  ;;  %v5701_v10 = vld [vmem:[%s10493_s2 + $0x90] sm:$0xff]  ;;  %v6214_v50 = vpack.c.bf16 %v1006_v59, %v1005_v60 }
  0xcc   :  { %2049 = vmatprep.mubr.f32.mxu1 %v7572_v25  ;;  %6204 = vmatpush1.bf16.msk.msra.mxu0 %vm8431_vm4, %v6202_v13  ;;  %v7039_v12 = vunpack.i.h.bf16 %v8467_v4  ;;  %v7038_v17 = vunpack.i.l.bf16 %v8467_v4  ;;  %v1194_v20 = vrot.slane %v1186_v58, %v7845_v31  ;;  %v10555_v21 = vsel %vm8572_vm2, 4294967295, %v10554_v21 }
  0xcd   :  { %6207 = vmatprep.subr.msk.bf16.mxu0 %vm8352_vm1, %v6205_v62 }
  0xce   :  { %5704 = vmatmul.mubr.msk.f32.gmra.mrb[2].mxu0 %vm10507_vm11, %v5700_v52  ;;  %v2232_v28 = vsel %vm10506_vm14, %v7044_v33, %v7039_v12  ;;  %v2231_v22 = vsel %vm10506_vm14, %v7043_v0, %v7038_v17  ;;  %v7052_v56 = vpop.permute.xlu1 %7051 }
  0xcf   :  { %5819 = vmatmul.mubr.msk.f32.vlgmr.msra.gmra.mrb[0].mxu1 %vm10507_vm11, %v5699_v37  ;;  %802 = vmatprep.mubr.f32.mxu0 %v7572_v25  ;;  %v7047_v43 = vpop.permute.xlu0 %7046  ;;  %v7054_v2 = vunpack.i.h.bf16 %v7052_v56  ;;  %v7053_v5 = vunpack.i.l.bf16 %v7052_v56  ;;  %v6315_v40 = vpack.c.bf16 %v2232_v28, %v2231_v22  ;;  %v5702_v37 = vld [vmem:[%s10493_s2 + $0x98] sm:$0xff] }
  0xd0   :  { %2055 = vmatprep.mubr.f32.mxu1 %v7572_v25  ;;  %6308 = vmatpush1.bf16.msk.msra.mxu1 %vm8431_vm4, %v6306_v8  ;;  %v7049_v47 = vunpack.i.h.bf16 %v7047_v43  ;;  %v7048_v35 = vunpack.i.l.bf16 %v7047_v43  ;;  %v2228_v8 = vsel %vm10506_vm14, %v7039_v12, %v7044_v33 }
  0xd1   :  { %6210 = vmatpush1.bf16.msk.msra.mxu0 %vm8431_vm4, %v6208_v18  ;;  %6311 = vmatprep.subr.msk.bf16.mxu1 %vm8352_vm1, %v6309_v34  ;;  %v2227_v18 = vsel %vm10506_vm14, %v7038_v17, %v7043_v0  ;;  %v1182_v34 = vrot.slane %v7881_v42, %v7845_v31  ;;  %v5708_v42 = vld [vmem:[%s10493_s2 + $0xa8] sm:$0xff] }
  0xd2   :  { %5705 = vmatmul.mubr.msk.f32.gmra.mrb[4].mxu0 %vm10507_vm11, %v5701_v10  ;;  %6213 = vmatprep.subr.msk.bf16.mxu0 %vm8498_vm6, %v6211_v9  ;;  %v7062_v38 = vpop.permute.xlu1 %7061  ;;  %v1012_v62 = vsel %vm10506_vm14, %v7054_v2, %v7049_v47  ;;  %v1011_v63 = vsel %vm10506_vm14, %v7053_v5, %v7048_v35  ;;  %v1008_v51 = vsel %vm10506_vm14, %v7049_v47, %v7054_v2 }
  0xd3   :  { %5820 = vmatmul.mubr.msk.f32.gmra.mrb[2].mxu1 %vm10507_vm11, %v5700_v52  ;;  %808 = vmatprep.mubr.f32.mxu0 %v7572_v25  ;;  %v7057_v13 = vpop.permute.xlu0 %7056  ;;  %v7064_v48 = vunpack.i.h.bf16 %v7062_v38  ;;  %v7063_v39 = vunpack.i.l.bf16 %v7062_v38  ;;  %v6217_v26 = vpack.c.bf16 %v1012_v62, %v1011_v63  ;;  %v1007_v33 = vsel %vm10506_vm14, %v7048_v35, %v7053_v5 }
  0xd4   :  { %2061 = vmatprep.mubr.f32.mxu1 %v7572_v25  ;;  %6314 = vmatpush1.bf16.msk.msra.mxu1 %vm8431_vm4, %v6312_v44  ;;  %v7059_v53 = vunpack.i.h.bf16 %v7057_v13  ;;  %v7058_v6 = vunpack.i.l.bf16 %v7057_v13  ;;  %v6220_v46 = vpack.c.bf16 %v1008_v51, %v1007_v33  ;;  %vm10560_vm4 = vcmp.le.s32.totalorder %v7825_v27, 14 }
  0xd5   :  { %6317 = vmatprep.subr.msk.bf16.mxu1 %vm8498_vm6, %v6315_v40  ;;  %vm8625_vm1 = vmand %vm10560_vm4, %vm7932_vm9  ;;  %v10567_v13 = vmov 0  ;;  %v1190_v60 = vrot.slane %v1182_v34, %v7845_v31 }
  0xd6   :  { %5706 = vmatmul.mubr.msk.f32.gmra.mrb[6].mxu0 %vm10507_vm11, %v5702_v37  ;;  %v8542_v14 = vpop.permute.xlu1 %7071  ;;  %v2234_v0 = vsel %vm10506_vm14, %v7064_v48, %v7059_v53  ;;  %v2233_v4 = vsel %vm10506_vm14, %v7063_v39, %v7058_v6  ;;  %vm10557_vm14 = vmmov %vm10556_vm10  ;;  %v8658_v63 = vsel %vm8625_vm1, 1, %v7569_v3  ;;  %v5710_v3 = vld [vmem:[%s10493_s2 + $0xb8] sm:$0xff] }
  0xd7   :  { %5821 = vmatmul.mubr.msk.f32.gmra.mrb[4].mxu1 %vm10507_vm11, %v5701_v10  ;;  %955 = vmatprep.mubr.f32.mxu0 %v7572_v25  ;;  %v7074_v7 = vunpack.i.h.bf16 %v8542_v14  ;;  %v7073_v57 = vunpack.i.l.bf16 %v8542_v14  ;;  %v8552_v49 = vpop.permute.xlu0 %7066  ;;  %v6318_v10 = vpack.c.bf16 %v2228_v8, %v2227_v18  ;;  %v6321_v47 = vpack.c.bf16 %v2234_v0, %v2233_v4  ;;  %vm10566_vm4 = vmmov %vm10563_vm5 }
  0xd8   :  { %2067 = vmatprep.mubr.f32.mxu1 %v7572_v25  ;;  %v7069_v52 = vunpack.i.h.bf16 %v8552_v49  ;;  %v7068_v19 = vunpack.i.l.bf16 %v8552_v49  ;;  %vm1195_vm1 = vcmp.eq.s32.totalorder %v1190_v60, 1 }
  0xda   :  { %5719 = vmatmul.mubr.msk.f32.vlgmr.msra.gmra.mrb[0].mxu0 %vm10507_vm11, %v5707_v41  ;;  %v8587_v12 = vpop.permute.xlu1 %7081  ;;  %v1176_v17 = vsel %vm10556_vm10, %v7074_v7, %v7069_v52  ;;  %v1175_v28 = vsel %vm10557_vm14, %v7073_v57, %v7068_v19  ;;  %vm1196_vm10 = vcmp.eq.s32.totalorder %v1194_v20, 1  ;;  %vm10558_vm14 = vcmp.lt.s32.totalorder %v7869_v36, 113 }
  0xdb   :  { %5822 = vmatmul.mubr.msk.f32.gmra.mrb[6].mxu1 %vm10507_vm11, %v5702_v37  ;;  %961 = vmatprep.mubr.f32.mxu0 %v7572_v25  ;;  %v7084_v22 = vunpack.i.h.bf16 %v8587_v12  ;;  %v7083_v9 = vunpack.i.l.bf16 %v8587_v12  ;;  %v8608_v56 = vpop.permute.xlu0 %7076  ;;  %v2230_v2 = vsel %vm10558_vm14, %v7059_v53, %v7064_v48  ;;  %vm10559_vm11 = vmmov %vm10558_vm14  ;;  %v6223_v30 = vpack.c.bf16 %v1176_v17, %v1175_v28  ;;  %v5709_v37 = vld [vmem:[%s10493_s2 + $0xb0] sm:$0xff] }
  0xdc   :  { %2178 = vmatprep.mubr.f32.mxu1 %v7572_v25  ;;  %6216 = vmatpush1.bf16.msk.msra.mxu0 %vm8572_vm2, %v6214_v50  ;;  %v7079_v43 = vunpack.i.h.bf16 %v8608_v56  ;;  %v7078_v44 = vunpack.i.l.bf16 %v8608_v56  ;;  %v2229_v5 = vsel %vm10559_vm11, %v7058_v6, %v7063_v39  ;;  %vm10564_vm11 = vcmp.lt.s32.totalorder %v7869_v36, 112  ;;  %vm8647_vm9 = vmpackc.low %vm1196_vm10, %vm1196_vm10 }
  0xdd   :  { %6219 = vmatprep.subr.msk.bf16.mxu0 %vm8498_vm6, %v6217_v26  ;;  %vm10565_vm14 = vmmov %vm10564_vm11  ;;  %v10568_v13 = vsel %vm8647_vm9, 4294967295, %v10567_v13  ;;  %v6324_v59 = vpack.c.bf16 %v2230_v2, %v2229_v5  ;;  %v1352_v20 = vrot.slane %v8658_v63, %v7848_v32  ;;  %v1172_v8 = vsel %vm10564_vm11, %v7069_v52, %v7074_v7 }
  0xde   :  { %5720 = vmatmul.mubr.msk.f32.gmra.mrb[2].mxu0 %vm10563_vm5, %v5708_v42  ;;  %v2361_v40 = vsel %vm10564_vm11, %v7084_v22, %v7079_v43  ;;  %v2360_v27 = vsel %vm10565_vm14, %v7083_v9, %v7078_v44  ;;  %v7092_v38 = vpop.permute.xlu1 %7091  ;;  %vm10569_vm5 = vmmov %vm10566_vm4  ;;  %v1348_v5 = vrot.slane %v8658_v63, %v7845_v31 }
  0xdf   :  { %5831 = vmatmul.mubr.msk.f32.vlgmr.msra.gmra.mrb[0].mxu1 %vm10566_vm4, %v5707_v41  ;;  %967 = vmatprep.mubr.f32.mxu0 %v7572_v25  ;;  %v7087_v58 = vpop.permute.xlu0 %7086  ;;  %v7094_v62 = vunpack.i.h.bf16 %v7092_v38  ;;  %v7093_v48 = vunpack.i.l.bf16 %v7092_v38  ;;  %v6327_v6 = vpack.c.bf16 %v2361_v40, %v2360_v27  ;;  %vm10570_vm10 = vmmov %vm10566_vm4  ;;  %v1360_v17 = vrot.slane %v1352_v20, %v7845_v31 }
  0xe0   :  { %2184 = vmatprep.mubr.f32.mxu1 %v7572_v25  ;;  %6320 = vmatpush1.bf16.msk.msra.mxu1 %vm8572_vm2, %v6318_v10  ;;  %v7089_v39 = vunpack.i.h.bf16 %v7087_v58  ;;  %v7088_v53 = vunpack.i.l.bf16 %v7087_v58  ;;  %vm10571_vm14 = vmmov %vm10564_vm11 }
  0xe1   :  { %6222 = vmatpush1.bf16.msk.msra.mxu0 %vm8572_vm2, %v6220_v46  ;;  %6323 = vmatprep.subr.msk.bf16.mxu1 %vm8498_vm6, %v6321_v47  ;;  %v1171_v18 = vsel %vm10571_vm14, %v7068_v19, %v7073_v57  ;;  %vm10572_vm4 = vmmov %vm10564_vm11  ;;  %v5723_v57 = vld [vmem:[%s10493_s2 + $0xc0] sm:$0xff]  ;;  %v10576_v46 = vmov 0 }
  0xe2   :  { %5721 = vmatmul.mubr.msk.f32.gmra.mrb[4].mxu0 %vm10569_vm5, %v5709_v37  ;;  %6225 = vmatprep.subr.msk.bf16.mxu0 %vm8647_vm9, %v6223_v30  ;;  %v7102_v41 = vpop.permute.xlu1 %7101  ;;  %v1178_v26 = vsel %vm10572_vm4, %v7094_v62, %v7089_v39  ;;  %vm10573_vm5 = vmmov %vm10572_vm4  ;;  %v6226_v0 = vpack.c.bf16 %v1172_v8, %v1171_v18  ;;  %v2357_v28 = vsel %vm10572_vm4, %v7079_v43, %v7084_v22 }
  0xe3   :  { %5832 = vmatmul.mubr.msk.f32.gmra.mrb[2].mxu1 %vm10570_vm10, %v5708_v42  ;;  %973 = vmatprep.mubr.f32.mxu0 %v7572_v25  ;;  %v7097_v50 = vpop.permute.xlu0 %7096  ;;  %v1177_v32 = vsel %vm10573_vm5, %v7093_v48, %v7088_v53  ;;  %v7104_v34 = vunpack.i.h.bf16 %v7102_v41  ;;  %v7103_v7 = vunpack.i.l.bf16 %v7102_v41  ;;  %vm10574_vm14 = vmmov %vm10570_vm10  ;;  %v1174_v12 = vsel %vm10572_vm4, %v7089_v39, %v7094_v62  ;;  %v5725_v41 = vld [vmem:[%s10493_s2 + $0xd0] sm:$0xff] }
  0xe4   :  { %2190 = vmatprep.mubr.f32.mxu1 %v7572_v25  ;;  %6326 = vmatpush1.bf16.msk.msra.mxu1 %vm8572_vm2, %v6324_v59  ;;  %v7099_v52 = vunpack.i.h.bf16 %v7097_v50  ;;  %v7098_v14 = vunpack.i.l.bf16 %v7097_v50  ;;  %vm10575_vm5 = vmmov %vm10572_vm4  ;;  %v6229_v2 = vpack.c.bf16 %v1178_v26, %v1177_v32  ;;  %v1356_v8 = vrot.slane %v1348_v5, %v7845_v31  ;;  %v5726_v31 = vld [vmem:[%s10493_s2 + $0xd8] sm:$0xff] }
  0xe5   :  { %6329 = vmatprep.subr.msk.bf16.mxu1 %vm8647_vm9, %v6327_v6  ;;  %v2356_v10 = vsel %vm10575_vm5, %v7078_v44, %v7083_v9  ;;  %vm10578_vm11 = vmmov %vm10572_vm4  ;;  %v5724_v44 = vld [vmem:[%s10493_s2 + $0xc8] sm:$0xff]  ;;  %v10600_v5 = vmov 0 }
  0xe6   :  { %5722 = vmatmul.mubr.msk.f32.gmra.mrb[6].mxu0 %vm10570_vm10, %v5710_v3  ;;  %v8696_v51 = vpop.permute.xlu1 %7111  ;;  %vm8726_vm10 = vmpackc.low %vm1195_vm1, %vm1195_vm1  ;;  %v1173_v22 = vsel %vm10578_vm11, %v7088_v53, %v7093_v48  ;;  %vm10582_vm11 = vcmp.lt.s32.totalorder %v7869_v36, 111  ;;  %v6330_v38 = vpack.c.bf16 %v2357_v28, %v2356_v10 }
  0xe7   :  { %5833 = vmatmul.mubr.msk.f32.gmra.mrb[4].mxu1 %vm10574_vm14, %v5709_v37  ;;  %1121 = vmatprep.mubr.f32.mxu0 %v7572_v25  ;;  %v7114_v49 = vunpack.i.h.bf16 %v8696_v51  ;;  %v7113_v19 = vunpack.i.l.bf16 %v8696_v51  ;;  %v8706_v33 = vpop.permute.xlu0 %7106  ;;  %v10577_v46 = vsel %vm8726_vm10, 4294967295, %v10576_v46  ;;  %vm10579_vm5 = vmmov %vm10572_vm4  ;;  %v6232_v59 = vpack.c.bf16 %v1174_v12, %v1173_v22 }
  0xe8   :  { %2196 = vmatprep.mubr.f32.mxu1 %v7572_v25  ;;  %v7109_v4 = vunpack.i.h.bf16 %v8706_v33  ;;  %v7108_v42 = vunpack.i.l.bf16 %v8706_v33  ;;  %v2363_v9 = vsel %vm10579_vm5, %v7104_v34, %v7099_v52  ;;  %vm10580_vm1 = vmmov %vm10572_vm4 }
  0xe9   :  { %v2362_v56 = vsel %vm10580_vm1, %v7103_v7, %v7098_v14  ;;  %vm10581_vm2 = vmmov %vm10574_vm14 }
  0xea   :  { %5735 = vmatmul.mubr.msk.f32.vlgmr.msra.gmra.mrb[0].mxu0 %vm10574_vm14, %v5723_v57  ;;  %v8741_v43 = vpop.permute.xlu1 %7121  ;;  %v1341_v47 = vsel %vm10582_vm11, %v7114_v49, %v7109_v4  ;;  %vm10583_vm14 = vmmov %vm10582_vm11  ;;  %v6333_v63 = vpack.c.bf16 %v2363_v9, %v2362_v56 }
  0xeb   :  { %5834 = vmatmul.mubr.msk.f32.gmra.mrb[6].mxu1 %vm10581_vm2, %v5710_v3  ;;  %1127 = vmatprep.mubr.f32.mxu0 %v7572_v25  ;;  %v1340_v35 = vsel %vm10583_vm14, %v7113_v19, %v7108_v42  ;;  %v7124_v40 = vunpack.i.h.bf16 %v8741_v43  ;;  %v7123_v27 = vunpack.i.l.bf16 %v8741_v43  ;;  %v7117_v30 = vpop.permute.xlu0 %7116  ;;  %vm1362_vm2 = vcmp.eq.s32.totalorder %v1360_v17, 1  ;;  %vm10584_vm4 = vmmov %vm10580_vm1  ;;  %v6003_v3 = vld [vmem:[%s10496_s5 + $0x100] sm:$0xff] }
  0xec   :  { %2307 = vmatprep.mubr.f32.mxu1 %v7572_v25  ;;  %6228 = vmatpush1.bf16.msk.msra.mxu0 %vm8726_vm10, %v6226_v0  ;;  %v7119_v37 = vunpack.i.h.bf16 %v7117_v30  ;;  %v7118_v58 = vunpack.i.l.bf16 %v7117_v30  ;;  %v2359_v60 = vsel %vm10584_vm4, %v7099_v52, %v7104_v34  ;;  %vm10585_vm5 = vmmov %vm10580_vm1  ;;  %vm10586_vm1 = vcmask 261120  }
  0xed   :  { %v2358_v62 = vsel %vm10585_vm5, %v7098_v14, %v7103_v7  ;;  %6231 = vmatprep.subr.msk.bf16.mxu0 %vm8647_vm9, %v6229_v2  ;;  %vm10587_vm14 = vmmov %vm10582_vm11  ;;  %v6235_v53 = vpack.c.bf16 %v1341_v47, %v1340_v35  ;;  %vm1361_vm5 = vcmp.eq.s32.totalorder %v1356_v8, 1 }
  0xee   :  { %5736 = vmatmul.mubr.msk.f32.gmra.mrb[2].mxu0 %vm10586_vm1, %v5724_v44  ;;  %v2490_v48 = vsel %vm10582_vm11, %v7124_v40, %v7119_v37  ;;  %v2489_v39 = vsel %vm10587_vm14, %v7123_v27, %v7118_v58  ;;  %v7132_v6 = vpop.permute.xlu1 %7131  ;;  %vm10588_vm6 = vmmov %vm10586_vm1  ;;  %v6336_v20 = vpack.c.bf16 %v2359_v60, %v2358_v62  ;;  %v5756_v60 = vld [vmem:[%s10493_s2 + $0x108] sm:$0xff]  ;;  %v5757_v62 = vld [vmem:[%s10493_s2 + $0x110] sm:$0xff] }
  0xef   :  { %5843 = vmatmul.mubr.msk.f32.vlgmr.msra.gmra.mrb[0].mxu1 %vm10588_vm6, %v5723_v57  ;;  %1133 = vmatprep.mubr.f32.mxu0 %v7572_v25  ;;  %vm8781_vm4 = vmpackc.low %vm1362_vm2, %vm1362_vm2  ;;  %v7127_v50 = vpop.permute.xlu0 %7126  ;;  %v7134_v18 = vunpack.i.h.bf16 %v7132_v6  ;;  %v7133_v26 = vunpack.i.l.bf16 %v7132_v6  ;;  %v6339_v7 = vpack.c.bf16 %v2490_v48, %v2489_v39 }
  0xf0   :  { %2313 = vmatprep.mubr.f32.mxu1 %v7572_v25  ;;  %6332 = vmatpush1.bf16.msk.msra.mxu1 %vm8726_vm10, %v6330_v38  ;;  %v7129_v32 = vunpack.i.h.bf16 %v7127_v50  ;;  %v7128_v34 = vunpack.i.l.bf16 %v7127_v50  ;;  %vm10591_vm6 = vmmov %vm10586_vm1  ;;  %v5741_v38 = vld [vmem:[%s10493_s2 + $0xf0] sm:$0xff] }
  0xf1   :  { %6234 = vmatpush1.bf16.msk.msra.mxu0 %vm8726_vm10, %v6232_v59  ;;  %6335 = vmatprep.subr.msk.bf16.mxu1 %vm8647_vm9, %v6333_v63  ;;  %vm10592_vm2 = vmmov %vm10586_vm1  ;;  %v5755_v59 = vld [vmem:[%s10493_s2 + $0x100] sm:$0xff]  ;;  %v5758_v63 = vld [vmem:[%s10493_s2 + $0x118] sm:$0xff] }
  0xf2   :  { %5737 = vmatmul.mubr.msk.f32.gmra.mrb[4].mxu0 %vm10591_vm6, %v5725_v41  ;;  %6237 = vmatprep.subr.msk.bf16.mxu0 %vm8781_vm4, %v6235_v53  ;;  %v7142_v52 = vpop.permute.xlu1 %7141  ;;  %vm10593_vm1 = vmmov %vm10582_vm11 }
  0xf3   :  { %5844 = vmatmul.mubr.msk.f32.gmra.mrb[2].mxu1 %vm10592_vm2, %v5724_v44  ;;  %1139 = vmatprep.mubr.f32.mxu0 %v7572_v25  ;;  %v7137_v14 = vpop.permute.xlu0 %7136  ;;  %v1337_v57 = vsel %vm10593_vm1, %v7109_v4, %v7114_v49  ;;  %vm10594_vm11 = vmmov %vm10593_vm1  ;;  %v7144_v10 = vunpack.i.h.bf16 %v7142_v52  ;;  %v7143_v49 = vunpack.i.l.bf16 %v7142_v52  ;;  %v5740_v44 = vld [vmem:[%s10493_s2 + $0xe8] sm:$0xff] }
  0xf4   :  { %2319 = vmatprep.mubr.f32.mxu1 %v7572_v25  ;;  %6338 = vmatpush1.bf16.msk.msra.mxu1 %vm8726_vm10, %v6336_v20  ;;  %v1336_v0 = vsel %vm10594_vm11, %v7108_v42, %v7113_v19  ;;  %vm10595_vm14 = vmmov %vm10593_vm1  ;;  %v7139_v4 = vunpack.i.h.bf16 %v7137_v14  ;;  %v7138_v51 = vunpack.i.l.bf16 %v7137_v14  ;;  %v5739_v19 = vld [vmem:[%s10493_s2 + $0xe0] sm:$0xff] }
  0xf5   :  { %v1343_v17 = vsel %vm10595_vm14, %v7134_v18, %v7129_v32  ;;  %vm10596_vm6 = vmmov %vm10593_vm1  ;;  %6341 = vmatprep.subr.msk.bf16.mxu1 %vm8781_vm4, %v6339_v7  ;;  %v6238_v33 = vpack.c.bf16 %v1337_v57, %v1336_v0 }
  0xf6   :  { %v1342_v28 = vsel %vm10596_vm6, %v7133_v26, %v7128_v34  ;;  %5738 = vmatmul.mubr.msk.f32.gmra.mrb[6].mxu0 %vm10592_vm2, %v5726_v31  ;;  %vm10597_vm1 = vmmov %vm10592_vm2 }
  0xf7   :  { %5845 = vmatmul.mubr.msk.f32.gmra.mrb[4].mxu1 %vm10597_vm1, %v5725_v41  ;;  %1286 = vmatprep.mubr.f32.mxu0 %v7572_v25  ;;  %vm10598_vm11 = vmmov %vm10596_vm6  ;;  %v6241_v12 = vpack.c.bf16 %v1343_v17, %v1342_v28 }
  0xf8   :  { %2325 = vmatprep.mubr.f32.mxu1 %v7572_v25  ;;  %v2486_v42 = vsel %vm10598_vm11, %v7119_v37, %v7124_v40  ;;  %vm10599_vm14 = vmmov %vm10596_vm6 }
  0xf9   :  { %v2485_v2 = vsel %vm10599_vm14, %v7118_v58, %v7123_v27  ;;  %vm8835_vm6 = vmpackc.low %vm1361_vm5, %vm1361_vm5  ;;  %v5742_v58 = vld [vmem:[%s10493_s2 + $0xf8] sm:$0xff] }
  0xfa   :  { %v10601_v5 = vsel %vm8835_vm6, 4294967295, %v10600_v5  ;;  %vm10602_vm2 = vmmov %vm10597_vm1  ;;  %v6342_v47 = vpack.c.bf16 %v2486_v42, %v2485_v2 }
  0xfb   :  { %5751 = vmatmul.mubr.msk.f32.vlgmr.msra.gmra.mrb[0].mxu0 %vm10602_vm2, %v5739_v19  ;;  %vm10603_vm1 = vmmov %vm10598_vm11 }
  0xfc   :  { %v1339_v22 = vsel %vm10603_vm1, %v7129_v32, %v7134_v18  ;;  %vm10604_vm10 = vmmov %vm10603_vm1  ;;  %1292 = vmatprep.mubr.f32.mxu0 %v7572_v25  ;;  %6240 = vmatpush1.bf16.msk.msra.mxu0 %vm8835_vm6, %v6238_v33 }
  0xfd   :  { %v1338_v9 = vsel %vm10604_vm10, %v7128_v34, %v7133_v26  ;;  %vm10605_vm11 = vmmov %vm10603_vm1  ;;  %6243 = vmatprep.subr.msk.bf16.mxu0 %vm8781_vm4, %v6241_v12 }
  0xfe   :  { %v2492_v56 = vsel %vm10605_vm11, %v7144_v10, %v7139_v4  ;;  %vm10606_vm14 = vmmov %vm10603_vm1  ;;  %v6244_v35 = vpack.c.bf16 %v1339_v22, %v1338_v9 }
  0xff   :  { %v2491_v43 = vsel %vm10606_vm14, %v7143_v49, %v7138_v51  ;;  %vm10607_vm9 = vmmov %vm10602_vm2 }
 0x100   :  { %5846 = vmatmul.mubr.msk.f32.gmra.mrb[6].mxu1 %vm10607_vm9, %v5726_v31  ;;  %vm10608_vm10 = vmmov %vm10603_vm1  ;;  %v6345_v30 = vpack.c.bf16 %v2492_v56, %v2491_v43  ;;  %6246 = vmatpush1.bf16.msk.msra.mxu0 %vm8835_vm6, %v6244_v35 }
 0x101   :  { %2436 = vmatprep.mubr.f32.mxu1 %v7572_v25  ;;  %v2488_v40 = vsel %vm10608_vm10, %v7139_v4, %v7144_v10  ;;  %vm10609_vm5 = vmmov %vm10603_vm1 }
 0x102   :  { %v2487_v27 = vsel %vm10609_vm5, %v7138_v51, %v7143_v49  ;;  %vm10610_vm9 = vmmov %vm10602_vm2 }
 0x103   :  { %5752 = vmatmul.mubr.msk.f32.gmra.mrb[2].mxu0 %vm10610_vm9, %v5740_v44  ;;  %v6348_v37 = vpack.c.bf16 %v2488_v40, %v2487_v27  ;;  %vm10611_vm1 = vmmov %vm10602_vm2 }
 0x104   :  { %5855 = vmatmul.mubr.msk.f32.vlgmr.msra.gmra.mrb[0].mxu1 %vm10602_vm2, %v5739_v19  ;;  %1298 = vmatprep.mubr.f32.mxu0 %v7572_v25  ;;  %vm10612_vm11 = vmmov %vm10611_vm1 }
 0x105   :  { %2442 = vmatprep.mubr.f32.mxu1 %v7572_v25  ;;  %6344 = vmatpush1.bf16.msk.msra.mxu1 %vm8835_vm6, %v6342_v47  ;;  %vm10613_vm14 = vmmov %vm10611_vm1 }
 0x106   :  { %6347 = vmatprep.subr.msk.bf16.mxu1 %vm8781_vm4, %v6345_v30  ;;  %vm10614_vm10 = vmmov %vm10611_vm1 }
 0x107   :  { %5753 = vmatmul.mubr.msk.f32.gmra.mrb[4].mxu0 %vm10611_vm1, %v5741_v38  ;;  %vm10615_vm5 = vmmov %vm10611_vm1 }
 0x108   :  { %5856 = vmatmul.mubr.msk.f32.gmra.mrb[2].mxu1 %vm10612_vm11, %v5740_v44  ;;  %1304 = vmatprep.mubr.f32.mxu0 %v7572_v25  ;;  %vm10616_vm9 = vmmov %vm10611_vm1 }
 0x109   :  { %2448 = vmatprep.mubr.f32.mxu1 %v7572_v25  ;;  %6350 = vmatpush1.bf16.msk.msra.mxu1 %vm8835_vm6, %v6348_v37  ;;  %vm10617_vm2 = vmmov %vm10611_vm1 }
 0x10a   :  { %vm10618_vm11 = vmmov %vm10611_vm1 }
 0x10b   :  { %5754 = vmatmul.mubr.msk.f32.gmra.mrb[6].mxu0 %vm10613_vm14, %v5742_v58  ;;  %vm10619_vm14 = vmmov %vm10611_vm1 }
 0x10c   :  { %5857 = vmatmul.mubr.msk.f32.gmra.mrb[4].mxu1 %vm10614_vm10, %v5741_v38  ;;  %1452 = vmatprep.mubr.f32.mxu0 %v7572_v25  ;;  %vm10620_vm10 = vmmov %vm10611_vm1 }
 0x10d   :  { %2454 = vmatprep.mubr.f32.mxu1 %v7572_v25 }
 0x10f   :  { %5767 = vmatmul.mubr.msk.f32.vlgmr.msra.gmra.mrb[0].mxu0 %vm10615_vm5, %v5755_v59  ;;  %vm10621_vm5 = vmmov %vm10611_vm1 }
 0x110   :  { %5858 = vmatmul.mubr.msk.f32.gmra.mrb[6].mxu1 %vm10616_vm9, %v5742_v58  ;;  %1458 = vmatprep.mubr.f32.mxu0 %v7572_v25  ;;  %vm10622_vm9 = vmmov %vm10611_vm1 }
 0x111   :  { %2565 = vmatprep.mubr.f32.mxu1 %v7572_v25 }
 0x113   :  { %5768 = vmatmul.mubr.msk.f32.gmra.mrb[2].mxu0 %vm10617_vm2, %v5756_v60 }
 0x114   :  { %5867 = vmatmul.mubr.msk.f32.vlgmr.msra.gmra.mrb[0].mxu1 %vm10611_vm1, %v5755_v59  ;;  %1464 = vmatprep.mubr.f32.mxu0 %v7572_v25 }
 0x115   :  { %2571 = vmatprep.mubr.f32.mxu1 %v7572_v25 }
 0x117   :  { %5769 = vmatmul.mubr.msk.f32.gmra.mrb[4].mxu0 %vm10618_vm11, %v5757_v62 }
 0x118   :  { %5868 = vmatmul.mubr.msk.f32.gmra.mrb[2].mxu1 %vm10619_vm14, %v5756_v60  ;;  %1470 = vmatprep.mubr.f32.mxu0 %v7572_v25 }
 0x119   :  { %2577 = vmatprep.mubr.f32.mxu1 %v7572_v25 }
 0x11b   :  { %5770 = vmatmul.mubr.msk.f32.gmra.mrb[6].mxu0 %vm10620_vm10, %v5758_v63 }
 0x11c   :  { %5869 = vmatmul.mubr.msk.f32.gmra.mrb[4].mxu1 %vm10621_vm5, %v5757_v62  ;;  %3055 = vmatprep.mubr.f32.mxu0 %v7572_v25 }
 0x11d   :  { %2583 = vmatprep.mubr.f32.mxu1 %v7572_v25 }
 0x120   :  { %5870 = vmatmul.mubr.msk.f32.gmra.mrb[6].mxu1 %vm10622_vm9, %v5758_v63 }
 0x121   :  { %4299 = vmatprep.mubr.f32.mxu1 %v7572_v25 }
 0x1e2   :  { %v8918_v48 = vpop.f32.mrb[0].mxu0 }
 0x1e3   :  { %v8920_v39 = vpop.f32.mrb[1].mxu0  ;;  %v2630_v53 = vmul.f32 %v8918_v48, %v8918_v48 }
 0x1e4   :  { %v2598_v6 = vadd.f32 %v8920_v39, %v8918_v48  ;;  %v2631_v41 = vmul.f32 %v8920_v39, %v8920_v39 }
 0x1e6   :  { %2599 = vadd.xlane.f32.xlu0 %v2598_v6  ;;  %v8928_v50 = vpop.f32.mrb[2].mxu0  ;;  %v2638_v20 = vadd.f32 %v2631_v41, %v2630_v53 }
 0x1e7   :  { %v8930_v8 = vpop.f32.mrb[0].mxu1  ;;  %v8932_v18 = vpop.f32.mrb[3].mxu0  ;;  %v2632_v26 = vmul.f32 %v8928_v50, %v8928_v50 }
 0x1e8   :  { %v8936_v32 = vpop.f32.mrb[1].mxu1  ;;  %2639 = vadd.xlane.f32.xlu1 %v2638_v20  ;;  %v2654_v34 = vmul.f32 %v8930_v8, %v8930_v8  ;;  %v2601_v7 = vadd.f32 %v8932_v18, %v8928_v50  ;;  %v2633_v31 = vmul.f32 %v8932_v18, %v8932_v18 }
 0x1e9   :  { %v2614_v52 = vadd.f32 %v8936_v32, %v8930_v8  ;;  %v2655_v14 = vmul.f32 %v8936_v32, %v8936_v32 }
 0x1ea   :  { %v8948_v57 = vpop.f32.mrb[4].mxu0  ;;  %v2641_v0 = vadd.f32 %v2633_v31, %v2632_v26 }
 0x1eb   :  { %v8950_v17 = vpop.f32.mrb[2].mxu1  ;;  %2615 = vadd.xlane.f32.xlu0 %v2614_v52  ;;  %v8952_v28 = vpop.f32.mrb[5].mxu0  ;;  %v2662_v10 = vadd.f32 %v2655_v14, %v2654_v34  ;;  %v2634_v49 = vmul.f32 %v8948_v57, %v8948_v57 }
 0x1ec   :  { %v8956_v4 = vpop.f32.mrb[3].mxu1  ;;  %v2604_v51 = vadd.f32 %v8952_v28, %v8948_v57  ;;  %v2656_v19 = vmul.f32 %v8950_v17, %v8950_v17  ;;  %v2635_v33 = vmul.f32 %v8952_v28, %v8952_v28 }
 0x1ed   :  { %2663 = vadd.xlane.f32.xlu1 %v2662_v10  ;;  %v2617_v42 = vadd.f32 %v8956_v4, %v8950_v17  ;;  %v2657_v2 = vmul.f32 %v8956_v4, %v8956_v4 }
 0x1ee   :  { %v8968_v12 = vpop.f32.mrb[6].mxu0  ;;  %v2644_v22 = vadd.f32 %v2635_v33, %v2634_v49 }
 0x1ef   :  { %v8970_v9 = vpop.f32.mrb[4].mxu1  ;;  %2618 = vadd.xlane.f32.xlu0 %v2617_v42  ;;  %v8972_v56 = vpop.f32.mrb[7].mxu0  ;;  %v2665_v43 = vadd.f32 %v2657_v2, %v2656_v19  ;;  %v2636_v44 = vmul.f32 %v8968_v12, %v8968_v12 }
 0x1f0   :  { %v8976_v47 = vpop.f32.mrb[5].mxu1  ;;  %v2607_v35 = vadd.f32 %v8972_v56, %v8968_v12  ;;  %v2658_v40 = vmul.f32 %v8970_v9, %v8970_v9  ;;  %v2637_v27 = vmul.f32 %v8972_v56, %v8972_v56 }
 0x1f1   :  { %2602 = vadd.xlane.f32.xlu1 %v2601_v7  ;;  %v2620_v30 = vadd.f32 %v8976_v47, %v8970_v9  ;;  %v2659_v38 = vmul.f32 %v8976_v47, %v8976_v47 }
 0x1f2   :  { %v2647_v37 = vadd.f32 %v2637_v27, %v2636_v44 }
 0x1f3   :  { %v8988_v58 = vpop.f32.mrb[6].mxu1  ;;  %2642 = vadd.xlane.f32.xlu0 %v2641_v0  ;;  %v2668_v59 = vadd.f32 %v2659_v38, %v2658_v40 }
 0x1f4   :  { %v8990_v60 = vpop.f32.mrb[7].mxu1  ;;  %v2660_v62 = vmul.f32 %v8988_v58, %v8988_v58 }
 0x1f5   :  { %2605 = vadd.xlane.f32.xlu1 %v2604_v51  ;;  %v2623_v63 = vadd.f32 %v8990_v60, %v8988_v58  ;;  %v2661_v53 = vmul.f32 %v8990_v60, %v8990_v60 }
 0x1f7   :  { %2666 = vadd.xlane.f32.xlu0 %v2665_v43  ;;  %v2671_v6 = vadd.f32 %v2661_v53, %v2660_v62 }
 0x1f9   :  { %2621 = vadd.xlane.f32.xlu1 %v2620_v30 }
 0x1fb   :  { %2608 = vadd.xlane.f32.xlu0 %v2607_v35 }
 0x1fd   :  { %2645 = vadd.xlane.f32.xlu1 %v2644_v22 }
 0x1ff   :  { %2624 = vadd.xlane.f32.xlu0 %v2623_v63  ;;  %v2694_v63 = vld [vmem:[%s10494_s3] sm:$0xff] }
 0x201   :  { %2669 = vadd.xlane.f32.xlu1 %v2668_v59 }
 0x203   :  { %2648 = vadd.xlane.f32.xlu0 %v2647_v37 }
 0x207   :  { %2672 = vadd.xlane.f32.xlu0 %v2671_v6 }
 0x273   :  { %v2600_v41 = vpop.xlane.xlu0 %2599 }
 0x275   :  { %v2640_v20 = vpop.xlane.xlu1 %2639 }
 0x278   :  { %v2616_v26 = vpop.xlane.xlu0 %2615 }
 0x279   :  { %v2626_v34 = vadd.f32 %v2616_v26, %v2600_v41 }
 0x27a   :  { %v2664_v7 = vpop.xlane.xlu1 %2663 }
 0x27b   :  { %v2678_v31 = vmul.f32 0.001953125, %v2626_v34  ;;  %v2674_v52 = vadd.f32 %v2664_v7, %v2640_v20 }
 0x27c   :  { %v2619_v14 = vpop.xlane.xlu0 %2618 }
 0x27d   :  { %v2686_v0 = vmul.f32 %v2678_v31, %v2678_v31  ;;  %v2682_v10 = vmul.f32 0.001953125, %v2674_v52  ;;  %v2710_v52 = vld [vmem:[%s10495_s4] sm:$0xff] }
 0x27e   :  { %v2603_v49 = vpop.xlane.xlu1 %2602 }
 0x27f   :  { %v2690_v51 = vsub.f32 %v2682_v10, %v2686_v0  ;;  %v2627_v19 = vadd.f32 %v2619_v14, %v2603_v49 }
 0x280   :  { %v2643_v33 = vpop.xlane.xlu0 %2642 }
 0x281   :  { %v2698_v42 = vadd.f32 1e-05, %v2690_v51  ;;  %v2679_v22 = vmul.f32 0.001953125, %v2627_v19 }
 0x282   :  { %v2606_v2 = vpop.xlane.xlu1 %2605 }
 0x283   :  { %7467 = vrsqrt.f32 %v2698_v42  ;;  %v2687_v40 = vmul.f32 %v2679_v22, %v2679_v22 }
 0x284   :  { %v2667_v43 = vpop.xlane.xlu0 %2666 }
 0x285   :  { %v2675_v44 = vadd.f32 %v2667_v43, %v2643_v33 }
 0x286   :  { %v2622_v35 = vpop.xlane.xlu1 %2621 }
 0x287   :  { %v2683_v27 = vmul.f32 0.001953125, %v2675_v44  ;;  %v2628_v37 = vadd.f32 %v2622_v35, %v2606_v2  ;;  %v2695_v44 = vld [vmem:[%s10494_s3 + $0x8] sm:$0xff] }
 0x288   :  { %v2609_v30 = vpop.xlane.xlu0 %2608 }
 0x289   :  { %v2691_v38 = vsub.f32 %v2683_v27, %v2687_v40  ;;  %v2680_v41 = vmul.f32 0.001953125, %v2628_v37 }
 0x28a   :  { %v2646_v59 = vpop.xlane.xlu1 %2645 }
 0x28b   :  { %v2699_v62 = vadd.f32 1e-05, %v2691_v38  ;;  %v2688_v10 = vmul.f32 %v2680_v41, %v2680_v41 }
 0x28c   :  { %v2625_v53 = vpop.xlane.xlu0 %2624 }
 0x28d   :  { %v7468_v6 = vpop.eup %7467  ;;  %7469 = vrsqrt.f32 %v2699_v62  ;;  %v2629_v34 = vadd.f32 %v2625_v53, %v2609_v30 }
 0x28e   :  { %v2670_v20 = vpop.xlane.xlu1 %2669  ;;  %v2706_v26 = vmul.f32 %v7468_v6, %v2694_v63  ;;  %v2696_v63 = vld [vmem:[%s10494_s3 + $0x10] sm:$0xff] }
 0x28f   :  { %v2676_v7 = vadd.f32 %v2670_v20, %v2646_v59  ;;  %v2681_v19 = vmul.f32 0.001953125, %v2629_v34  ;;  %v2697_v20 = vld [vmem:[%s10494_s3 + $0x18] sm:$0xff] }
 0x290   :  { %2724 = vperm.xlu1 %7145, %v2706_v26   ;;  %v2649_v14 = vpop.xlane.xlu0 %2648  ;;  %v2714_v0 = vmul.f32 %v2706_v26, %v2678_v31  ;;  %v2711_v31 = vld [vmem:[%s10495_s4 + $0x8] sm:$0xff] }
 0x291   :  { %v2684_v49 = vmul.f32 0.001953125, %v2676_v7  ;;  %v2689_v40 = vmul.f32 %v2681_v19, %v2681_v19 }
 0x292   :  { %v2718_v51 = vsub.f32 %v2710_v52, %v2714_v0  ;;  %v2713_v0 = vld [vmem:[%s10495_s4 + $0x18] sm:$0xff] }
 0x293   :  { %v2692_v33 = vsub.f32 %v2684_v49, %v2688_v10 }
 0x294   :  { %2752 = vperm.xlu1 %7145, %v2718_v51   ;;  %v2673_v42 = vpop.xlane.xlu0 %2672 }
 0x295   :  { %v2700_v2 = vadd.f32 1e-05, %v2692_v33  ;;  %v2677_v43 = vadd.f32 %v2673_v42, %v2649_v14 }
 0x297   :  { %v7470_v35 = vpop.eup %7469  ;;  %7471 = vrsqrt.f32 %v2700_v2  ;;  %v2685_v27 = vmul.f32 0.001953125, %v2677_v43 }
 0x298   :  { %v2707_v30 = vmul.f32 %v7470_v35, %v2695_v44 }
 0x299   :  { %v2693_v38 = vsub.f32 %v2685_v27, %v2689_v40 }
 0x29a   :  { %2729 = vperm.xlu0 %7146, %v2707_v30   ;;  %v2715_v37 = vmul.f32 %v2707_v30, %v2679_v22  ;;  %v2712_v22 = vld [vmem:[%s10495_s4 + $0x10] sm:$0xff] }
 0x29b   :  { %v2701_v59 = vadd.f32 1e-05, %v2693_v38 }
 0x29c   :  { %v2719_v62 = vsub.f32 %v2711_v31, %v2715_v37 }
 0x29d   :  { %7473 = vrsqrt.f32 %v2701_v59 }
 0x29e   :  { %2757 = vperm.xlu1 %7145, %v2719_v62  }
 0x2a1   :  { %v7472_v53 = vpop.eup %7471 }
 0x2a2   :  { %v2708_v6 = vmul.f32 %v7472_v53, %v2696_v63 }
 0x2a4   :  { %2734 = vperm.xlu1 %7145, %v2708_v6   ;;  %v2716_v7 = vmul.f32 %v2708_v6, %v2680_v41 }
 0x2a6   :  { %v2720_v52 = vsub.f32 %v2712_v22, %v2716_v7 }
 0x2a7   :  { %v7474_v26 = vpop.eup %7473 }
 0x2a8   :  { %v2709_v34 = vmul.f32 %v7474_v26, %v2697_v20 }
 0x2aa   :  { %2739 = vperm.xlu1 %7145, %v2709_v34   ;;  %v2717_v14 = vmul.f32 %v2709_v34, %v2681_v19 }
 0x2ac   :  { %v2721_v10 = vsub.f32 %v2713_v0, %v2717_v14 }
 0x2ae   :  { %2762 = vperm.xlu1 %7145, %v2720_v52  }
 0x2b2   :  { %2767 = vperm.xlu1 %7145, %v2721_v10  }
 0x30f   :  { %v2725_v49 = vpop.permute.xlu1 %2724 }
 0x310   :  { %v2742_v51 = vmul.f32 %v2725_v49, %v8918_v48  ;;  %v2743_v33 = vmul.f32 %v2725_v49, %v8920_v39  ;;  %v2834_v41 = vmul.f32 %v2725_v49, %v8930_v8  ;;  %v2835_v42 = vmul.f32 %v2725_v49, %v8936_v32 }
 0x313   :  { %v2753_v2 = vpop.permute.xlu1 %2752 }
 0x314   :  { %v2770_v43 = vadd.f32 %v2753_v2, %v2742_v51  ;;  %v2771_v44 = vadd.f32 %v2753_v2, %v2743_v33  ;;  %v2842_v19 = vadd.f32 %v2834_v41, %v2753_v2  ;;  %v2843_v35 = vadd.f32 %v2835_v42, %v2753_v2 }
 0x316   :  { %v2786_v40 = vmul.f32 1.442695, %v2770_v43  ;;  %v2788_v27 = vmul.f32 1.442695, %v2771_v44  ;;  %v2858_v30 = vmul.f32 1.442695, %v2842_v19 }
 0x317   :  { %v2860_v38 = vmul.f32 1.442695, %v2843_v35  ;;  %vm2778_vm2 = vcmp.gt.f32.partialorder %v2770_v43, 0.0  ;;  %vm2779_vm1 = vcmp.gt.f32.partialorder %v2771_v44, 0.0  ;;  %vm2850_vm11 = vcmp.gt.f32.partialorder %v2842_v19, 0.0 }
 0x318   :  { %7475 = vpow2.f32 %v2786_v40  ;;  %vm2851_vm14 = vcmp.gt.f32.partialorder %v2843_v35, 0.0 }
 0x319   :  { %7477 = vpow2.f32 %v2788_v27  ;;  %v2730_v31 = vpop.permute.xlu0 %2729 }
 0x31a   :  { %7479 = vpow2.f32 %v2858_v30  ;;  %v2744_v48 = vmul.f32 %v2730_v31, %v8928_v50  ;;  %v2745_v39 = vmul.f32 %v2730_v31, %v8932_v18  ;;  %v2836_v8 = vmul.f32 %v2730_v31, %v8950_v17 }
 0x31b   :  { %7481 = vpow2.f32 %v2860_v38  ;;  %v2837_v32 = vmul.f32 %v2730_v31, %v8956_v4 }
 0x31d   :  { %v2758_v37 = vpop.permute.xlu1 %2757 }
 0x31e   :  { %v2772_v59 = vadd.f32 %v2758_v37, %v2744_v48  ;;  %v9030_v62 = vadd.f32 %v2758_v37, %v2745_v39  ;;  %v9032_v63 = vadd.f32 %v2836_v8, %v2758_v37  ;;  %v9034_v53 = vadd.f32 %v2837_v32, %v2758_v37 }
 0x320   :  { %v2790_v6 = vmul.f32 1.442695, %v2772_v59  ;;  %v2792_v20 = vmul.f32 1.442695, %v9030_v62  ;;  %v2862_v26 = vmul.f32 1.442695, %v9032_v63 }
 0x321   :  { %v2864_v50 = vmul.f32 1.442695, %v9034_v53  ;;  %vm2780_vm10 = vcmp.gt.f32.partialorder %v2772_v59, 0.0  ;;  %vm2781_vm5 = vcmp.gt.f32.partialorder %v9030_v62, 0.0  ;;  %vm2852_vm9 = vcmp.gt.f32.partialorder %v9032_v63, 0.0 }
 0x322   :  { %v7476_v18 = vpop.eup %7475  ;;  %7483 = vpow2.f32 %v2790_v6  ;;  %vm2853_vm6 = vcmp.gt.f32.partialorder %v9034_v53, 0.0 }
 0x323   :  { %v7478_v17 = vpop.eup %7477  ;;  %7485 = vpow2.f32 %v2792_v20  ;;  %v5871_v7 = vadd.f32 -1.0, %v7476_v18  ;;  %v2735_v14 = vpop.permute.xlu1 %2734 }
 0x324   :  { %v7480_v4 = vpop.eup %7479  ;;  %7487 = vpow2.f32 %v2862_v26  ;;  %v5872_v22 = vadd.f32 -1.0, %v7478_v17  ;;  %v2746_v40 = vmul.f32 %v2735_v14, %v8948_v57  ;;  %v2747_v27 = vmul.f32 %v2735_v14, %v8952_v28 }
 0x325   :  { %v7482_v34 = vpop.eup %7481  ;;  %v5879_v52 = vadd.f32 -1.0, %v7480_v4  ;;  %7489 = vpow2.f32 %v2864_v50  ;;  %v2810_v49 = vmul.f32 1.6732632, %v5871_v7  ;;  %v2838_v30 = vmul.f32 %v2735_v14, %v8970_v9 }
 0x326   :  { %v5880_v0 = vadd.f32 -1.0, %v7482_v34  ;;  %v2811_v51 = vmul.f32 1.6732632, %v5872_v22  ;;  %v2839_v38 = vmul.f32 %v2735_v14, %v8976_v47 }
 0x327   :  { %v2882_v10 = vmul.f32 1.6732632, %v5879_v52  ;;  %v2818_v48 = vsel %vm2778_vm2, %v2770_v43, %v2810_v49 }
 0x328   :  { %v2883_v33 = vmul.f32 1.6732632, %v5880_v0  ;;  %v2819_v39 = vsel %vm2779_vm1, %v2771_v44, %v2811_v51 }
 0x329   :  { %v2740_v41 = vpop.permute.xlu1 %2739  ;;  %v2890_v42 = vsel %vm2850_vm11, %v2842_v19, %v2882_v10 }
 0x32a   :  { %v2891_v19 = vsel %vm2851_vm14, %v2843_v35, %v2883_v33  ;;  %v9047_v6 = vmul.f32 1.050701, %v2890_v42  ;;  %v2748_v47 = vmul.f32 %v2740_v41, %v8968_v12  ;;  %v2749_v18 = vmul.f32 %v2740_v41, %v8972_v56 }
 0x32b   :  { %v2840_v56 = vmul.f32 %v2740_v41, %v8988_v58  ;;  %v2841_v14 = vmul.f32 %v2740_v41, %v8990_v60 }
 0x32c   :  { %v7484_v2 = vpop.eup %7483 }
 0x32d   :  { %v7486_v31 = vpop.eup %7485  ;;  %v5873_v8 = vadd.f32 -1.0, %v7484_v2  ;;  %v2763_v32 = vpop.permute.xlu1 %2762 }
 0x32e   :  { %v7488_v37 = vpop.eup %7487  ;;  %v5874_v20 = vadd.f32 -1.0, %v7486_v31  ;;  %v9049_v26 = vadd.f32 %v2763_v32, %v2746_v40  ;;  %v9051_v57 = vadd.f32 %v2763_v32, %v2747_v27  ;;  %v9055_v35 = vadd.f32 %v2838_v30, %v2763_v32 }
 0x32f   :  { %v7490_v28 = vpop.eup %7489  ;;  %v2812_v50 = vmul.f32 1.6732632, %v5873_v8  ;;  %v5881_v9 = vadd.f32 -1.0, %v7488_v37  ;;  %v9057_v17 = vadd.f32 %v2839_v38, %v2763_v32  ;;  %v9095_v40 = vmul.f32 1.050701, %v2818_v48 }
 0x330   :  { %v2813_v43 = vmul.f32 1.6732632, %v5874_v20  ;;  %v5882_v44 = vadd.f32 -1.0, %v7490_v28  ;;  %v2794_v7 = vmul.f32 1.442695, %v9049_v26  ;;  %vm2783_vm2 = vcmp.gt.f32.partialorder %v9051_v57, 0.0 }
 0x331   :  { %v2820_v4 = vsel %vm2780_vm10, %v2772_v59, %v2812_v50  ;;  %v2884_v34 = vmul.f32 1.6732632, %v5881_v9  ;;  %v2796_v22 = vmul.f32 1.442695, %v9051_v57  ;;  %v2768_v0 = vpop.permute.xlu1 %2767  ;;  %v2866_v58 = vmul.f32 1.442695, %v9055_v35 }
 0x332   :  { %v2821_v52 = vsel %vm2781_vm5, %v9030_v62, %v2813_v43  ;;  %v2885_v12 = vmul.f32 1.6732632, %v5882_v44  ;;  %v9067_v10 = vmul.f32 1.050701, %v2820_v4  ;;  %7491 = vpow2.f32 %v2794_v7 }
 0x333   :  { %v9069_v49 = vmul.f32 1.050701, %v2821_v52  ;;  %v2892_v59 = vsel %vm2852_vm9, %v9032_v63, %v2884_v34  ;;  %7493 = vpow2.f32 %v2796_v22  ;;  %v2868_v33 = vmul.f32 1.442695, %v9057_v17 }
 0x334   :  { %v2893_v51 = vsel %vm2853_vm6, %v9034_v53, %v2885_v12  ;;  %v9077_v62 = vmul.f32 1.050701, %v2892_v59  ;;  %v9083_v41 = vadd.f32 %v2768_v0, %v2748_v47  ;;  %v9085_v42 = vadd.f32 %v2768_v0, %v2749_v18 }
 0x335   :  { %v9080_v60 = vmul.f32 1.050701, %v2893_v51  ;;  %7495 = vpow2.f32 %v2866_v58  ;;  %v9087_v63 = vadd.f32 %v2840_v56, %v2768_v0  ;;  %v9089_v2 = vadd.f32 %v2841_v14, %v2768_v0 }
 0x336   :  { %v9093_v53 = vpack.i.bf16 %v9077_v62, %v9047_v6  ;;  %v9097_v27 = vmul.f32 1.050701, %v2819_v39  ;;  %7497 = vpow2.f32 %v2868_v33  ;;  %v2798_v30 = vmul.f32 1.442695, %v9083_v41 }
 0x337   :  { %v9100_v38 = vmul.f32 1.050701, %v2891_v19  ;;  %v2800_v31 = vmul.f32 1.442695, %v9085_v42  ;;  %v2870_v8 = vmul.f32 1.442695, %v9087_v63  ;;  %v9109_v48 = vpack.i.bf16 %v9067_v10, %v9095_v40 }
 0x338   :  { %7158 = vrot.lane.b32.xlu0 %v9093_v53, %s7570_s21  ;;  %7499 = vpow2.f32 %v2798_v30  ;;  %v2872_v32 = vmul.f32 1.442695, %v9089_v2  ;;  %v9113_v39 = vpack.i.bf16 %v9069_v49, %v9097_v27  ;;  %vm2782_vm6 = vcmp.gt.f32.partialorder %v9049_v26, 0.0 }
 0x339   :  { %7501 = vpow2.f32 %v2800_v31  ;;  %v9118_v19 = vpack.i.bf16 %v9080_v60, %v9100_v38  ;;  %7148 = vrot.lane.b32.xlu1 %v9109_v48, %s7570_s21  ;;  %vm2854_vm1 = vcmp.gt.f32.partialorder %v9055_v35, 0.0  ;;  %vm2855_vm11 = vcmp.gt.f32.partialorder %v9057_v17, 0.0 }
 0x33a   :  { %7503 = vpow2.f32 %v2870_v8  ;;  %vm2784_vm14 = vcmp.gt.f32.partialorder %v9083_v41, 0.0  ;;  %vm2785_vm10 = vcmp.gt.f32.partialorder %v9085_v42, 0.0  ;;  %vm2856_vm5 = vcmp.gt.f32.partialorder %v9087_v63, 0.0 }
 0x33b   :  { %7505 = vpow2.f32 %v2872_v32  ;;  %vm2857_vm9 = vcmp.gt.f32.partialorder %v9089_v2, 0.0 }
 0x33c   :  { %v7492_v37 = vpop.eup %7491 }
 0x33d   :  { %v7494_v20 = vpop.eup %7493  ;;  %v5875_v28 = vadd.f32 -1.0, %v7492_v37  ;;  %7153 = vrot.lane.b32.xlu1 %v9113_v39, %s7570_s21 }
 0x33e   :  { %v5876_v50 = vadd.f32 -1.0, %v7494_v20 }
 0x33f   :  { %v7496_v9 = vpop.eup %7495  ;;  %v2814_v47 = vmul.f32 1.6732632, %v5875_v28 }
 0x340   :  { %v7498_v18 = vpop.eup %7497  ;;  %v2815_v43 = vmul.f32 1.6732632, %v5876_v50  ;;  %v5883_v44 = vadd.f32 -1.0, %v7496_v9  ;;  %v6503_v50 = vpack.c.bf16 %v9080_v60, %v9100_v38  ;;  %v5933_v38 = vld [vmem:[%s10496_s5 + $0x70] sm:$0xff] }
 0x341   :  { %v5884_v4 = vadd.f32 -1.0, %v7498_v18  ;;  %v2822_v7 = vsel %vm2782_vm6, %v9049_v26, %v2814_v47  ;;  %7163 = vrot.lane.b32.xlu1 %v9118_v19, %s7570_s21  ;;  %v6399_v26 = vpack.c.bf16 %v9069_v49, %v9097_v27  ;;  %vm10623_vm6 = vcmp.lt.s32.totalorder %v7869_v36, 16 }
 0x342   :  { %v7500_v34 = vpop.eup %7499  ;;  %v2886_v22 = vmul.f32 1.6732632, %v5883_v44  ;;  %v2823_v0 = vsel %vm2783_vm2, %v9051_v57, %v2815_v43  ;;  %v9141_v58 = vmul.f32 1.050701, %v2822_v7  ;;  %v6401_v57 = vpack.c.bf16 %v9067_v10, %v9095_v40  ;;  %vm10624_vm2 = vmmov %vm10623_vm6  ;;  %v5932_v10 = vld [vmem:[%s10496_s5 + $0x68] sm:$0xff] }
 0x343   :  { %v7502_v52 = vpop.eup %7501  ;;  %v2887_v12 = vmul.f32 1.6732632, %v5884_v4  ;;  %v5877_v56 = vadd.f32 -1.0, %v7500_v34  ;;  %v9158_v9 = vmul.f32 1.050701, %v2823_v0 }
 0x344   :  { %v7504_v14 = vpop.eup %7503  ;;  %v5878_v59 = vadd.f32 -1.0, %v7502_v52  ;;  %v2894_v33 = vsel %vm2854_vm1, %v9055_v35, %v2886_v22  ;;  %v6505_v35 = vpack.c.bf16 %v9077_v62, %v9047_v6  ;;  %vm10625_vm1 = vmmov %vm10624_vm2 }
 0x345   :  { %v7506_v51 = vpop.eup %7505  ;;  %v2816_v30 = vmul.f32 1.6732632, %v5877_v56  ;;  %v5885_v31 = vadd.f32 -1.0, %v7504_v14  ;;  %v2895_v8 = vsel %vm2855_vm11, %v9057_v17, %v2887_v12  ;;  %v9165_v43 = vmul.f32 1.050701, %v2894_v33  ;;  %vm10626_vm11 = vmmov %vm10625_vm1 }
 0x346   :  { %v2817_v32 = vmul.f32 1.6732632, %v5878_v59  ;;  %v5886_v37 = vadd.f32 -1.0, %v7506_v51  ;;  %v9167_v44 = vmul.f32 1.050701, %v2895_v8 }
 0x347   :  { %v2824_v20 = vsel %vm2784_vm14, %v9083_v41, %v2816_v30  ;;  %v2888_v28 = vmul.f32 1.6732632, %v5885_v31  ;;  %vm10627_vm14 = vmmov %vm10625_vm1 }
 0x348   :  { %v2825_v17 = vsel %vm2785_vm10, %v9085_v42, %v2817_v32  ;;  %v9163_v47 = vmul.f32 1.050701, %v2824_v20  ;;  %v2889_v18 = vmul.f32 1.6732632, %v5886_v37  ;;  %vm10628_vm10 = vmmov %vm10625_vm1 }
 0x349   :  { %v9169_v41 = vmul.f32 1.050701, %v2825_v17  ;;  %v2896_v4 = vsel %vm2856_vm5, %v9087_v63, %v2888_v28  ;;  %vm10629_vm5 = vmmov %vm10625_vm1 }
 0x34a   :  { %v2897_v34 = vsel %vm2857_vm9, %v9089_v2, %v2889_v18  ;;  %v9177_v7 = vmul.f32 1.050701, %v2896_v4  ;;  %v9181_v42 = vpack.i.bf16 %v9163_v47, %v9141_v58  ;;  %v6405_v56 = vpack.c.bf16 %v9163_v47, %v9141_v58  ;;  %vm10630_vm9 = vmmov %vm10625_vm1 }
 0x34b   :  { %v9183_v22 = vmul.f32 1.050701, %v2897_v34  ;;  %v9187_v52 = vpack.i.bf16 %v9169_v41, %v9158_v9  ;;  %v6403_v12 = vpack.c.bf16 %v9169_v41, %v9158_v9 }
 0x34c   :  { %7168 = vrot.lane.b32.xlu0 %v9181_v42, %s7570_s21  ;;  %v9193_v63 = vpack.i.bf16 %v9177_v7, %v9165_v43 }
 0x34d   :  { %7173 = vrot.lane.b32.xlu1 %v9187_v52, %s7570_s21  ;;  %v9199_v2 = vpack.i.bf16 %v9183_v22, %v9167_v44 }
 0x350   :  { %7178 = vrot.lane.b32.xlu0 %v9193_v63, %s7570_s21 }
 0x351   :  { %7188 = vrot.lane.b32.xlu1 %v9199_v2, %s7570_s21 }
 0x354   :  { %7183 = vrot.lane.b32.xlu0 %v9109_v48, %s7571_s16 }
 0x355   :  { %7193 = vrot.lane.b32.xlu1 %v9113_v39, %s7571_s16 }
 0x358   :  { %7198 = vrot.lane.b32.xlu0 %v9093_v53, %s7571_s16 }
 0x359   :  { %7203 = vrot.lane.b32.xlu1 %v9118_v19, %s7571_s16 }
 0x35c   :  { %7208 = vrot.lane.b32.xlu0 %v9181_v42, %s7571_s16 }
 0x35d   :  { %7213 = vrot.lane.b32.xlu1 %v9187_v52, %s7571_s16 }
 0x360   :  { %7218 = vrot.lane.b32.xlu0 %v9193_v63, %s7571_s16 }
 0x361   :  { %7228 = vrot.lane.b32.xlu1 %v9199_v2, %s7571_s16 }
 0x364   :  { %7223 = vrot.lane.b32.xlu0 %v9109_v48, %s7573_s17 }
 0x365   :  { %7233 = vrot.lane.b32.xlu1 %v9113_v39, %s7573_s17 }
 0x368   :  { %7238 = vrot.lane.b32.xlu0 %v9093_v53, %s7573_s17 }
 0x369   :  { %7243 = vrot.lane.b32.xlu1 %v9118_v19, %s7573_s17 }
 0x36c   :  { %7248 = vrot.lane.b32.xlu0 %v9181_v42, %s7573_s17 }
 0x36d   :  { %7253 = vrot.lane.b32.xlu1 %v9187_v52, %s7573_s17 }
 0x370   :  { %7258 = vrot.lane.b32.xlu0 %v9193_v63, %s7573_s17 }
 0x371   :  { %7268 = vrot.lane.b32.xlu1 %v9199_v2, %s7573_s17 }
 0x374   :  { %7263 = vrot.lane.b32.xlu0 %v9109_v48, %s7574_s18 }
 0x375   :  { %7273 = vrot.lane.b32.xlu1 %v9113_v39, %s7574_s18 }
 0x378   :  { %7278 = vrot.lane.b32.xlu0 %v9093_v53, %s7574_s18 }
 0x379   :  { %7283 = vrot.lane.b32.xlu1 %v9118_v19, %s7574_s18 }
 0x37c   :  { %7288 = vrot.lane.b32.xlu0 %v9181_v42, %s7574_s18 }
 0x37d   :  { %7293 = vrot.lane.b32.xlu1 %v9187_v52, %s7574_s18 }
 0x380   :  { %7298 = vrot.lane.b32.xlu0 %v9193_v63, %s7574_s18 }
 0x381   :  { %7303 = vrot.lane.b32.xlu1 %v9199_v2, %s7574_s18 }
 0x384   :  { %7308 = vrot.lane.b32.xlu0 %v9109_v48, %s7575_s19 }
 0x385   :  { %7313 = vrot.lane.b32.xlu1 %v9113_v39, %s7575_s19 }
 0x388   :  { %7318 = vrot.lane.b32.xlu0 %v9093_v53, %s7575_s19 }
 0x389   :  { %7323 = vrot.lane.b32.xlu1 %v9118_v19, %s7575_s19 }
 0x38c   :  { %7328 = vrot.lane.b32.xlu0 %v9181_v42, %s7575_s19 }
 0x38d   :  { %7333 = vrot.lane.b32.xlu1 %v9187_v52, %s7575_s19 }
 0x390   :  { %7338 = vrot.lane.b32.xlu0 %v9193_v63, %s7575_s19 }
 0x391   :  { %7348 = vrot.lane.b32.xlu1 %v9199_v2, %s7575_s19 }
 0x394   :  { %7343 = vrot.lane.b32.xlu0 %v9109_v48, %s7576_s20 }
 0x395   :  { %7353 = vrot.lane.b32.xlu1 %v9113_v39, %s7576_s20 }
 0x398   :  { %7358 = vrot.lane.b32.xlu0 %v9093_v53, %s7576_s20 }
 0x399   :  { %7363 = vrot.lane.b32.xlu1 %v9118_v19, %s7576_s20 }
 0x39c   :  { %7368 = vrot.lane.b32.xlu0 %v9181_v42, %s7576_s20 }
 0x39d   :  { %7373 = vrot.lane.b32.xlu1 %v9187_v52, %s7576_s20 }
 0x3a0   :  { %7378 = vrot.lane.b32.xlu0 %v9193_v63, %s7576_s20 }
 0x3a1   :  { %7388 = vrot.lane.b32.xlu1 %v9199_v2, %s7576_s20 }
 0x3a4   :  { %7383 = vrot.lane.b32.xlu0 %v9109_v48, %s7577_s22 }
 0x3a5   :  { %7393 = vrot.lane.b32.xlu1 %v9113_v39, %s7577_s22 }
 0x3a8   :  { %7398 = vrot.lane.b32.xlu0 %v9093_v53, %s7577_s22 }
 0x3a9   :  { %7403 = vrot.lane.b32.xlu1 %v9118_v19, %s7577_s22 }
 0x3aa   :  { %v7159_v32 = vpop.permute.xlu0 %7158 }
 0x3ab   :  { %v7149_v59 = vpop.permute.xlu1 %7148 }
 0x3ac   :  { %7408 = vrot.lane.b32.xlu0 %v9181_v42, %s7577_s22  ;;  %v7151_v33 = vunpack.i.h.bf16 %v7149_v59  ;;  %v7150_v30 = vunpack.i.l.bf16 %v7149_v59  ;;  %v7161_v59 = vunpack.i.h.bf16 %v7159_v32 }
 0x3ad   :  { %7413 = vrot.lane.b32.xlu1 %v9187_v52, %s7577_s22 }
 0x3af   :  { %v7154_v51 = vpop.permute.xlu1 %7153 }
 0x3b0   :  { %7418 = vrot.lane.b32.xlu0 %v9193_v63, %s7577_s22  ;;  %v7156_v31 = vunpack.i.h.bf16 %v7154_v51  ;;  %v7155_v8 = vunpack.i.l.bf16 %v7154_v51  ;;  %v7160_v51 = vunpack.i.l.bf16 %v7159_v32 }
 0x3b1   :  { %7428 = vrot.lane.b32.xlu1 %v9199_v2, %s7577_s22 }
 0x3b2   :  { %v2958_v37 = vsel %vm10623_vm6, %v7150_v30, %v7155_v8  ;;  %v2959_v20 = vsel %vm10624_vm2, %v7151_v33, %v7156_v31  ;;  %v2962_v28 = vsel %vm10625_vm1, %v7155_v8, %v7150_v30  ;;  %v2963_v17 = vsel %vm10626_vm11, %v7156_v31, %v7151_v33  ;;  %vm10631_vm6 = vmmov %vm10625_vm1 }
 0x3b3   :  { %v6351_v18 = vpack.c.bf16 %v2959_v20, %v2958_v37  ;;  %v6354_v4 = vpack.c.bf16 %v2963_v17, %v2962_v28  ;;  %v7164_v34 = vpop.permute.xlu1 %7163  ;;  %vm10632_vm2 = vmmov %vm10625_vm1 }
 0x3b4   :  { %7423 = vrot.lane.b32.xlu0 %v9109_v48, %s7578_s0  ;;  %v7166_v0 = vunpack.i.h.bf16 %v7164_v34  ;;  %v7165_v14 = vunpack.i.l.bf16 %v7164_v34  ;;  %vm10633_vm11 = vmmov %vm10625_vm1 }
 0x3b5   :  { %7433 = vrot.lane.b32.xlu1 %v9113_v39, %s7578_s0  ;;  %6353 = vmatprep.subr.msk.bf16.mxu0 %vm7893_vm7, %v6351_v18 }
 0x3b6   :  { %v4220_v30 = vsel %vm10627_vm14, %v7161_v59, %v7166_v0  ;;  %v4224_v33 = vsel %vm10628_vm10, %v7166_v0, %v7161_v59  ;;  %v4219_v31 = vsel %vm10629_vm5, %v7160_v51, %v7165_v14  ;;  %v4223_v48 = vsel %vm10630_vm9, %v7165_v14, %v7160_v51  ;;  %6356 = vmatpush1.bf16.msk.msra.mxu0 %vm7917_vm8, %v6354_v4  ;;  %vm10634_vm14 = vmmov %vm10625_vm1 }
 0x3b7   :  { %v6455_v8 = vpack.c.bf16 %v4220_v30, %v4219_v31  ;;  %v6458_v39 = vpack.c.bf16 %v4224_v33, %v4223_v48  ;;  %vm10635_vm10 = vmmov %vm10625_vm1 }
 0x3b8   :  { %7438 = vrot.lane.b32.xlu0 %v9093_v53, %s7578_s0  ;;  %vm10636_vm5 = vmmov %vm10625_vm1 }
 0x3b9   :  { %7443 = vrot.lane.b32.xlu1 %v9118_v19, %s7578_s0  ;;  %6457 = vmatprep.subr.msk.bf16.mxu1 %vm7893_vm7, %v6455_v8  ;;  %vm10637_vm9 = vmmov %vm10625_vm1 }
 0x3ba   :  { %6460 = vmatpush1.bf16.msk.msra.mxu1 %vm7917_vm8, %v6458_v39  ;;  %v5887_v39 = vld [vmem:[%s10496_s5 + $0x20] sm:$0xff] }
 0x3bc   :  { %7448 = vrot.lane.b32.xlu0 %v9181_v42, %s7578_s0 }
 0x3bd   :  { %7453 = vrot.lane.b32.xlu1 %v9187_v52, %s7578_s0 }
 0x3be   :  { %v7169_v14 = vpop.permute.xlu0 %7168 }
 0x3bf   :  { %v7171_v0 = vunpack.i.h.bf16 %v7169_v14  ;;  %v7170_v32 = vunpack.i.l.bf16 %v7169_v14  ;;  %v7174_v37 = vpop.permute.xlu1 %7173 }
 0x3c0   :  { %v7176_v53 = vunpack.i.h.bf16 %v7174_v37  ;;  %v7175_v20 = vunpack.i.l.bf16 %v7174_v37  ;;  %7458 = vrot.lane.b32.xlu0 %v9193_v63, %s7578_s0 }
 0x3c1   :  { %7463 = vrot.lane.b32.xlu1 %v9199_v2, %s7578_s0 }
 0x3c2   :  { %v2961_v19 = vsel %vm10631_vm6, %v7171_v0, %v7176_v53  ;;  %v2965_v42 = vsel %vm10632_vm2, %v7176_v53, %v7171_v0  ;;  %v2960_v52 = vsel %vm10625_vm1, %v7170_v32, %v7175_v20  ;;  %v2964_v28 = vsel %vm10633_vm11, %v7175_v20, %v7170_v32  ;;  %v7179_v17 = vpop.permute.xlu0 %7178 }
 0x3c3   :  { %v6357_v18 = vpack.c.bf16 %v2961_v19, %v2960_v52  ;;  %v6360_v4 = vpack.c.bf16 %v2965_v42, %v2964_v28  ;;  %v7181_v34 = vunpack.i.h.bf16 %v7179_v17  ;;  %v7180_v63 = vunpack.i.l.bf16 %v7179_v17  ;;  %v7189_v59 = vpop.permute.xlu1 %7188 }
 0x3c4   :  { %v7191_v51 = vunpack.i.h.bf16 %v7189_v59  ;;  %v7190_v2 = vunpack.i.l.bf16 %v7189_v59  ;;  %vm10638_vm6 = vcmask 261120   ;;  %vm10639_vm2 = vcmp.lt.s32.totalorder %v7869_v36, 17 }
 0x3c5   :  { %6359 = vmatprep.subr.msk.bf16.mxu0 %vm7893_vm7, %v6357_v18  ;;  %vm10640_vm1 = vmmov %vm10639_vm2 }
 0x3c6   :  { %v4222_v30 = vsel %vm10634_vm14, %v7181_v34, %v7191_v51  ;;  %v4226_v33 = vsel %vm10635_vm10, %v7191_v51, %v7181_v34  ;;  %v4221_v31 = vsel %vm10636_vm5, %v7180_v63, %v7190_v2  ;;  %v4225_v48 = vsel %vm10637_vm9, %v7190_v2, %v7180_v63  ;;  %6362 = vmatpush1.bf16.msk.msra.mxu0 %vm7917_vm8, %v6360_v4  ;;  %v7184_v8 = vpop.permute.xlu0 %7183  ;;  %vm10641_vm11 = vmmov %vm10640_vm1 }
 0x3c7   :  { %v6461_v14 = vpack.c.bf16 %v4222_v30, %v4221_v31  ;;  %v6464_v0 = vpack.c.bf16 %v4226_v33, %v4225_v48  ;;  %v7186_v32 = vunpack.i.h.bf16 %v7184_v8  ;;  %v7185_v37 = vunpack.i.l.bf16 %v7184_v8  ;;  %v7194_v53 = vpop.permute.xlu1 %7193  ;;  %vm10642_vm14 = vmmov %vm10640_vm1 }
 0x3c8   :  { %v7196_v20 = vunpack.i.h.bf16 %v7194_v53  ;;  %v7195_v19 = vunpack.i.l.bf16 %v7194_v53  ;;  %vm10645_vm10 = vmmov %vm10640_vm1 }
 0x3c9   :  { %5899 = vmatmul.mubr.msk.f32.vlgmr.msra.gmra.mrb[8].mxu0 %vm10638_vm6, %v5887_v39  ;;  %6463 = vmatprep.subr.msk.bf16.mxu1 %vm7893_vm7, %v6461_v14  ;;  %vm10643_vm7 = vmmov %vm10638_vm6  ;;  %v5889_v14 = vld [vmem:[%s10496_s5 + $0x30] sm:$0xff] }
 0x3ca   :  { %v2923_v42 = vsel %vm10639_vm2, %v7186_v32, %v7196_v20  ;;  %v2927_v52 = vsel %vm10640_vm1, %v7196_v20, %v7186_v32  ;;  %v2922_v28 = vsel %vm10641_vm11, %v7185_v37, %v7195_v19  ;;  %v2926_v17 = vsel %vm10642_vm14, %v7195_v19, %v7185_v37  ;;  %6466 = vmatpush1.bf16.msk.msra.mxu1 %vm7917_vm8, %v6464_v0  ;;  %v7199_v18 = vpop.permute.xlu0 %7198  ;;  %vm10644_vm8 = vmmov %vm10640_vm1 }
 0x3cb   :  { %v6363_v4 = vpack.c.bf16 %v2923_v42, %v2922_v28  ;;  %v6366_v34 = vpack.c.bf16 %v2927_v52, %v2926_v17  ;;  %v7201_v63 = vunpack.i.h.bf16 %v7199_v18  ;;  %v7200_v59 = vunpack.i.l.bf16 %v7199_v18  ;;  %v7204_v51 = vpop.permute.xlu1 %7203  ;;  %3061 = vmatprep.mubr.f32.mxu0 %v7572_v25  ;;  %vm10646_vm5 = vmmov %vm10640_vm1 }
 0x3cc   :  { %v7206_v2 = vunpack.i.h.bf16 %v7204_v51  ;;  %v7205_v30 = vunpack.i.l.bf16 %v7204_v51  ;;  %vm10647_vm9 = vmmov %vm10640_vm1 }
 0x3cd   :  { %5900 = vmatmul.mubr.msk.f32.gmra.mrb[10].mxu0 %vm10643_vm7, %v5888_v55  ;;  %6365 = vmatprep.subr.msk.bf16.mxu0 %vm7990_vm15, %v6363_v4  ;;  %vm10648_vm2 = vmmov %vm10638_vm6  ;;  %v5890_v4 = vld [vmem:[%s10496_s5 + $0x38] sm:$0xff] }
 0x3ce   :  { %v4188_v15 = vsel %vm10644_vm8, %v7201_v63, %v7206_v2  ;;  %v4192_v33 = vsel %vm10645_vm10, %v7206_v2, %v7201_v63  ;;  %v4187_v31 = vsel %vm10646_vm5, %v7200_v59, %v7205_v30  ;;  %v4191_v48 = vsel %vm10647_vm9, %v7205_v30, %v7200_v59  ;;  %6027 = vmatmul.mubr.msk.f32.vlgmr.msra.gmra.mrb[8].mxu1 %vm10638_vm6, %v5887_v39  ;;  %v7209_v8 = vpop.permute.xlu0 %7208  ;;  %vm10649_vm11 = vmmov %vm10640_vm1 }
 0x3cf   :  { %v6467_v0 = vpack.c.bf16 %v4188_v15, %v4187_v31  ;;  %v6470_v32 = vpack.c.bf16 %v4192_v33, %v4191_v48  ;;  %6368 = vmatpush1.bf16.msk.msra.mxu0 %vm7997_vm0, %v6366_v34  ;;  %v7211_v37 = vunpack.i.h.bf16 %v7209_v8  ;;  %v7210_v53 = vunpack.i.l.bf16 %v7209_v8  ;;  %v7214_v20 = vpop.permute.xlu1 %7213  ;;  %3067 = vmatprep.mubr.f32.mxu0 %v7572_v25  ;;  %vm10650_vm14 = vmmov %vm10640_vm1 }
 0x3d0   :  { %v7216_v19 = vunpack.i.h.bf16 %v7214_v20  ;;  %v7215_v42 = vunpack.i.l.bf16 %v7214_v20  ;;  %4305 = vmatprep.mubr.f32.mxu1 %v7572_v25  ;;  %vm10651_vm7 = vmmov %vm10640_vm1  ;;  %v2938_v20 = vld [vmem:[%s10496_s5] sm:$0xff] }
 0x3d1   :  { %5901 = vmatmul.mubr.msk.f32.gmra.mrb[12].mxu0 %vm10648_vm2, %v5889_v14  ;;  %6469 = vmatprep.subr.msk.bf16.mxu1 %vm7990_vm15, %v6467_v0  ;;  %vm10652_vm8 = vmmov %vm10648_vm2 }
 0x3d2   :  { %v2925_v39 = vsel %vm10640_vm1, %v7211_v37, %v7216_v19  ;;  %v2929_v52 = vsel %vm10649_vm11, %v7216_v19, %v7211_v37  ;;  %v2924_v28 = vsel %vm10650_vm14, %v7210_v53, %v7215_v42  ;;  %v2928_v17 = vsel %vm10651_vm7, %v7215_v42, %v7210_v53  ;;  %6028 = vmatmul.mubr.msk.f32.gmra.mrb[10].mxu1 %vm10652_vm8, %v5888_v55  ;;  %v7219_v18 = vpop.permute.xlu0 %7218  ;;  %vm10653_vm10 = vmmov %vm10648_vm2 }
 0x3d3   :  { %v6369_v34 = vpack.c.bf16 %v2925_v39, %v2924_v28  ;;  %v6372_v63 = vpack.c.bf16 %v2929_v52, %v2928_v17  ;;  %6472 = vmatpush1.bf16.msk.msra.mxu1 %vm7997_vm0, %v6470_v32  ;;  %v7221_v59 = vunpack.i.h.bf16 %v7219_v18  ;;  %v7220_v51 = vunpack.i.l.bf16 %v7219_v18  ;;  %v7229_v2 = vpop.permute.xlu1 %7228  ;;  %3073 = vmatprep.mubr.f32.mxu0 %v7572_v25  ;;  %vm10654_vm5 = vmmov %vm10640_vm1 }
 0x3d4   :  { %v7231_v30 = vunpack.i.h.bf16 %v7229_v2  ;;  %v7230_v15 = vunpack.i.l.bf16 %v7229_v2  ;;  %4311 = vmatprep.mubr.f32.mxu1 %v7572_v25  ;;  %vm10655_vm9 = vmmov %vm10640_vm1  ;;  %vm10659_vm11 = vcmp.lt.s32.totalorder %v7869_v36, 15  ;;  %v2939_v2 = vld [vmem:[%s10496_s5 + $0x8] sm:$0xff] }
 0x3d5   :  { %5902 = vmatmul.mubr.msk.f32.gmra.mrb[14].mxu0 %vm10653_vm10, %v5890_v4  ;;  %6371 = vmatprep.subr.msk.bf16.mxu0 %vm7990_vm15, %v6369_v34  ;;  %vm10656_vm6 = vmmov %vm10640_vm1 }
 0x3d6   :  { %v4190_v55 = vsel %vm10654_vm5, %v7221_v59, %v7231_v30  ;;  %v4194_v33 = vsel %vm10655_vm9, %v7231_v30, %v7221_v59  ;;  %v4189_v31 = vsel %vm10656_vm6, %v7220_v51, %v7230_v15  ;;  %vm10657_vm2 = vmmov %vm10640_vm1  ;;  %v7224_v8 = vpop.permute.xlu0 %7223  ;;  %6374 = vmatpush1.bf16.msk.msra.mxu0 %vm7997_vm0, %v6372_v63  ;;  %3156 = vmatprep.mubr.f32.mxu0 %v7572_v25 }
 0x3d7   :  { %v4193_v48 = vsel %vm10657_vm2, %v7230_v15, %v7220_v51  ;;  %vm10658_vm1 = vmmov %vm10652_vm8  ;;  %v6473_v0 = vpack.c.bf16 %v4190_v55, %v4189_v31  ;;  %v7226_v32 = vunpack.i.h.bf16 %v7224_v8  ;;  %v7225_v37 = vunpack.i.l.bf16 %v7224_v8  ;;  %v7234_v53 = vpop.permute.xlu1 %7233 }
 0x3d8   :  { %6029 = vmatmul.mubr.msk.f32.gmra.mrb[12].mxu1 %vm10658_vm1, %v5889_v14  ;;  %v6476_v19 = vpack.c.bf16 %v4194_v33, %v4193_v48  ;;  %v7236_v42 = vunpack.i.h.bf16 %v7234_v53  ;;  %v7235_v39 = vunpack.i.l.bf16 %v7234_v53  ;;  %vm10660_vm14 = vmmov %vm10659_vm11 }
 0x3d9   :  { %4317 = vmatprep.mubr.f32.mxu1 %v7572_v25  ;;  %6475 = vmatprep.subr.msk.bf16.mxu1 %vm7990_vm15, %v6473_v0  ;;  %vm10661_vm7 = vmmov %vm10659_vm11 }
 0x3da   :  { %v3198_v14 = vsel %vm10659_vm11, %v7226_v32, %v7236_v42  ;;  %v3202_v52 = vsel %vm10660_vm14, %v7236_v42, %v7226_v32  ;;  %v3197_v28 = vsel %vm10661_vm7, %v7225_v37, %v7235_v39  ;;  %vm10662_vm8 = vmmov %vm10661_vm7  ;;  %v7239_v18 = vpop.permute.xlu0 %7238  ;;  %6478 = vmatpush1.bf16.msk.msra.mxu1 %vm7997_vm0, %v6476_v19 }
 0x3db   :  { %v3201_v17 = vsel %vm10662_vm8, %v7235_v39, %v7225_v37  ;;  %vm10663_vm10 = vmmov %vm10658_vm1  ;;  %v6375_v34 = vpack.c.bf16 %v3198_v14, %v3197_v28  ;;  %v7241_v11 = vunpack.i.h.bf16 %v7239_v18  ;;  %v7240_v59 = vunpack.i.l.bf16 %v7239_v18  ;;  %v7244_v51 = vpop.permute.xlu1 %7243  ;;  %v2940_v37 = vld [vmem:[%s10496_s5 + $0x10] sm:$0xff] }
 0x3dc   :  { %5911 = vmatmul.mubr.msk.f32.vlgmr.msra.gmra.mrb[8].mxu0 %vm10663_vm10, %v2938_v20  ;;  %v6378_v63 = vpack.c.bf16 %v3202_v52, %v3201_v17  ;;  %vm10664_vm5 = vmmov %vm10658_vm1  ;;  %v7246_v30 = vunpack.i.h.bf16 %v7244_v51  ;;  %v7245_v15 = vunpack.i.l.bf16 %v7244_v51 }
 0x3dd   :  { %6030 = vmatmul.mubr.msk.f32.gmra.mrb[14].mxu1 %vm10664_vm5, %v5890_v4  ;;  %3162 = vmatprep.mubr.f32.mxu0 %v7572_v25  ;;  %vm10665_vm15 = vmmov %vm10661_vm7 }
 0x3de   :  { %4388 = vmatprep.mubr.f32.mxu1 %v7572_v25  ;;  %6377 = vmatprep.subr.msk.bf16.mxu0 %vm8077_vm12, %v6375_v34  ;;  %v4430_v4 = vsel %vm10665_vm15, %v7241_v11, %v7246_v30  ;;  %vm10666_vm9 = vmmov %vm10661_vm7  ;;  %v7249_v31 = vpop.permute.xlu0 %7248 }
 0x3df   :  { %v4434_v55 = vsel %vm10666_vm9, %v7246_v30, %v7241_v11  ;;  %vm10667_vm6 = vmmov %vm10661_vm7  ;;  %6380 = vmatpush1.bf16.msk.msra.mxu0 %vm8091_vm13, %v6378_v63  ;;  %v7251_v8 = vunpack.i.h.bf16 %v7249_v31  ;;  %v7250_v0 = vunpack.i.l.bf16 %v7249_v31  ;;  %v7254_v32 = vpop.permute.xlu1 %7253 }
 0x3e0   :  { %v4429_v33 = vsel %vm10667_vm6, %v7240_v59, %v7245_v15  ;;  %vm10668_vm2 = vmmov %vm10667_vm6  ;;  %v7256_v19 = vunpack.i.h.bf16 %v7254_v32  ;;  %v7255_v42 = vunpack.i.l.bf16 %v7254_v32 }
 0x3e1   :  { %v4433_v23 = vsel %vm10668_vm2, %v7245_v15, %v7240_v59  ;;  %vm10669_vm0 = vmmov %vm10658_vm1  ;;  %v6479_v48 = vpack.c.bf16 %v4430_v4, %v4429_v33  ;;  %v2941_v59 = vld [vmem:[%s10496_s5 + $0x18] sm:$0xff] }
 0x3e2   :  { %5912 = vmatmul.mubr.msk.f32.gmra.mrb[10].mxu0 %vm10669_vm0, %v2939_v2  ;;  %vm10670_vm1 = vmmov %vm10669_vm0  ;;  %v6482_v53 = vpack.c.bf16 %v4434_v55, %v4433_v23  ;;  %v7259_v28 = vpop.permute.xlu0 %7258 }
 0x3e3   :  { %6039 = vmatmul.mubr.msk.f32.vlgmr.msra.gmra.mrb[8].mxu1 %vm10670_vm1, %v2938_v20  ;;  %3168 = vmatprep.mubr.f32.mxu0 %v7572_v25  ;;  %vm10671_vm11 = vmmov %vm10668_vm2  ;;  %v7261_v34 = vunpack.i.h.bf16 %v7259_v28  ;;  %v7260_v63 = vunpack.i.l.bf16 %v7259_v28  ;;  %v7269_v11 = vpop.permute.xlu1 %7268 }
 0x3e4   :  { %4394 = vmatprep.mubr.f32.mxu1 %v7572_v25  ;;  %6481 = vmatprep.subr.msk.bf16.mxu1 %vm8077_vm12, %v6479_v48  ;;  %v3200_v20 = vsel %vm10671_vm11, %v7251_v8, %v7256_v19  ;;  %vm10672_vm14 = vmmov %vm10668_vm2  ;;  %v7271_v51 = vunpack.i.h.bf16 %v7269_v11  ;;  %v7270_v30 = vunpack.i.l.bf16 %v7269_v11  ;;  %vm10681_vm11 = vcmp.lt.s32.totalorder %v7869_v36, 1 }
 0x3e5   :  { %v3204_v39 = vsel %vm10672_vm14, %v7256_v19, %v7251_v8  ;;  %vm10673_vm7 = vmmov %vm10668_vm2  ;;  %6484 = vmatpush1.bf16.msk.msra.mxu1 %vm8091_vm13, %v6482_v53 }
 0x3e6   :  { %v3199_v14 = vsel %vm10673_vm7, %v7250_v0, %v7255_v42  ;;  %vm10674_vm8 = vmmov %vm10668_vm2  ;;  %v4435_v55 = vsel %vm10668_vm2, %v7270_v30, %v7260_v63  ;;  %v7264_v33 = vpop.permute.xlu0 %7263 }
 0x3e7   :  { %v3203_v52 = vsel %vm10674_vm8, %v7255_v42, %v7250_v0  ;;  %vm10675_vm10 = vmmov %vm10669_vm0  ;;  %v6381_v17 = vpack.c.bf16 %v3200_v20, %v3199_v14  ;;  %v7266_v31 = vunpack.i.h.bf16 %v7264_v33  ;;  %v7265_v48 = vunpack.i.l.bf16 %v7264_v33  ;;  %v7274_v8 = vpop.permute.xlu1 %7273  ;;  %v5915_v0 = vld [vmem:[%s10496_s5 + $0x40] sm:$0xff] }
 0x3e8   :  { %5913 = vmatmul.mubr.msk.f32.gmra.mrb[12].mxu0 %vm10675_vm10, %v2940_v37  ;;  %v6384_v18 = vpack.c.bf16 %v3204_v39, %v3203_v52  ;;  %vm10676_vm5 = vmmov %vm10669_vm0  ;;  %v7276_v53 = vunpack.i.h.bf16 %v7274_v8  ;;  %v7275_v19 = vunpack.i.l.bf16 %v7274_v8 }
 0x3e9   :  { %6040 = vmatmul.mubr.msk.f32.gmra.mrb[10].mxu1 %vm10676_vm5, %v2939_v2  ;;  %3174 = vmatprep.mubr.f32.mxu0 %v7572_v25  ;;  %vm10677_vm15 = vmmov %vm10668_vm2 }
 0x3ea   :  { %4400 = vmatprep.mubr.f32.mxu1 %v7572_v25  ;;  %6383 = vmatprep.subr.msk.bf16.mxu0 %vm8077_vm12, %v6381_v17  ;;  %v4432_v2 = vsel %vm10677_vm15, %v7261_v34, %v7271_v51  ;;  %vm10678_vm9 = vmmov %vm10668_vm2  ;;  %v7279_v14 = vpop.permute.xlu0 %7278 }
 0x3eb   :  { %v4436_v15 = vsel %vm10678_vm9, %v7271_v51, %v7261_v34  ;;  %vm10679_vm6 = vmmov %vm10668_vm2  ;;  %6386 = vmatpush1.bf16.msk.msra.mxu0 %vm8091_vm13, %v6384_v18  ;;  %v7281_v45 = vunpack.i.h.bf16 %v7279_v14  ;;  %v7280_v17 = vunpack.i.l.bf16 %v7279_v14  ;;  %v7284_v18 = vpop.permute.xlu1 %7283  ;;  %v5916_v34 = vld [vmem:[%s10496_s5 + $0x48] sm:$0xff] }
 0x3ec   :  { %v4431_v4 = vsel %vm10679_vm6, %v7260_v63, %v7270_v30  ;;  %5914 = vmatmul.mubr.msk.f32.gmra.mrb[14].mxu0 %vm10669_vm0, %v2941_v59  ;;  %vm10680_vm1 = vmmov %vm10669_vm0  ;;  %v6488_v32 = vpack.c.bf16 %v4436_v15, %v4435_v55  ;;  %v7286_v63 = vunpack.i.h.bf16 %v7284_v18  ;;  %v7285_v11 = vunpack.i.l.bf16 %v7284_v18 }
 0x3ed   :  { %v6485_v23 = vpack.c.bf16 %v4432_v2, %v4431_v4  ;;  %6041 = vmatmul.mubr.msk.f32.gmra.mrb[12].mxu1 %vm10680_vm1, %v2940_v37  ;;  %3294 = vmatprep.mubr.f32.mxu0 %v7572_v25  ;;  %v3344_v37 = vsel %vm10681_vm11, %v7266_v31, %v7276_v53  ;;  %vm10682_vm14 = vmmov %vm10681_vm11 }
 0x3ee   :  { %4406 = vmatprep.mubr.f32.mxu1 %v7572_v25  ;;  %v3348_v42 = vsel %vm10682_vm14, %v7276_v53, %v7266_v31  ;;  %vm10683_vm7 = vmmov %vm10681_vm11  ;;  %v7289_v2 = vpop.permute.xlu0 %7288 }
 0x3ef   :  { %6487 = vmatprep.subr.msk.bf16.mxu1 %vm8077_vm12, %v6485_v23  ;;  %v3343_v20 = vsel %vm10683_vm7, %v7265_v48, %v7275_v19  ;;  %vm10684_vm8 = vmmov %vm10683_vm7  ;;  %v7291_v4 = vunpack.i.h.bf16 %v7289_v2  ;;  %v7290_v55 = vunpack.i.l.bf16 %v7289_v2  ;;  %v7294_v33 = vpop.permute.xlu1 %7293  ;;  %v5917_v23 = vld [vmem:[%s10496_s5 + $0x50] sm:$0xff] }
 0x3f0   :  { %v3347_v39 = vsel %vm10684_vm8, %v7275_v19, %v7265_v48  ;;  %vm10685_vm10 = vmmov %vm10669_vm0  ;;  %v6387_v52 = vpack.c.bf16 %v3344_v37, %v3343_v20  ;;  %6490 = vmatpush1.bf16.msk.msra.mxu1 %vm8091_vm13, %v6488_v32  ;;  %v7296_v48 = vunpack.i.h.bf16 %v7294_v33  ;;  %v7295_v8 = vunpack.i.l.bf16 %v7294_v33 }
 0x3f1   :  { %5927 = vmatmul.mubr.msk.f32.vlgmr.msra.gmra.mrb[8].mxu0 %vm10685_vm10, %v5915_v0  ;;  %v6390_v28 = vpack.c.bf16 %v3348_v42, %v3347_v39  ;;  %vm10686_vm5 = vmmov %vm10669_vm0 }
 0x3f2   :  { %6042 = vmatmul.mubr.msk.f32.gmra.mrb[14].mxu1 %vm10686_vm5, %v2941_v59  ;;  %3300 = vmatprep.mubr.f32.mxu0 %v7572_v25  ;;  %vm10687_vm12 = vmmov %vm10683_vm7  ;;  %v7299_v37 = vpop.permute.xlu0 %7298 }
 0x3f3   :  { %4509 = vmatprep.mubr.f32.mxu1 %v7572_v25  ;;  %6389 = vmatprep.subr.msk.bf16.mxu0 %vm8174_vm3, %v6387_v52  ;;  %v4559_v59 = vsel %vm10687_vm12, %v7281_v45, %v7286_v63  ;;  %vm10688_vm15 = vmmov %vm10683_vm7  ;;  %v7301_v39 = vunpack.i.h.bf16 %v7299_v37  ;;  %v7300_v14 = vunpack.i.l.bf16 %v7299_v37  ;;  %v7304_v52 = vpop.permute.xlu1 %7303 }
 0x3f4   :  { %v4563_v51 = vsel %vm10688_vm15, %v7286_v63, %v7281_v45  ;;  %vm10689_vm9 = vmmov %vm10683_vm7  ;;  %v7306_v45 = vunpack.i.h.bf16 %v7304_v52 }
 0x3f5   :  { %v4558_v30 = vsel %vm10689_vm9, %v7280_v17, %v7285_v11  ;;  %vm10690_vm6 = vmmov %vm10683_vm7 }
 0x3f6   :  { %v4562_v54 = vsel %vm10690_vm6, %v7285_v11, %v7280_v17  ;;  %vm10691_vm13 = vmmov %vm10669_vm0  ;;  %v6491_v15 = vpack.c.bf16 %v4559_v59, %v4558_v30  ;;  %v7305_v17 = vunpack.i.l.bf16 %v7304_v52  ;;  %v9590_v59 = vpop.permute.xlu0 %7308 }
 0x3f7   :  { %5928 = vmatmul.mubr.msk.f32.gmra.mrb[10].mxu0 %vm10691_vm13, %v5916_v34  ;;  %vm10692_vm2 = vmmov %vm10669_vm0  ;;  %vm10693_vm0 = vnez %v10543_v24  ;;  %v6494_v31 = vpack.c.bf16 %v4563_v51, %v4562_v54  ;;  %v7311_v30 = vunpack.i.h.bf16 %v9590_v59  ;;  %v7310_v54 = vunpack.i.l.bf16 %v9590_v59  ;;  %v7314_v2 = vpop.permute.xlu1 %7313 }
 0x3f8   :  { %6051 = vmatmul.mubr.msk.f32.vlgmr.msra.gmra.mrb[8].mxu1 %vm10692_vm2, %v5915_v0  ;;  %6392 = vmatpush1.bf16.msk.msra.mxu0 %vm10693_vm0, %v6390_v28  ;;  %vm10694_vm1 = vmmov %vm10690_vm6  ;;  %v5918_v28 = vld [vmem:[%s10496_s5 + $0x58] sm:$0xff]  ;;  %v7315_v33 = vunpack.i.l.bf16 %v7314_v2 }
 0x3f9   :  { %3306 = vmatprep.mubr.f32.mxu0 %v7572_v25  ;;  %4515 = vmatprep.mubr.f32.mxu1 %v7572_v25  ;;  %v3346_v0 = vsel %vm10694_vm1, %v7291_v4, %v7296_v48  ;;  %vm10695_vm11 = vmmov %vm10694_vm1 }
 0x3fa   :  { %6493 = vmatprep.subr.msk.bf16.mxu1 %vm8174_vm3, %v6491_v15  ;;  %v3350_v32 = vsel %vm10695_vm11, %v7296_v48, %v7291_v4  ;;  %vm10696_vm14 = vmmov %vm10694_vm1  ;;  %v5931_v15 = vld [vmem:[%s10496_s5 + $0x60] sm:$0xff] }
 0x3fb   :  { %v3345_v53 = vsel %vm10696_vm14, %v7290_v55, %v7295_v8  ;;  %vm10697_vm7 = vmmov %vm10694_vm1  ;;  %6496 = vmatpush1.bf16.msk.msra.mxu1 %vm10693_vm0, %v6494_v31  ;;  %v9618_v49 = vpop.permute.xlu1 %7323 }
 0x3fc   :  { %v3349_v19 = vsel %vm10697_vm7, %v7295_v8, %v7290_v55  ;;  %vm10698_vm8 = vmmov %vm10692_vm2  ;;  %v6393_v42 = vpack.c.bf16 %v3346_v0, %v3345_v53  ;;  %v7316_v55 = vunpack.i.h.bf16 %v7314_v2  ;;  %v7325_v8 = vunpack.i.l.bf16 %v9618_v49 }
 0x3fd   :  { %5929 = vmatmul.mubr.msk.f32.gmra.mrb[12].mxu0 %vm10698_vm8, %v5917_v23  ;;  %v6396_v20 = vpack.c.bf16 %v3350_v32, %v3349_v19  ;;  %vm10699_vm10 = vmmov %vm10692_vm2 }
 0x3fe   :  { %6052 = vmatmul.mubr.msk.f32.gmra.mrb[10].mxu1 %vm10699_vm10, %v5916_v34  ;;  %3312 = vmatprep.mubr.f32.mxu0 %v7572_v25  ;;  %vm10700_vm5 = vmmov %vm10694_vm1  ;;  %vm10713_vm10 = vnez %v10549_v1  ;;  %v5950_v1 = vld [vmem:[%s10496_s5 + $0x98] sm:$0xff] }
 0x3ff   :  { %4521 = vmatprep.mubr.f32.mxu1 %v7572_v25  ;;  %6395 = vmatprep.subr.msk.bf16.mxu0 %vm8174_vm3, %v6393_v42  ;;  %v4561_v18 = vsel %vm10700_vm5, %v7301_v39, %v7306_v45  ;;  %vm10701_vm12 = vmmov %vm10694_vm1 }
 0x400   :  { %v4565_v34 = vsel %vm10701_vm12, %v7306_v45, %v7301_v39  ;;  %vm10702_vm15 = vmmov %vm10694_vm1  ;;  %6398 = vmatpush1.bf16.msk.msra.mxu0 %vm10693_vm0, %v6396_v20  ;;  %v5947_v39 = vld [vmem:[%s10496_s5 + $0x80] sm:$0xff] }
 0x401   :  { %v4560_v63 = vsel %vm10702_vm15, %v7300_v14, %v7305_v17  ;;  %vm10703_vm9 = vmmov %vm10694_vm1  ;;  %6400 = vmatprep.subr.bf16.mxu0 %v6399_v26  ;;  %vm10706_vm1 = vcmp.lt.s32.totalorder %v7869_v36, 127  ;;  %v7326_v26 = vunpack.i.h.bf16 %v9618_v49 }
 0x402   :  { %v4564_v11 = vsel %vm10703_vm9, %v7305_v17, %v7300_v14  ;;  %vm10704_vm6 = vmmov %vm10692_vm2  ;;  %v6497_v51 = vpack.c.bf16 %v4561_v18, %v4560_v63  ;;  %v3608_v31 = vsel %vm10706_vm1, %v7316_v55, %v7311_v30 }
 0x403   :  { %5930 = vmatmul.mubr.msk.f32.gmra.mrb[14].mxu0 %vm10704_vm6, %v5918_v28  ;;  %vm10705_vm13 = vmmov %vm10692_vm2  ;;  %v6500_v4 = vpack.c.bf16 %v4565_v34, %v4564_v11 }
 0x404   :  { %6053 = vmatmul.mubr.msk.f32.gmra.mrb[12].mxu1 %vm10705_vm13, %v5917_v23  ;;  %3440 = vmatprep.mubr.f32.mxu0 %v7572_v25  ;;  %v9608_v23 = vpop.permute.xlu0 %7318  ;;  %vm10707_vm11 = vmmov %vm10706_vm1 }
 0x405   :  { %4527 = vmatprep.mubr.f32.mxu1 %v7572_v25  ;;  %6499 = vmatprep.subr.msk.bf16.mxu1 %vm8174_vm3, %v6497_v51  ;;  %v3607_v48 = vsel %vm10707_vm11, %v7315_v33, %v7310_v54  ;;  %vm10708_vm14 = vmmov %vm10692_vm2  ;;  %v7321_v16 = vunpack.i.h.bf16 %v9608_v23  ;;  %v7320_v27 = vunpack.i.l.bf16 %v9608_v23 }
 0x406   :  { %6502 = vmatpush1.bf16.msk.msra.mxu1 %vm10693_vm0, %v6500_v4  ;;  %v6407_v40 = vpack.c.bf16 %v3608_v31, %v3607_v48  ;;  %vm10709_vm3 = vmmov %vm10692_vm2  ;;  %v5948_v31 = vld [vmem:[%s10496_s5 + $0x88] sm:$0xff] }
 0x407   :  { %5943 = vmatmul.mubr.msk.f32.vlgmr.msra.gmra.mrb[8].mxu0 %vm10692_vm2, %v5931_v15  ;;  %6504 = vmatprep.subr.bf16.mxu1 %v6503_v50  ;;  %vm10710_vm0 = vmmov %vm10692_vm2  ;;  %v10714_v50 = vpack.c.bf16 %v9183_v22, %v9167_v44  ;;  %v5934_v44 = vld [vmem:[%s10496_s5 + $0x78] sm:$0xff]  ;;  %v10717_v22 = vpack.c.bf16 %v9177_v7, %v9165_v43 }
 0x408   :  { %6054 = vmatmul.mubr.msk.f32.gmra.mrb[14].mxu1 %vm10708_vm14, %v5918_v28  ;;  %6402 = vmatpush1.bf16.msra.mxu0 %v6401_v57  ;;  %v7329_v24 = vpop.permute.xlu0 %7328  ;;  %v7334_v57 = vpop.permute.xlu1 %7333  ;;  %vm10711_vm7 = vmmov %vm10706_vm1  ;;  %vm10725_vm14 = vcmp.lt.s32.totalorder %v7869_v36, 113 }
 0x409   :  { %6404 = vmatprep.subr.bf16.mxu0 %v6403_v12  ;;  %3446 = vmatprep.mubr.f32.mxu0 %v7572_v25  ;;  %v4789_v9 = vsel %vm10711_vm7, %v7326_v26, %v7321_v16  ;;  %vm10712_vm8 = vmmov %vm10706_vm1  ;;  %v7331_v62 = vunpack.i.h.bf16 %v7329_v24  ;;  %v7336_v47 = vunpack.i.h.bf16 %v7334_v57  ;;  %v7335_v12 = vunpack.i.l.bf16 %v7334_v57 }
 0x40a   :  { %4638 = vmatprep.mubr.f32.mxu1 %v7572_v25  ;;  %v4788_v60 = vsel %vm10712_vm8, %v7325_v8, %v7320_v27  ;;  %vm10715_vm5 = vmmov %vm10710_vm0 }
 0x40b   :  { %5944 = vmatmul.mubr.msk.f32.gmra.mrb[10].mxu0 %vm10709_vm3, %v5932_v10  ;;  %v6511_v58 = vpack.c.bf16 %v4789_v9, %v4788_v60  ;;  %vm10716_vm12 = vmmov %vm10710_vm0  ;;  %v5949_v60 = vld [vmem:[%s10496_s5 + $0x90] sm:$0xff] }
 0x40c   :  { %6063 = vmatmul.mubr.msk.f32.vlgmr.msra.gmra.mrb[8].mxu1 %vm10710_vm0, %v5931_v15  ;;  %6406 = vmatpush1.bf16.msra.mxu0 %v6405_v56  ;;  %v9666_v41 = vpop.permute.xlu0 %7338  ;;  %v9670_v6 = vpop.permute.xlu1 %7348  ;;  %vm10718_vm15 = vmmov %vm10706_vm1 }
 0x40d   :  { %6506 = vmatpush1.bf16.msra.mxu1 %v6505_v35  ;;  %6409 = vmatprep.subr.msk.bf16.mxu0 %vm10713_vm10, %v6407_v40  ;;  %v7330_v35 = vunpack.i.l.bf16 %v7329_v24  ;;  %v3604_v0 = vsel %vm10718_vm15, %v7311_v30, %v7316_v55  ;;  %vm10719_vm9 = vmmov %vm10706_vm1  ;;  %v7341_v14 = vunpack.i.h.bf16 %v9666_v41  ;;  %v7340_v52 = vunpack.i.l.bf16 %v9666_v41 }
 0x40e   :  { %6508 = vmatprep.subr.bf16.mxu1 %v10714_v50  ;;  %3452 = vmatprep.mubr.f32.mxu0 %v7572_v25  ;;  %v3603_v32 = vsel %vm10719_vm9, %v7310_v54, %v7315_v33  ;;  %vm10720_vm6 = vmmov %vm10710_vm0  ;;  %v7351_v28 = vunpack.i.h.bf16 %v9670_v6  ;;  %v7350_v45 = vunpack.i.l.bf16 %v9670_v6 }
 0x40f   :  { %4644 = vmatprep.mubr.f32.mxu1 %v7572_v25  ;;  %5945 = vmatmul.mubr.msk.f32.gmra.mrb[12].mxu0 %vm10715_vm5, %v5933_v38  ;;  %vm10721_vm13 = vmmov %vm10706_vm1  ;;  %v6410_v17 = vpack.c.bf16 %v3604_v0, %v3603_v32 }
 0x410   :  { %6064 = vmatmul.mubr.msk.f32.gmra.mrb[10].mxu1 %vm10716_vm12, %v5932_v10  ;;  %3458 = vmatprep.mubr.f32.mxu0 %v7572_v25  ;;  %v9683_v56 = vpop.permute.xlu0 %7343  ;;  %v9692_v7 = vpop.permute.xlu1 %7353  ;;  %v3610_v19 = vsel %vm10721_vm13, %v7336_v47, %v7331_v62  ;;  %vm10722_vm2 = vmmov %vm10706_vm1  ;;  %vm10731_vm12 = vnez %v10551_v61 }
 0x411   :  { %6510 = vmatpush1.bf16.msra.mxu1 %v10717_v22  ;;  %4650 = vmatprep.mubr.f32.mxu1 %v7572_v25  ;;  %v7346_v53 = vunpack.i.h.bf16 %v9683_v56  ;;  %v7345_v43 = vunpack.i.l.bf16 %v9683_v56  ;;  %v3609_v37 = vsel %vm10722_vm2, %v7335_v12, %v7330_v35  ;;  %vm10723_vm1 = vmmov %vm10710_vm0  ;;  %v7356_v42 = vunpack.i.h.bf16 %v9692_v7 }
 0x412   :  { %6513 = vmatprep.subr.msk.bf16.mxu1 %vm10713_vm10, %v6511_v58  ;;  %v7355_v20 = vunpack.i.l.bf16 %v9692_v7  ;;  %vm10724_vm11 = vmmov %vm10722_vm2  ;;  %v6413_v51 = vpack.c.bf16 %v3610_v19, %v3609_v37 }
 0x413   :  { %5946 = vmatmul.mubr.msk.f32.gmra.mrb[14].mxu0 %vm10720_vm6, %v5934_v44  ;;  %v3606_v18 = vsel %vm10724_vm11, %v7331_v62, %v7336_v47  ;;  %v3754_v34 = vsel %vm10725_vm14, %v7356_v42, %v7346_v53  ;;  %vm10726_vm3 = vmmov %vm10725_vm14 }
 0x414   :  { %6065 = vmatmul.mubr.msk.f32.gmra.mrb[12].mxu1 %vm10723_vm1, %v5933_v38  ;;  %3554 = vmatprep.mubr.f32.mxu0 %v7572_v25  ;;  %v3753_v63 = vsel %vm10726_vm3, %v7355_v20, %v7345_v43  ;;  %v9724_v11 = vpop.permute.xlu0 %7358  ;;  %vm10727_vm0 = vmmov %vm10722_vm2  ;;  %v9731_v2 = vpop.permute.xlu1 %7363 }
 0x415   :  { %4656 = vmatprep.mubr.f32.mxu1 %v7572_v25  ;;  %v3605_v59 = vsel %vm10727_vm0, %v7330_v35, %v7335_v12  ;;  %vm10728_vm7 = vmmov %vm10723_vm1  ;;  %v7361_v30 = vunpack.i.h.bf16 %v9724_v11  ;;  %v7360_v54 = vunpack.i.l.bf16 %v9724_v11  ;;  %v7366_v55 = vunpack.i.h.bf16 %v9731_v2 }
 0x416   :  { %vm10729_vm8 = vmmov %vm10727_vm0  ;;  %v7365_v33 = vunpack.i.l.bf16 %v9731_v2  ;;  %v6419_v49 = vpack.c.bf16 %v3754_v34, %v3753_v63 }
 0x417   :  { %5951 = vmatmul.mubr.msk.f32.vlgmr.msra.gmra.mrb[8].mxu0 %vm10728_vm7, %v5947_v39  ;;  %v4785_v15 = vsel %vm10729_vm8, %v7321_v16, %v7326_v26  ;;  %vm10730_vm5 = vmmov %vm10727_vm0  ;;  %v6416_v16 = vpack.c.bf16 %v3606_v18, %v3605_v59 }
 0x418   :  { %v4784_v4 = vsel %vm10730_vm5, %v7320_v27, %v7325_v8  ;;  %6412 = vmatpush1.bf16.msk.msra.mxu0 %vm10731_vm12, %v6410_v17  ;;  %vm10732_vm15 = vmmov %vm10723_vm1  ;;  %3560 = vmatprep.mubr.f32.mxu0 %v7572_v25  ;;  %v9761_v27 = vpop.permute.xlu0 %7368  ;;  %v7374_v24 = vpop.permute.xlu1 %7373 }
 0x419   :  { %6066 = vmatmul.mubr.msk.f32.gmra.mrb[14].mxu1 %vm10732_vm15, %v5934_v44  ;;  %vm10733_vm9 = vmmov %vm10727_vm0  ;;  %6415 = vmatprep.subr.msk.bf16.mxu0 %vm10713_vm10, %v6413_v51  ;;  %v6514_v26 = vpack.c.bf16 %v4785_v15, %v4784_v4  ;;  %v7371_v6 = vunpack.i.h.bf16 %v9761_v27  ;;  %v7370_v62 = vunpack.i.l.bf16 %v9761_v27  ;;  %v7376_v35 = vunpack.i.h.bf16 %v7374_v24 }
 0x41a   :  { %v4791_v48 = vsel %vm10733_vm9, %v7351_v28, %v7341_v14  ;;  %vm10734_vm6 = vmmov %vm10727_vm0  ;;  %4735 = vmatprep.mubr.f32.mxu1 %v7572_v25  ;;  %v7375_v47 = vunpack.i.l.bf16 %v7374_v24  ;;  %v5957_v24 = vld [vmem:[%s10496_s5 + $0xb0] sm:$0xff] }
 0x41b   :  { %v4790_v23 = vsel %vm10734_vm6, %v7350_v45, %v7340_v52  ;;  %vm10735_vm13 = vmmov %vm10726_vm3  ;;  %5952 = vmatmul.mubr.msk.f32.gmra.mrb[10].mxu0 %vm10723_vm1, %v5948_v31 }
 0x41c   :  { %v4918_v8 = vsel %vm10735_vm13, %v7366_v55, %v7361_v30  ;;  %vm10736_vm2 = vmmov %vm10726_vm3  ;;  %v6517_v9 = vpack.c.bf16 %v4791_v48, %v4790_v23  ;;  %6418 = vmatpush1.bf16.msk.msra.mxu0 %vm10731_vm12, %v6416_v16  ;;  %v9792_v50 = vpop.permute.xlu0 %7378  ;;  %3566 = vmatprep.mubr.f32.mxu0 %v7572_v25  ;;  %v9796_v58 = vpop.permute.xlu1 %7388 }
 0x41d   :  { %v4917_v10 = vsel %vm10736_vm2, %v7365_v33, %v7360_v54  ;;  %vm10737_vm11 = vmmov %vm10727_vm0  ;;  %v7381_v7 = vunpack.i.h.bf16 %v9792_v50  ;;  %v7380_v37 = vunpack.i.l.bf16 %v9792_v50 }
 0x41e   :  { %v4787_v40 = vsel %vm10737_vm11, %v7341_v14, %v7351_v28  ;;  %vm10738_vm14 = vmmov %vm10727_vm0  ;;  %vm10740_vm0 = vnez %v10553_v29  ;;  %v6523_v38 = vpack.c.bf16 %v4918_v8, %v4917_v10  ;;  %v4913_v28 = vsel %vm10736_vm2, %v7360_v54, %v7365_v33  ;;  %v5958_v29 = vld [vmem:[%s10496_s5 + $0xb8] sm:$0xff] }
 0x41f   :  { %v4786_v57 = vsel %vm10738_vm14, %v7340_v52, %v7350_v45  ;;  %vm10739_vm3 = vmmov %vm10723_vm1  ;;  %6421 = vmatprep.subr.msk.bf16.mxu0 %vm10740_vm0, %v6419_v49  ;;  %vm10751_vm11 = vcmp.lt.s32.totalorder %v7869_v36, 112 }
 0x420   :  { %6067 = vmatmul.mubr.msk.f32.vlgmr.msra.gmra.mrb[8].mxu1 %vm10739_vm3, %v5947_v39  ;;  %v6520_v41 = vpack.c.bf16 %v4787_v40, %v4786_v57  ;;  %vm10741_vm7 = vmmov %vm10723_vm1  ;;  %v9810_v12 = vpop.permute.xlu0 %7383  ;;  %v9827_v32 = vpop.permute.xlu1 %7393  ;;  %v5955_v39 = vld [vmem:[%s10496_s5 + $0xa0] sm:$0xff] }
 0x421   :  { %6516 = vmatpush1.bf16.msk.msra.mxu1 %vm10731_vm12, %v6514_v26  ;;  %4741 = vmatprep.mubr.f32.mxu1 %v7572_v25  ;;  %vm10742_vm8 = vmmov %vm10723_vm1  ;;  %v7386_v22 = vunpack.i.h.bf16 %v9810_v12  ;;  %v7385_v0 = vunpack.i.l.bf16 %v9810_v12  ;;  %v7396_v56 = vunpack.i.h.bf16 %v9827_v32 }
 0x422   :  { %6519 = vmatprep.subr.msk.bf16.mxu1 %vm10713_vm10, %v6517_v9  ;;  %5953 = vmatmul.mubr.msk.f32.gmra.mrb[12].mxu0 %vm10741_vm7, %v5949_v60  ;;  %vm10743_vm10 = vmmov %vm10736_vm2 }
 0x423   :  { %3572 = vmatprep.mubr.f32.mxu0 %v7572_v25  ;;  %v3750_v44 = vsel %vm10743_vm10, %v7346_v53, %v7356_v42  ;;  %vm10744_vm5 = vmmov %vm10736_vm2  ;;  %v7391_v42 = vunpack.i.h.bf16 %v9796_v58  ;;  %v3900_v18 = vsel %vm10751_vm11, %v7396_v56, %v7386_v22 }
 0x424   :  { %6068 = vmatmul.mubr.msk.f32.gmra.mrb[10].mxu1 %vm10742_vm8, %v5948_v31  ;;  %v3749_v61 = vsel %vm10744_vm5, %v7345_v43, %v7355_v20  ;;  %vm10746_vm15 = vmmov %vm10736_vm2  ;;  %v7395_v43 = vunpack.i.l.bf16 %v9827_v32  ;;  %v7390_v20 = vunpack.i.l.bf16 %v9796_v58  ;;  %v9860_v17 = vpop.permute.xlu0 %7398  ;;  %v9876_v59 = vpop.permute.xlu1 %7403 }
 0x425   :  { %6522 = vmatpush1.bf16.msk.msra.mxu1 %vm10731_vm12, %v6520_v41  ;;  %4747 = vmatprep.mubr.f32.mxu1 %v7572_v25  ;;  %vm10745_vm12 = vmmov %vm10736_vm2  ;;  %v3755_v53 = vsel %vm10746_vm15, %v7375_v47, %v7370_v62  ;;  %v6422_v14 = vpack.c.bf16 %v3750_v44, %v3749_v61  ;;  %v7401_v63 = vunpack.i.h.bf16 %v9860_v17  ;;  %v7400_v11 = vunpack.i.l.bf16 %v9860_v17 }
 0x426   :  { %6525 = vmatprep.subr.msk.bf16.mxu1 %vm10740_vm0, %v6523_v38  ;;  %v3756_v19 = vsel %vm10745_vm12, %v7376_v35, %v7371_v6  ;;  %vm10747_vm9 = vmmov %vm10723_vm1  ;;  %v7406_v54 = vunpack.i.h.bf16 %v9876_v59  ;;  %v7405_v2 = vunpack.i.l.bf16 %v9876_v59  ;;  %vm10758_vm12 = vnez %v10555_v21 }
 0x427   :  { %5954 = vmatmul.mubr.msk.f32.gmra.mrb[14].mxu0 %vm10747_vm9, %v5950_v1  ;;  %vm10748_vm6 = vmmov %vm10723_vm1 }
 0x428   :  { %6069 = vmatmul.mubr.msk.f32.gmra.mrb[12].mxu1 %vm10748_vm6, %v5949_v60  ;;  %3700 = vmatprep.mubr.f32.mxu0 %v7572_v25  ;;  %vm10749_vm13 = vmmov %vm10736_vm2  ;;  %v9896_v31 = vpop.permute.xlu0 %7408  ;;  %v7414_v27 = vpop.permute.xlu1 %7413 }
 0x429   :  { %4753 = vmatprep.mubr.f32.mxu1 %v7572_v25  ;;  %v4914_v52 = vsel %vm10749_vm13, %v7361_v30, %v7366_v55  ;;  %vm10750_vm1 = vmmov %vm10736_vm2  ;;  %v6425_v30 = vpack.c.bf16 %v3756_v19, %v3755_v53  ;;  %v5956_v55 = vld [vmem:[%s10496_s5 + $0xa8] sm:$0xff]  ;;  %v7411_v38 = vunpack.i.h.bf16 %v9896_v31  ;;  %v7410_v50 = vunpack.i.l.bf16 %v9896_v31 }
 0x42a   :  { %v3752_v45 = vsel %vm10750_vm1, %v7371_v6, %v7376_v35  ;;  %vm10752_vm14 = vmmov %vm10751_vm11  ;;  %v6526_v48 = vpack.c.bf16 %v4914_v52, %v4913_v28  ;;  %v7416_v41 = vunpack.i.h.bf16 %v7414_v27  ;;  %v7415_v58 = vunpack.i.l.bf16 %v7414_v27 }
 0x42b   :  { %v3899_v34 = vsel %vm10752_vm14, %v7395_v43, %v7385_v0  ;;  %vm10753_vm3 = vmmov %vm10750_vm1 }
 0x42c   :  { %v3751_v51 = vsel %vm10753_vm3, %v7370_v62, %v7375_v47  ;;  %vm10754_vm7 = vmmov %vm10748_vm6  ;;  %v6431_v33 = vpack.c.bf16 %v3900_v18, %v3899_v34  ;;  %v9928_v57 = vpop.permute.xlu0 %7418  ;;  %v7429_v60 = vpop.permute.xlu1 %7428 }
 0x42d   :  { %5967 = vmatmul.mubr.msk.f32.vlgmr.msra.gmra.mrb[8].mxu0 %vm10754_vm7, %v5955_v39  ;;  %vm10755_vm8 = vmmov %vm10748_vm6  ;;  %v6428_v23 = vpack.c.bf16 %v3752_v45, %v3751_v51  ;;  %v7420_v32 = vunpack.i.l.bf16 %v9928_v57  ;;  %v7431_v19 = vunpack.i.h.bf16 %v7429_v60  ;;  %v7430_v53 = vunpack.i.l.bf16 %v7429_v60  ;;  %v5972_v51 = vld [vmem:[%s10496_s5 + $0xc8] sm:$0xff] }
 0x42e   :  { %6070 = vmatmul.mubr.msk.f32.gmra.mrb[14].mxu1 %vm10755_vm8, %v5950_v1  ;;  %vm10756_vm10 = vmmov %vm10750_vm1  ;;  %6424 = vmatpush1.bf16.msk.msra.mxu0 %vm10758_vm12, %v6422_v14 }
 0x42f   :  { %v4920_v15 = vsel %vm10756_vm10, %v7391_v42, %v7381_v7  ;;  %vm10757_vm5 = vmmov %vm10750_vm1  ;;  %3706 = vmatprep.mubr.f32.mxu0 %v7572_v25  ;;  %6427 = vmatprep.subr.msk.bf16.mxu0 %vm10740_vm0, %v6425_v30 }
 0x430   :  { %v4919_v4 = vsel %vm10757_vm5, %v7390_v20, %v7380_v37  ;;  %vm10759_vm15 = vmmov %vm10751_vm11  ;;  %4864 = vmatprep.mubr.f32.mxu1 %v7572_v25  ;;  %v9944_v6 = vpop.permute.xlu0 %7423  ;;  %v9961_v1 = vpop.permute.xlu1 %7433 }
 0x431   :  { %v5047_v49 = vsel %vm10759_vm15, %v7406_v54, %v7401_v63  ;;  %vm10760_vm9 = vmmov %vm10751_vm11  ;;  %v6529_v10 = vpack.c.bf16 %v4920_v15, %v4919_v4  ;;  %vm10765_vm11 = vnez %v10568_v13  ;;  %v7426_v35 = vunpack.i.h.bf16 %v9944_v6  ;;  %v5974_v13 = vld [vmem:[%s10496_s5 + $0xd8] sm:$0xff] }
 0x432   :  { %v5046_v16 = vsel %vm10760_vm9, %v7405_v2, %v7400_v11  ;;  %vm10761_vm6 = vmmov %vm10750_vm1  ;;  %6430 = vmatpush1.bf16.msk.msra.mxu0 %vm10758_vm12, %v6428_v23  ;;  %v7425_v47 = vunpack.i.l.bf16 %v9944_v6  ;;  %v7436_v12 = vunpack.i.h.bf16 %v9961_v1  ;;  %v5987_v6 = vld [vmem:[%s10496_s5 + $0xe0] sm:$0xff] }
 0x433   :  { %v4916_v26 = vsel %vm10761_vm6, %v7381_v7, %v7391_v42  ;;  %vm10762_vm13 = vmmov %vm10750_vm1  ;;  %v6535_v40 = vpack.c.bf16 %v5047_v49, %v5046_v16  ;;  %6433 = vmatprep.subr.msk.bf16.mxu0 %vm10765_vm11, %v6431_v33  ;;  %v5973_v49 = vld [vmem:[%s10496_s5 + $0xd0] sm:$0xff] }
 0x434   :  { %v4915_v8 = vsel %vm10762_vm13, %v7380_v37, %v7390_v20  ;;  %vm10763_vm2 = vmmov %vm10754_vm7  ;;  %v9992_v20 = vpop.permute.xlu0 %7438  ;;  %vm10777_vm13 = vcmp.lt.s32.totalorder %v7869_v36, 111  ;;  %v10008_v45 = vpop.permute.xlu1 %7443 }
 0x435   :  { %5968 = vmatmul.mubr.msk.f32.gmra.mrb[10].mxu0 %vm10763_vm2, %v5956_v55  ;;  %vm10764_vm1 = vmmov %vm10763_vm2  ;;  %v6532_v9 = vpack.c.bf16 %v4916_v26, %v4915_v8  ;;  %v7441_v52 = vunpack.i.h.bf16 %v9992_v20  ;;  %v7440_v28 = vunpack.i.l.bf16 %v9992_v20  ;;  %v7446_v34 = vunpack.i.h.bf16 %v10008_v45 }
 0x436   :  { %6079 = vmatmul.mubr.msk.f32.vlgmr.msra.gmra.mrb[8].mxu1 %vm10764_vm1, %v5955_v39  ;;  %3712 = vmatprep.mubr.f32.mxu0 %v7572_v25  ;;  %vm10766_vm14 = vmmov %vm10764_vm1  ;;  %v4046_v39 = vsel %vm10777_vm13, %v7436_v12, %v7426_v35 }
 0x437   :  { %6528 = vmatpush1.bf16.msk.msra.mxu1 %vm10758_vm12, %v6526_v48  ;;  %4870 = vmatprep.mubr.f32.mxu1 %v7572_v25  ;;  %vm10767_vm3 = vmmov %vm10764_vm1 }
 0x438   :  { %6531 = vmatprep.subr.msk.bf16.mxu1 %vm10740_vm0, %v6529_v10  ;;  %vm10768_vm0 = vmmov %vm10760_vm9  ;;  %v7449_v48 = vpop.permute.xlu0 %7448  ;;  %v7454_v23 = vpop.permute.xlu1 %7453 }
 0x439   :  { %5969 = vmatmul.mubr.msk.f32.gmra.mrb[12].mxu0 %vm10766_vm14, %v5957_v24  ;;  %v3896_v62 = vsel %vm10768_vm0, %v7386_v22, %v7396_v56  ;;  %vm10769_vm7 = vmmov %vm10768_vm0  ;;  %v7435_v22 = vunpack.i.l.bf16 %v9961_v1  ;;  %v5971_v56 = vld [vmem:[%s10496_s5 + $0xc0] sm:$0xff]  ;;  %v7451_v26 = vunpack.i.h.bf16 %v7449_v48  ;;  %v7450_v8 = vunpack.i.l.bf16 %v7449_v48 }
 0x43a   :  { %6080 = vmatmul.mubr.msk.f32.gmra.mrb[10].mxu1 %vm10767_vm3, %v5956_v55  ;;  %3718 = vmatprep.mubr.f32.mxu0 %v7572_v25  ;;  %v3895_v21 = vsel %vm10769_vm7, %v7385_v0, %v7395_v43  ;;  %vm10770_vm8 = vmmov %vm10768_vm0  ;;  %v7421_v0 = vunpack.i.h.bf16 %v9928_v57  ;;  %v7456_v10 = vunpack.i.h.bf16 %v7454_v23 }
 0x43b   :  { %6534 = vmatpush1.bf16.msk.msra.mxu1 %vm10758_vm12, %v6532_v9  ;;  %4876 = vmatprep.mubr.f32.mxu1 %v7572_v25  ;;  %v3902_v44 = vsel %vm10770_vm8, %v7416_v41, %v7411_v38  ;;  %vm10771_vm10 = vmmov %vm10768_vm0  ;;  %v6434_v43 = vpack.c.bf16 %v3896_v62, %v3895_v21  ;;  %vm10782_vm8 = vnez %v10577_v46 }
 0x43c   :  { %6537 = vmatprep.subr.msk.bf16.mxu1 %vm10765_vm11, %v6535_v40  ;;  %v3901_v61 = vsel %vm10771_vm10, %v7415_v58, %v7410_v50  ;;  %vm10772_vm5 = vmmov %vm10764_vm1  ;;  %v7459_v40 = vpop.permute.xlu0 %7458  ;;  %v7464_v57 = vpop.permute.xlu1 %7463 }
 0x43d   :  { %5970 = vmatmul.mubr.msk.f32.gmra.mrb[14].mxu0 %vm10772_vm5, %v5958_v29  ;;  %vm10773_vm12 = vmmov %vm10764_vm1  ;;  %v6437_v18 = vpack.c.bf16 %v3902_v44, %v3901_v61 }
 0x43e   :  { %6081 = vmatmul.mubr.msk.f32.gmra.mrb[12].mxu1 %vm10773_vm12, %v5957_v24  ;;  %3846 = vmatprep.mubr.f32.mxu0 %v7572_v25  ;;  %vm10774_vm15 = vmmov %vm10768_vm0  ;;  %v7455_v24 = vunpack.i.l.bf16 %v7454_v23 }
 0x43f   :  { %4882 = vmatprep.mubr.f32.mxu1 %v7572_v25  ;;  %v5043_v7 = vsel %vm10774_vm15, %v7401_v63, %v7406_v54  ;;  %vm10775_vm9 = vmmov %vm10768_vm0  ;;  %v7445_v63 = vunpack.i.l.bf16 %v10008_v45 }
 0x440   :  { %v5042_v37 = vsel %vm10775_vm9, %v7400_v11, %v7405_v2  ;;  %vm10776_vm6 = vmmov %vm10768_vm0  ;;  %v5049_v11 = vsel %vm10768_vm0, %v7431_v19, %v7421_v0 }
 0x441   :  { %v3898_v42 = vsel %vm10776_vm6, %v7411_v38, %v7416_v41  ;;  %vm10778_vm2 = vmmov %vm10777_vm13  ;;  %v6538_v54 = vpack.c.bf16 %v5043_v7, %v5042_v37  ;;  %v7460_v41 = vunpack.i.l.bf16 %v7459_v40  ;;  %v5990_v7 = vld [vmem:[%s10496_s5 + $0xf8] sm:$0xff]  ;;  %v6005_v37 = vld [vmem:[%s10496_s5 + $0x110] sm:$0xff] }
 0x442   :  { %v4045_v14 = vsel %vm10778_vm2, %v7435_v22, %v7425_v47  ;;  %vm10779_vm1 = vmmov %vm10768_vm0  ;;  %6082 = vmatmul.mubr.msk.f32.gmra.mrb[14].mxu1 %vm10767_vm3, %v5958_v29  ;;  %v7465_v29 = vunpack.i.l.bf16 %v7464_v57 }
 0x443   :  { %v3897_v17 = vsel %vm10779_vm1, %v7410_v50, %v7415_v58  ;;  %vm10780_vm14 = vmmov %vm10767_vm3  ;;  %v6443_v30 = vpack.c.bf16 %v4046_v39, %v4045_v14  ;;  %4993 = vmatprep.mubr.f32.mxu1 %v7572_v25  ;;  %v7461_v50 = vunpack.i.h.bf16 %v7459_v40  ;;  %v7466_v58 = vunpack.i.h.bf16 %v7464_v57 }
 0x444   :  { %5983 = vmatmul.mubr.msk.f32.vlgmr.msra.gmra.mrb[8].mxu0 %vm10780_vm14, %v5971_v56  ;;  %vm10781_vm7 = vmmov %vm10768_vm0  ;;  %v6440_v2 = vpack.c.bf16 %v3898_v42, %v3897_v17  ;;  %v6006_v42 = vld [vmem:[%s10496_s5 + $0x118] sm:$0xff] }
 0x445   :  { %v5048_v59 = vsel %vm10781_vm7, %v7430_v53, %v7420_v32  ;;  %6436 = vmatpush1.bf16.msk.msra.mxu0 %vm10782_vm8, %v6434_v43  ;;  %3852 = vmatprep.mubr.f32.mxu0 %v7572_v25  ;;  %vm10783_vm10 = vmmov %vm10778_vm2  ;;  %v5989_v43 = vld [vmem:[%s10496_s5 + $0xf0] sm:$0xff] }
 0x446   :  { %6439 = vmatprep.subr.msk.bf16.mxu0 %vm10765_vm11, %v6437_v18  ;;  %v5176_v15 = vsel %vm10783_vm10, %v7446_v34, %v7441_v52  ;;  %vm10784_vm5 = vmmov %vm10778_vm2  ;;  %v6541_v31 = vpack.c.bf16 %v5049_v11, %v5048_v59 }
 0x447   :  { %v5175_v4 = vsel %vm10784_vm5, %v7445_v63, %v7440_v28  ;;  %vm10785_vm12 = vmmov %vm10768_vm0 }
 0x448   :  { %v5045_v55 = vsel %vm10785_vm12, %v7421_v0, %v7431_v19  ;;  %vm10786_vm15 = vmmov %vm10768_vm0  ;;  %v6547_v16 = vpack.c.bf16 %v5176_v15, %v5175_v4 }
 0x449   :  { %v5044_v33 = vsel %vm10786_vm15, %v7420_v32, %v7430_v53  ;;  %vm10787_vm9 = vmmov %vm10767_vm3  ;;  %6442 = vmatpush1.bf16.msk.msra.mxu0 %vm10782_vm8, %v6440_v2 }
 0x44a   :  { %5984 = vmatmul.mubr.msk.f32.gmra.mrb[10].mxu0 %vm10787_vm9, %v5972_v51  ;;  %vm10788_vm6 = vmmov %vm10767_vm3  ;;  %6445 = vmatprep.subr.msk.bf16.mxu0 %vm8781_vm4, %v6443_v30  ;;  %v6544_v27 = vpack.c.bf16 %v5045_v55, %v5044_v33 }
 0x44b   :  { %6091 = vmatmul.mubr.msk.f32.vlgmr.msra.gmra.mrb[8].mxu1 %vm10788_vm6, %v5971_v56  ;;  %3858 = vmatprep.mubr.f32.mxu0 %v7572_v25  ;;  %vm10789_vm13 = vmmov %vm10767_vm3 }
 0x44c   :  { %6540 = vmatpush1.bf16.msk.msra.mxu1 %vm10782_vm8, %v6538_v54  ;;  %4999 = vmatprep.mubr.f32.mxu1 %v7572_v25  ;;  %vm10790_vm2 = vmmov %vm10767_vm3 }
 0x44d   :  { %6543 = vmatprep.subr.msk.bf16.mxu1 %vm10765_vm11, %v6541_v31  ;;  %vm10791_vm11 = vmmov %vm10784_vm5 }
 0x44e   :  { %5985 = vmatmul.mubr.msk.f32.gmra.mrb[12].mxu0 %vm10789_vm13, %v5973_v49  ;;  %v4042_v9 = vsel %vm10791_vm11, %v7426_v35, %v7436_v12  ;;  %vm10792_vm1 = vmmov %vm10784_vm5 }
 0x44f   :  { %6092 = vmatmul.mubr.msk.f32.gmra.mrb[10].mxu1 %vm10790_vm2, %v5972_v51  ;;  %3864 = vmatprep.mubr.f32.mxu0 %v7572_v25  ;;  %v4041_v46 = vsel %vm10792_vm1, %v7425_v47, %v7435_v22  ;;  %vm10793_vm14 = vmmov %vm10792_vm1  ;;  %v5988_v22 = vld [vmem:[%s10496_s5 + $0xe8] sm:$0xff]  ;;  %v5173_v53 = vsel %vm10792_vm1, %v7460_v41, %v7465_v29 }
 0x450   :  { %6546 = vmatpush1.bf16.msk.msra.mxu1 %vm10782_vm8, %v6544_v27  ;;  %5005 = vmatprep.mubr.f32.mxu1 %v7572_v25  ;;  %v4048_v60 = vsel %vm10793_vm14, %v7456_v10, %v7451_v26  ;;  %vm10794_vm3 = vmmov %vm10792_vm1  ;;  %v6446_v62 = vpack.c.bf16 %v4042_v9, %v4041_v46 }
 0x451   :  { %6549 = vmatprep.subr.msk.bf16.mxu1 %vm8781_vm4, %v6547_v16  ;;  %v4047_v38 = vsel %vm10794_vm3, %v7455_v24, %v7450_v8  ;;  %vm10795_vm0 = vmmov %vm10790_vm2  ;;  %vm10805_vm2 = vnez %v10601_v5  ;;  %v6004_v5 = vld [vmem:[%s10496_s5 + $0x108] sm:$0xff] }
 0x452   :  { %5986 = vmatmul.mubr.msk.f32.gmra.mrb[14].mxu0 %vm10795_vm0, %v5974_v13  ;;  %vm10796_vm7 = vmmov %vm10795_vm0  ;;  %v6449_v44 = vpack.c.bf16 %v4048_v60, %v4047_v38 }
 0x453   :  { %6093 = vmatmul.mubr.msk.f32.gmra.mrb[12].mxu1 %vm10796_vm7, %v5973_v49  ;;  %3992 = vmatprep.mubr.f32.mxu0 %v7572_v25  ;;  %vm10797_vm8 = vmmov %vm10792_vm1 }
 0x454   :  { %5011 = vmatprep.mubr.f32.mxu1 %v7572_v25  ;;  %v5172_v21 = vsel %vm10797_vm8, %v7441_v52, %v7446_v34  ;;  %vm10798_vm10 = vmmov %vm10792_vm1 }
 0x455   :  { %v5171_v35 = vsel %vm10798_vm10, %v7440_v28, %v7445_v63  ;;  %vm10799_vm5 = vmmov %vm10792_vm1 }
 0x456   :  { %v4044_v47 = vsel %vm10799_vm5, %v7451_v26, %v7456_v10  ;;  %vm10800_vm12 = vmmov %vm10792_vm1  ;;  %v6550_v0 = vpack.c.bf16 %v5172_v21, %v5171_v35 }
 0x457   :  { %v4043_v1 = vsel %vm10800_vm12, %v7450_v8, %v7455_v24  ;;  %vm10801_vm15 = vmmov %vm10795_vm0 }
 0x458   :  { %5999 = vmatmul.mubr.msk.f32.vlgmr.msra.gmra.mrb[8].mxu0 %vm10801_vm15, %v5987_v6  ;;  %vm10802_vm9 = vmmov %vm10795_vm0  ;;  %v6452_v32 = vpack.c.bf16 %v4044_v47, %v4043_v1 }
 0x459   :  { %6094 = vmatmul.mubr.msk.f32.gmra.mrb[14].mxu1 %vm10802_vm9, %v5974_v13  ;;  %vm10803_vm6 = vmmov %vm10792_vm1  ;;  %6448 = vmatpush1.bf16.msk.msra.mxu0 %vm10805_vm2, %v6446_v62 }
 0x45a   :  { %v5178_v61 = vsel %vm10803_vm6, %v7466_v58, %v7461_v50  ;;  %vm10804_vm13 = vmmov %vm10792_vm1  ;;  %3998 = vmatprep.mubr.f32.mxu0 %v7572_v25  ;;  %6451 = vmatprep.subr.msk.bf16.mxu0 %vm8781_vm4, %v6449_v44 }
 0x45b   :  { %v5177_v12 = vsel %vm10804_vm13, %v7465_v29, %v7460_v41  ;;  %5122 = vmatprep.mubr.f32.mxu1 %v7572_v25  ;;  %vm10806_vm11 = vmmov %vm10792_vm1 }
 0x45c   :  { %v5174_v19 = vsel %vm10806_vm11, %v7461_v50, %v7466_v58  ;;  %v6553_v56 = vpack.c.bf16 %v5178_v61, %v5177_v12  ;;  %vm10807_vm14 = vmmov %vm10795_vm0 }
 0x45d   :  { %6000 = vmatmul.mubr.msk.f32.gmra.mrb[10].mxu0 %vm10807_vm14, %v5988_v22  ;;  %vm10808_vm3 = vmmov %vm10795_vm0  ;;  %v6556_v36 = vpack.c.bf16 %v5174_v19, %v5173_v53 }
 0x45e   :  { %6103 = vmatmul.mubr.msk.f32.vlgmr.msra.gmra.mrb[8].mxu1 %vm10808_vm3, %v5987_v6  ;;  %6454 = vmatpush1.bf16.msk.msra.mxu0 %vm10805_vm2, %v6452_v32  ;;  %vm10809_vm7 = vmmov %vm10795_vm0 }
 0x45f   :  { %6552 = vmatpush1.bf16.msk.msra.mxu1 %vm10805_vm2, %v6550_v0  ;;  %4004 = vmatprep.mubr.f32.mxu0 %v7572_v25  ;;  %vm10811_vm8 = vmmov %vm10795_vm0 }
 0x460   :  { %6555 = vmatprep.subr.msk.bf16.mxu1 %vm8781_vm4, %v6553_v56  ;;  %5128 = vmatprep.mubr.f32.mxu1 %v7572_v25  ;;  %vm10810_vm4 = vmmov %vm10795_vm0 }
 0x461   :  { %6001 = vmatmul.mubr.msk.f32.gmra.mrb[12].mxu0 %vm10795_vm0, %v5989_v43  ;;  %vm10812_vm10 = vmmov %vm10795_vm0 }
 0x462   :  { %6104 = vmatmul.mubr.msk.f32.gmra.mrb[10].mxu1 %vm10809_vm7, %v5988_v22  ;;  %4010 = vmatprep.mubr.f32.mxu0 %v7572_v25  ;;  %vm10813_vm5 = vmmov %vm10795_vm0 }
 0x463   :  { %6558 = vmatpush1.bf16.msk.msra.mxu1 %vm10805_vm2, %v6556_v36  ;;  %5134 = vmatprep.mubr.f32.mxu1 %v7572_v25  ;;  %vm10814_vm12 = vmmov %vm10795_vm0 }
 0x464   :  { %vm10815_vm15 = vmmov %vm10795_vm0 }
 0x465   :  { %6002 = vmatmul.mubr.msk.f32.gmra.mrb[14].mxu0 %vm10810_vm4, %v5990_v7  ;;  %vm10816_vm9 = vmmov %vm10795_vm0 }
 0x466   :  { %6105 = vmatmul.mubr.msk.f32.gmra.mrb[12].mxu1 %vm10811_vm8, %v5989_v43  ;;  %4138 = vmatprep.mubr.f32.mxu0 %v7572_v25  ;;  %vm10817_vm6 = vmmov %vm10795_vm0 }
 0x467   :  { %5140 = vmatprep.mubr.f32.mxu1 %v7572_v25  ;;  %vm10818_vm13 = vmmov %vm10795_vm0 }
 0x468   :  { %vm10819_vm2 = vmmov %vm10795_vm0 }
 0x469   :  { %6015 = vmatmul.mubr.msk.f32.vlgmr.msra.gmra.mrb[8].mxu0 %vm10812_vm10, %v6003_v3  ;;  %vm10820_vm11 = vmmov %vm10795_vm0 }
 0x46a   :  { %6106 = vmatmul.mubr.msk.f32.gmra.mrb[14].mxu1 %vm10813_vm5, %v5990_v7  ;;  %4144 = vmatprep.mubr.f32.mxu0 %v7572_v25 }
 0x46b   :  { %5251 = vmatprep.mubr.f32.mxu1 %v7572_v25 }
 0x46d   :  { %6016 = vmatmul.mubr.msk.f32.gmra.mrb[10].mxu0 %vm10814_vm12, %v6004_v5 }
 0x46e   :  { %6115 = vmatmul.mubr.msk.f32.vlgmr.msra.gmra.mrb[8].mxu1 %vm10815_vm15, %v6003_v3  ;;  %4150 = vmatprep.mubr.f32.mxu0 %v7572_v25 }
 0x46f   :  { %5257 = vmatprep.mubr.f32.mxu1 %v7572_v25 }
 0x471   :  { %6017 = vmatmul.mubr.msk.f32.gmra.mrb[12].mxu0 %vm10816_vm9, %v6005_v37 }
 0x472   :  { %6116 = vmatmul.mubr.msk.f32.gmra.mrb[10].mxu1 %vm10817_vm6, %v6004_v5  ;;  %4156 = vmatprep.mubr.f32.mxu0 %v7572_v25 }
 0x473   :  { %5263 = vmatprep.mubr.f32.mxu1 %v7572_v25 }
 0x475   :  { %6018 = vmatmul.mubr.msk.f32.gmra.mrb[14].mxu0 %vm10818_vm13, %v6006_v42 }
 0x476   :  { %6117 = vmatmul.mubr.msk.f32.gmra.mrb[12].mxu1 %vm10819_vm2, %v6005_v37 }
 0x477   :  { %5269 = vmatprep.mubr.f32.mxu1 %v7572_v25 }
 0x47a   :  { %6118 = vmatmul.mubr.msk.f32.gmra.mrb[14].mxu1 %vm10820_vm11, %v6006_v42 }
 0x53c   :  { %v10175_v20 = vpop.f32.mrb[8].mxu0 }
 0x53d   :  { %v5316_v39 = vmul.f32 %v10175_v20, %v10175_v20  ;;  %v10179_v14 = vpop.f32.mrb[9].mxu0 }
 0x53e   :  { %v5284_v52 = vadd.f32 %v10179_v14, %v10175_v20  ;;  %v5317_v28 = vmul.f32 %v10179_v14, %v10179_v14 }
 0x540   :  { %5285 = vadd.xlane.f32.xlu0 %v5284_v52  ;;  %v10187_v17 = vpop.f32.mrb[10].mxu0  ;;  %v5324_v25 = vadd.f32 %v5317_v28, %v5316_v39 }
 0x541   :  { %v10185_v45 = vpop.f32.mrb[8].mxu1  ;;  %v5318_v34 = vmul.f32 %v10187_v17, %v10187_v17  ;;  %v10193_v63 = vpop.f32.mrb[11].mxu0 }
 0x542   :  { %v5340_v18 = vmul.f32 %v10185_v45, %v10185_v45  ;;  %v10195_v11 = vpop.f32.mrb[9].mxu1  ;;  %v5287_v59 = vadd.f32 %v10193_v63, %v10187_v17  ;;  %v5319_v51 = vmul.f32 %v10193_v63, %v10193_v63 }
 0x543   :  { %v5300_v30 = vadd.f32 %v10195_v11, %v10185_v45  ;;  %v5341_v54 = vmul.f32 %v10195_v11, %v10195_v11 }
 0x544   :  { %v10205_v2 = vpop.f32.mrb[12].mxu0  ;;  %v5327_v55 = vadd.f32 %v5319_v51, %v5318_v34 }
 0x545   :  { %5301 = vadd.xlane.f32.xlu1 %v5300_v30  ;;  %v10207_v15 = vpop.f32.mrb[10].mxu1  ;;  %v5348_v4 = vadd.f32 %v5341_v54, %v5340_v18  ;;  %v5320_v33 = vmul.f32 %v10205_v2, %v10205_v2  ;;  %v10213_v48 = vpop.f32.mrb[13].mxu0 }
 0x546   :  { %v5342_v31 = vmul.f32 %v10207_v15, %v10207_v15  ;;  %v10215_v23 = vpop.f32.mrb[11].mxu1  ;;  %v5290_v49 = vadd.f32 %v10213_v48, %v10205_v2  ;;  %v5321_v16 = vmul.f32 %v10213_v48, %v10213_v48 }
 0x547   :  { %v5303_v27 = vadd.f32 %v10215_v23, %v10207_v15  ;;  %v5343_v26 = vmul.f32 %v10215_v23, %v10215_v23 }
 0x548   :  { %v10227_v10 = vpop.f32.mrb[14].mxu0  ;;  %v5330_v13 = vadd.f32 %v5321_v16, %v5320_v33  ;;  %v5380_v16 = vld [vmem:[%s10497_s6] sm:$0xff] }
 0x549   :  { %v10225_v8 = vpop.f32.mrb[12].mxu1  ;;  %5325 = vadd.xlane.f32.xlu1 %v5324_v25  ;;  %5304 = vadd.xlane.f32.xlu0 %v5303_v27  ;;  %v5351_v24 = vadd.f32 %v5343_v26, %v5342_v31  ;;  %v5322_v57 = vmul.f32 %v10227_v10, %v10227_v10  ;;  %v10233_v9 = vpop.f32.mrb[15].mxu0 }
 0x54a   :  { %v5344_v40 = vmul.f32 %v10225_v8, %v10225_v8  ;;  %v10235_v46 = vpop.f32.mrb[13].mxu1  ;;  %v5293_v60 = vadd.f32 %v10233_v9, %v10227_v10  ;;  %v5323_v38 = vmul.f32 %v10233_v9, %v10233_v9 }
 0x54b   :  { %v5306_v50 = vadd.f32 %v10235_v46, %v10225_v8  ;;  %v5345_v41 = vmul.f32 %v10235_v46, %v10235_v46 }
 0x54c   :  { %v5333_v58 = vadd.f32 %v5323_v38, %v5322_v57  ;;  %v5381_v38 = vld [vmem:[%s10497_s6 + $0x8] sm:$0xff] }
 0x54d   :  { %v10245_v29 = vpop.f32.mrb[14].mxu1  ;;  %5349 = vadd.xlane.f32.xlu1 %v5348_v4  ;;  %5328 = vadd.xlane.f32.xlu0 %v5327_v55  ;;  %v5354_v6 = vadd.f32 %v5345_v41, %v5344_v40 }
 0x54e   :  { %v5346_v62 = vmul.f32 %v10245_v29, %v10245_v29  ;;  %v10249_v21 = vpop.f32.mrb[15].mxu1 }
 0x54f   :  { %v5309_v35 = vadd.f32 %v10249_v21, %v10245_v29  ;;  %v5347_v47 = vmul.f32 %v10249_v21, %v10249_v21 }
 0x551   :  { %v5357_v1 = vadd.f32 %v5347_v47, %v5346_v62  ;;  %5352 = vadd.xlane.f32.xlu0 %v5351_v24  ;;  %5288 = vadd.xlane.f32.xlu1 %v5287_v59 }
 0x555   :  { %5307 = vadd.xlane.f32.xlu1 %v5306_v50  ;;  %5291 = vadd.xlane.f32.xlu0 %v5290_v49 }
 0x559   :  { %5331 = vadd.xlane.f32.xlu1 %v5330_v13  ;;  %5294 = vadd.xlane.f32.xlu0 %v5293_v60 }
 0x55d   :  { %5355 = vadd.xlane.f32.xlu1 %v5354_v6  ;;  %5310 = vadd.xlane.f32.xlu0 %v5309_v35 }
 0x561   :  { %5334 = vadd.xlane.f32.xlu0 %v5333_v58 }
 0x565   :  { %5358 = vadd.xlane.f32.xlu0 %v5357_v1 }
 0x5cd   :  { %v5286_v44 = vpop.xlane.xlu0 %5285 }
 0x5d2   :  { %v5302_v61 = vpop.xlane.xlu1 %5301 }
 0x5d3   :  { %v5312_v12 = vadd.f32 %v5302_v61, %v5286_v44  ;;  %v5396_v61 = vld [vmem:[%s10498_s7] sm:$0xff] }
 0x5d5   :  { %v5364_v32 = vmul.f32 0.001953125, %v5312_v12 }
 0x5d6   :  { %v5326_v22 = vpop.xlane.xlu1 %5325  ;;  %v5305_v0 = vpop.xlane.xlu0 %5304 }
 0x5d7   :  { %v5372_v43 = vmul.f32 %v5364_v32, %v5364_v32 }
 0x5da   :  { %v5350_v19 = vpop.xlane.xlu1 %5349  ;;  %v5329_v53 = vpop.xlane.xlu0 %5328 }
 0x5db   :  { %v5360_v56 = vadd.f32 %v5350_v19, %v5326_v22  ;;  %v5382_v19 = vld [vmem:[%s10497_s6 + $0x10] sm:$0xff] }
 0x5dd   :  { %v5368_v36 = vmul.f32 0.001953125, %v5360_v56 }
 0x5de   :  { %v5353_v7 = vpop.xlane.xlu0 %5352  ;;  %v5289_v3 = vpop.xlane.xlu1 %5288 }
 0x5df   :  { %v5376_v5 = vsub.f32 %v5368_v36, %v5372_v43  ;;  %v5361_v37 = vadd.f32 %v5353_v7, %v5329_v53  ;;  %v5313_v42 = vadd.f32 %v5305_v0, %v5289_v3  ;;  %v5398_v36 = vld [vmem:[%s10498_s7 + $0x10] sm:$0xff] }
 0x5e1   :  { %v5384_v39 = vadd.f32 1e-05, %v5376_v5  ;;  %v5365_v52 = vmul.f32 0.001953125, %v5313_v42  ;;  %v5369_v18 = vmul.f32 0.001953125, %v5361_v37  ;;  %v5383_v37 = vld [vmem:[%s10497_s6 + $0x18] sm:$0xff] }
 0x5e2   :  { %v5308_v28 = vpop.xlane.xlu1 %5307  ;;  %v5292_v25 = vpop.xlane.xlu0 %5291 }
 0x5e3   :  { %7507 = vrsqrt.f32 %v5384_v39  ;;  %v5373_v34 = vmul.f32 %v5365_v52, %v5365_v52  ;;  %v5314_v51 = vadd.f32 %v5308_v28, %v5292_v25 }
 0x5e5   :  { %v5377_v59 = vsub.f32 %v5369_v18, %v5373_v34  ;;  %v5366_v55 = vmul.f32 0.001953125, %v5314_v51 }
 0x5e6   :  { %v5332_v30 = vpop.xlane.xlu1 %5331  ;;  %v5295_v54 = vpop.xlane.xlu0 %5294 }
 0x5e7   :  { %v5385_v4 = vadd.f32 1e-05, %v5377_v59  ;;  %v5374_v26 = vmul.f32 %v5366_v55, %v5366_v55 }
 0x5e9   :  { %7509 = vrsqrt.f32 %v5385_v4 }
 0x5ea   :  { %v5356_v33 = vpop.xlane.xlu1 %5355  ;;  %v5311_v31 = vpop.xlane.xlu0 %5310 }
 0x5eb   :  { %v5362_v49 = vadd.f32 %v5356_v33, %v5332_v30  ;;  %v5315_v13 = vadd.f32 %v5311_v31, %v5295_v54 }
 0x5ed   :  { %v7508_v27 = vpop.eup %7507  ;;  %v5370_v24 = vmul.f32 0.001953125, %v5362_v49  ;;  %v5367_v41 = vmul.f32 0.001953125, %v5315_v13 }
 0x5ee   :  { %v5335_v40 = vpop.xlane.xlu0 %5334  ;;  %v5392_v57 = vmul.f32 %v7508_v27, %v5380_v16  ;;  %v7553_v16 = vld [vmem:[%s10491_s1] sm:$0xff] }
 0x5ef   :  { %v5378_v60 = vsub.f32 %v5370_v24, %v5374_v26  ;;  %v5375_v1 = vmul.f32 %v5367_v41, %v5367_v41  ;;  %v7556_v26 = vld [vmem:[%s10491_s1 + $0x48] sm:$0xff] }
 0x5f0   :  { %5410 = vperm.xlu1 %7145, %v5392_v57   ;;  %v5400_v47 = vmul.f32 %v5392_v57, %v5364_v32  ;;  %v5397_v32 = vld [vmem:[%s10498_s7 + $0x8] sm:$0xff] }
 0x5f1   :  { %v5386_v50 = vadd.f32 1e-05, %v5378_v60 }
 0x5f2   :  { %v5359_v58 = vpop.xlane.xlu0 %5358  ;;  %v5404_v22 = vsub.f32 %v5396_v61, %v5400_v47 }
 0x5f3   :  { %v7510_v6 = vpop.eup %7509  ;;  %7511 = vrsqrt.f32 %v5386_v50  ;;  %v5363_v62 = vadd.f32 %v5359_v58, %v5335_v40 }
 0x5f4   :  { %v5393_v35 = vmul.f32 %v7510_v6, %v5381_v38 }
 0x5f5   :  { %v5371_v44 = vmul.f32 0.001953125, %v5363_v62 }
 0x5f6   :  { %5415 = vperm.xlu0 %7146, %v5393_v35   ;;  %v5401_v56 = vmul.f32 %v5393_v35, %v5365_v52  ;;  %v5399_v52 = vld [vmem:[%s10498_s7 + $0x18] sm:$0xff] }
 0x5f7   :  { %v5379_v12 = vsub.f32 %v5371_v44, %v5375_v1 }
 0x5f8   :  { %v5405_v3 = vsub.f32 %v5397_v32, %v5401_v56 }
 0x5f9   :  { %v5387_v0 = vadd.f32 1e-05, %v5379_v12 }
 0x5fa   :  { %5438 = vperm.xlu0 %7146, %v5404_v22  }
 0x5fb   :  { %7513 = vrsqrt.f32 %v5387_v0 }
 0x5fd   :  { %v7512_v53 = vpop.eup %7511 }
 0x5fe   :  { %v5394_v43 = vmul.f32 %v7512_v53, %v5382_v19 }
 0x600   :  { %5420 = vperm.xlu1 %7145, %v5394_v43   ;;  %v5402_v7 = vmul.f32 %v5394_v43, %v5366_v55  ;;  %v7560_v43 = vld [vmem:[%s10491_s1 + $0x58] sm:$0xff] }
 0x602   :  { %v5406_v5 = vsub.f32 %v5398_v36, %v5402_v7  ;;  %v7561_v36 = vld [vmem:[%s10491_s1 + $0x20] sm:$0xff] }
 0x604   :  { %5443 = vperm.xlu1 %7145, %v5405_v3   ;;  %5448 = vperm.xlu0 %7146, %v5406_v5   ;;  %v7562_v3 = vld [vmem:[%s10491_s1 + $0x28] sm:$0xff] }
 0x605   :  { %v7514_v42 = vpop.eup %7513 }
 0x606   :  { %v5395_v39 = vmul.f32 %v7514_v42, %v5383_v37 }
 0x608   :  { %5425 = vperm.xlu1 %7145, %v5395_v39   ;;  %v5403_v28 = vmul.f32 %v5395_v39, %v5367_v41  ;;  %v7563_v39 = vld [vmem:[%s10491_s1 + $0x60] sm:$0xff] }
 0x60a   :  { %v5407_v25 = vsub.f32 %v5399_v52, %v5403_v28 }
 0x60c   :  { %5453 = vperm.xlu1 %7145, %v5407_v25  }
 0x66f   :  { %v5411_v18 = vpop.permute.xlu1 %5410 }
 0x670   :  { %v5428_v59 = vmul.f32 %v5411_v18, %v10175_v20  ;;  %v5429_v51 = vmul.f32 %v5411_v18, %v10179_v14  ;;  %v5536_v30 = vmul.f32 %v5411_v18, %v10185_v45  ;;  %v5537_v54 = vmul.f32 %v5411_v18, %v10195_v11  ;;  %v7554_v20 = vld [vmem:[%s10491_s1 + $0x8] sm:$0xff]  ;;  %v7555_v45 = vld [vmem:[%s10491_s1 + $0x40] sm:$0xff] }
 0x671   :  { %v7564_v18 = vld [vmem:[%s10491_s1 + $0x68] sm:$0xff] }
 0x675   :  { %v5416_v34 = vpop.permute.xlu0 %5415 }
 0x676   :  { %v5430_v50 = vmul.f32 %v5416_v34, %v10187_v17  ;;  %v5431_v41 = vmul.f32 %v5416_v34, %v10193_v63  ;;  %v5538_v58 = vmul.f32 %v5416_v34, %v10207_v15  ;;  %v5539_v6 = vmul.f32 %v5416_v34, %v10215_v23 }
 0x679   :  { %v5439_v4 = vpop.permute.xlu0 %5438 }
 0x67a   :  { %v5456_v55 = vadd.f32 %v5439_v4, %v5428_v59  ;;  %v5457_v33 = vadd.f32 %v5439_v4, %v5429_v51  ;;  %v5544_v31 = vadd.f32 %v5536_v30, %v5439_v4  ;;  %v5545_v49 = vadd.f32 %v5537_v54, %v5439_v4 }
 0x67c   :  { %v10286_v27 = vadd.f32 %v7553_v16, %v5456_v55  ;;  %v10291_v14 = vadd.f32 %v7554_v20, %v5457_v33  ;;  %v10296_v11 = vadd.f32 %v7555_v45, %v5544_v31  ;;  %v10301_v24 = vadd.f32 %v7556_v26, %v5545_v49 }
 0x67e   :  { %v5480_v13 = vmul.f32 1.442695, %v10286_v27  ;;  %v5482_v40 = vmul.f32 1.442695, %v10291_v14  ;;  %v5568_v57 = vmul.f32 1.442695, %v10296_v11 }
 0x67f   :  { %v5570_v60 = vmul.f32 1.442695, %v10301_v24  ;;  %v5421_v38 = vpop.permute.xlu1 %5420  ;;  %vm5472_vm1 = vcmp.gt.f32.partialorder %v10286_v27, 0.0  ;;  %vm5473_vm14 = vcmp.gt.f32.partialorder %v10291_v14, 0.0  ;;  %vm5560_vm3 = vcmp.gt.f32.partialorder %v10296_v11, 0.0 }
 0x680   :  { %7515 = vpow2.f32 %v5480_v13  ;;  %v5432_v62 = vmul.f32 %v5421_v38, %v10205_v2  ;;  %v5433_v47 = vmul.f32 %v5421_v38, %v10213_v48  ;;  %v5540_v1 = vmul.f32 %v5421_v38, %v10225_v8  ;;  %v7557_v2 = vld [vmem:[%s10491_s1 + $0x10] sm:$0xff]  ;;  %v7558_v48 = vld [vmem:[%s10491_s1 + $0x18] sm:$0xff] }
 0x681   :  { %7517 = vpow2.f32 %v5482_v40  ;;  %v5541_v44 = vmul.f32 %v5421_v38, %v10235_v46  ;;  %v7559_v46 = vld [vmem:[%s10491_s1 + $0x50] sm:$0xff]  ;;  %vm5561_vm0 = vcmp.gt.f32.partialorder %v10301_v24, 0.0 }
 0x682   :  { %7519 = vpow2.f32 %v5568_v57 }
 0x683   :  { %7521 = vpow2.f32 %v5570_v60  ;;  %v5444_v35 = vpop.permute.xlu1 %5443  ;;  %v5449_v61 = vpop.permute.xlu0 %5448 }
 0x684   :  { %v5458_v17 = vadd.f32 %v5444_v35, %v5430_v50  ;;  %v5459_v12 = vadd.f32 %v5444_v35, %v5431_v41  ;;  %v5546_v63 = vadd.f32 %v5538_v58, %v5444_v35  ;;  %v5547_v22 = vadd.f32 %v5539_v6, %v5444_v35 }
 0x685   :  { %v5460_v0 = vadd.f32 %v5449_v61, %v5432_v62  ;;  %v5461_v15 = vadd.f32 %v5449_v61, %v5433_v47  ;;  %v5548_v19 = vadd.f32 %v5540_v1, %v5449_v61  ;;  %v5549_v23 = vadd.f32 %v5541_v44, %v5449_v61 }
 0x686   :  { %v10318_v53 = vadd.f32 %v7557_v2, %v5458_v17  ;;  %v10323_v8 = vadd.f32 %v7558_v48, %v5459_v12  ;;  %v10328_v56 = vadd.f32 %v7559_v46, %v5546_v63  ;;  %v10333_v32 = vadd.f32 %v7560_v43, %v5547_v22  ;;  %v7566_v22 = vld [vmem:[%s10491_s1 + $0x38] sm:$0xff] }
 0x687   :  { %v10338_v7 = vadd.f32 %v7561_v36, %v5460_v0  ;;  %v10343_v5 = vadd.f32 %v7562_v3, %v5461_v15  ;;  %v10350_v52 = vadd.f32 %v7563_v39, %v5548_v19  ;;  %v10357_v34 = vadd.f32 %v7564_v18, %v5549_v23  ;;  %v5426_v59 = vpop.permute.xlu1 %5425  ;;  %v7567_v36 = vld [vmem:[%s10491_s1 + $0x70] sm:$0xff] }
 0x688   :  { %v5484_v37 = vmul.f32 1.442695, %v10318_v53  ;;  %v5486_v42 = vmul.f32 1.442695, %v10323_v8  ;;  %v5572_v28 = vmul.f32 1.442695, %v10328_v56  ;;  %v5434_v57 = vmul.f32 %v5426_v59, %v10227_v10 }
 0x689   :  { %v5574_v25 = vmul.f32 1.442695, %v10333_v32  ;;  %v5488_v30 = vmul.f32 1.442695, %v10338_v7  ;;  %v5490_v55 = vmul.f32 1.442695, %v10343_v5  ;;  %v5435_v50 = vmul.f32 %v5426_v59, %v10233_v9 }
 0x68a   :  { %v7516_v51 = vpop.eup %7515  ;;  %7523 = vpow2.f32 %v5484_v37  ;;  %v5576_v49 = vmul.f32 1.442695, %v10350_v52  ;;  %v5578_v26 = vmul.f32 1.442695, %v10357_v34  ;;  %v5543_v47 = vmul.f32 %v5426_v59, %v10249_v21  ;;  %v7565_v21 = vld [vmem:[%s10491_s1 + $0x30] sm:$0xff] }
 0x68b   :  { %v7518_v54 = vpop.eup %7517  ;;  %v6119_v4 = vadd.f32 -1.0, %v7516_v51  ;;  %7525 = vpow2.f32 %v5486_v42  ;;  %v5454_v41 = vpop.permute.xlu1 %5453  ;;  %vm5474_vm7 = vcmp.gt.f32.partialorder %v10318_v53, 0.0  ;;  %vm5475_vm4 = vcmp.gt.f32.partialorder %v10323_v8, 0.0 }
 0x68c   :  { %v7520_v33 = vpop.eup %7519  ;;  %v6120_v31 = vadd.f32 -1.0, %v7518_v54  ;;  %7527 = vpow2.f32 %v5572_v28  ;;  %v5462_v1 = vadd.f32 %v5454_v41, %v5434_v57  ;;  %v5463_v44 = vadd.f32 %v5454_v41, %v5435_v50  ;;  %v7568_v28 = vld [vmem:[%s10491_s1 + $0x78] sm:$0xff] }
 0x68d   :  { %v7522_v16 = vpop.eup %7521  ;;  %v5504_v20 = vmul.f32 1.6732632, %v6119_v4  ;;  %v6127_v45 = vadd.f32 -1.0, %v7520_v33  ;;  %7529 = vpow2.f32 %v5574_v25  ;;  %v5551_v17 = vadd.f32 %v5543_v47, %v5454_v41 }
 0x68e   :  { %v5505_v13 = vmul.f32 1.6732632, %v6120_v31  ;;  %v6128_v40 = vadd.f32 -1.0, %v7522_v16  ;;  %7531 = vpow2.f32 %v5488_v30  ;;  %vm5562_vm8 = vcmp.gt.f32.partialorder %v10328_v56, 0.0 }
 0x68f   :  { %v5512_v60 = vsel %vm5472_vm1, %v10286_v27, %v5504_v20  ;;  %v5592_v38 = vmul.f32 1.6732632, %v6127_v45  ;;  %7533 = vpow2.f32 %v5490_v55  ;;  %v5542_v27 = vmul.f32 %v5426_v59, %v10245_v29 }
 0x690   :  { %v5513_v58 = vsel %vm5473_vm14, %v10291_v14, %v5505_v13  ;;  %v5520_v6 = vmul.f32 1.050701, %v5512_v60  ;;  %v5593_v62 = vmul.f32 1.6732632, %v6128_v40  ;;  %7535 = vpow2.f32 %v5576_v49 }
 0x691   :  { %v5521_v35 = vmul.f32 1.050701, %v5513_v58  ;;  %v5600_v10 = vsel %vm5560_vm3, %v10296_v11, %v5592_v38  ;;  %7537 = vpow2.f32 %v5578_v26  ;;  %v5550_v61 = vadd.f32 %v5542_v27, %v5454_v41 }
 0x692   :  { %5528 = vst [vmem:[%s10499_s8] sm:$0xff] %v5520_v6  ;;  %v5601_v9 = vsel %vm5561_vm0, %v10301_v24, %v5593_v62  ;;  %v5608_v14 = vmul.f32 1.050701, %v5600_v10  ;;  %v10397_v24 = vadd.f32 %v7565_v21, %v5462_v1  ;;  %vm5563_vm10 = vcmp.gt.f32.partialorder %v10333_v32, 0.0 }
 0x693   :  { %5529 = vst [vmem:[%s10499_s8 + $0x8] sm:$0xff] %v5521_v35  ;;  %v5609_v11 = vmul.f32 1.050701, %v5601_v9  ;;  %v10407_v0 = vadd.f32 %v7566_v22, %v5463_v44  ;;  %vm5476_vm5 = vcmp.gt.f32.partialorder %v10338_v7, 0.0  ;;  %vm5477_vm12 = vcmp.gt.f32.partialorder %v10343_v5, 0.0 }
 0x694   :  { %v7524_v29 = vpop.eup %7523  ;;  %6135 = vst [vmem:[%s10499_s8 + $0x40] sm:$0xff] %v5608_v14  ;;  %v5492_v23 = vmul.f32 1.442695, %v10397_v24  ;;  %v10416_v3 = vadd.f32 %v7567_v36, %v5550_v61  ;;  %v10421_v25 = vadd.f32 %v7568_v28, %v5551_v17  ;;  %vm5564_vm15 = vcmp.gt.f32.partialorder %v10350_v52, 0.0 }
 0x695   :  { %v7526_v12 = vpop.eup %7525  ;;  %6136 = vst [vmem:[%s10499_s8 + $0x48] sm:$0xff] %v5609_v11  ;;  %v6121_v63 = vadd.f32 -1.0, %v7524_v29  ;;  %v5494_v43 = vmul.f32 1.442695, %v10407_v0  ;;  %vm5565_vm9 = vcmp.gt.f32.partialorder %v10357_v34, 0.0  ;;  %vm5478_vm6 = vcmp.gt.f32.partialorder %v10397_v24, 0.0 }
 0x696   :  { %v7528_v15 = vpop.eup %7527  ;;  %v6122_v19 = vadd.f32 -1.0, %v7526_v12  ;;  %7539 = vpow2.f32 %v5492_v23  ;;  %v5580_v41 = vmul.f32 1.442695, %v10416_v3  ;;  %v5582_v6 = vmul.f32 1.442695, %v10421_v25 }
 0x697   :  { %v7530_v2 = vpop.eup %7529  ;;  %v5506_v48 = vmul.f32 1.6732632, %v6121_v63  ;;  %v6129_v46 = vadd.f32 -1.0, %v7528_v15  ;;  %7541 = vpow2.f32 %v5494_v43  ;;  %vm5479_vm13 = vcmp.gt.f32.partialorder %v10407_v0, 0.0 }
 0x698   :  { %v7532_v37 = vpop.eup %7531  ;;  %v5507_v42 = vmul.f32 1.6732632, %v6122_v19  ;;  %v6130_v39 = vadd.f32 -1.0, %v7530_v2  ;;  %7543 = vpow2.f32 %v5580_v41  ;;  %vm5566_vm2 = vcmp.gt.f32.partialorder %v10416_v3, 0.0 }
 0x699   :  { %v7534_v18 = vpop.eup %7533  ;;  %v5514_v59 = vsel %vm5474_vm7, %v10318_v53, %v5506_v48  ;;  %v5594_v51 = vmul.f32 1.6732632, %v6129_v46  ;;  %v6123_v30 = vadd.f32 -1.0, %v7532_v37  ;;  %7545 = vpow2.f32 %v5582_v6 }
 0x69a   :  { %v7536_v54 = vpop.eup %7535  ;;  %v5515_v4 = vsel %vm5475_vm4, %v10323_v8, %v5507_v42  ;;  %v5522_v55 = vmul.f32 1.050701, %v5514_v59  ;;  %v5595_v33 = vmul.f32 1.6732632, %v6130_v39  ;;  %v6124_v31 = vadd.f32 -1.0, %v7534_v18 }
 0x69b   :  { %v7538_v49 = vpop.eup %7537  ;;  %v5523_v16 = vmul.f32 1.050701, %v5515_v4  ;;  %v5602_v20 = vsel %vm5562_vm8, %v10328_v56, %v5594_v51  ;;  %v5508_v45 = vmul.f32 1.6732632, %v6123_v30  ;;  %v6131_v26 = vadd.f32 -1.0, %v7536_v54 }
 0x69c   :  { %5530 = vst [vmem:[%s10499_s8 + $0x10] sm:$0xff] %v5522_v55  ;;  %v5603_v53 = vsel %vm5563_vm10, %v10333_v32, %v5595_v33  ;;  %v5610_v8 = vmul.f32 1.050701, %v5602_v20  ;;  %v5509_v13 = vmul.f32 1.6732632, %v6124_v31  ;;  %v6132_v40 = vadd.f32 -1.0, %v7538_v49 }
 0x69d   :  { %5531 = vst [vmem:[%s10499_s8 + $0x18] sm:$0xff] %v5523_v16  ;;  %v5611_v57 = vmul.f32 1.050701, %v5603_v53  ;;  %v5516_v56 = vsel %vm5476_vm5, %v10338_v7, %v5508_v45  ;;  %v5596_v60 = vmul.f32 1.6732632, %v6131_v26  ;;  %vm5567_vm11 = vcmp.gt.f32.partialorder %v10421_v25, 0.0 }
 0x69e   :  { %6137 = vst [vmem:[%s10499_s8 + $0x50] sm:$0xff] %v5610_v8  ;;  %v5517_v32 = vsel %vm5477_vm12, %v10343_v5, %v5509_v13  ;;  %v5524_v38 = vmul.f32 1.050701, %v5516_v56  ;;  %v5597_v50 = vmul.f32 1.6732632, %v6132_v40 }
 0x69f   :  { %6138 = vst [vmem:[%s10499_s8 + $0x58] sm:$0xff] %v5611_v57  ;;  %v5525_v7 = vmul.f32 1.050701, %v5517_v32  ;;  %v5604_v58 = vsel %vm5564_vm15, %v10350_v52, %v5596_v60 }
 0x6a0   :  { %5532 = vst [vmem:[%s10499_s8 + $0x20] sm:$0xff] %v5524_v38  ;;  %v5605_v5 = vsel %vm5565_vm9, %v10357_v34, %v5597_v50  ;;  %v5612_v62 = vmul.f32 1.050701, %v5604_v58  ;;  %v7540_v10 = vpop.eup %7539 }
 0x6a1   :  { %5533 = vst [vmem:[%s10499_s8 + $0x28] sm:$0xff] %v5525_v7  ;;  %v5613_v35 = vmul.f32 1.050701, %v5605_v5  ;;  %v7542_v52 = vpop.eup %7541  ;;  %v6125_v27 = vadd.f32 -1.0, %v7540_v10 }
 0x6a2   :  { %6139 = vst [vmem:[%s10499_s8 + $0x60] sm:$0xff] %v5612_v62  ;;  %v6126_v34 = vadd.f32 -1.0, %v7542_v52  ;;  %v7544_v61 = vpop.eup %7543 }
 0x6a3   :  { %6140 = vst [vmem:[%s10499_s8 + $0x68] sm:$0xff] %v5613_v35  ;;  %v5510_v9 = vmul.f32 1.6732632, %v6125_v27  ;;  %v7546_v29 = vpop.eup %7545  ;;  %v6133_v21 = vadd.f32 -1.0, %v7544_v61 }
 0x6a4   :  { %v5511_v14 = vmul.f32 1.6732632, %v6126_v34  ;;  %v6134_v17 = vadd.f32 -1.0, %v7546_v29 }
 0x6a5   :  { %v5518_v47 = vsel %vm5478_vm6, %v10397_v24, %v5510_v9  ;;  %v5598_v12 = vmul.f32 1.6732632, %v6133_v21 }
 0x6a6   :  { %v5519_v1 = vsel %vm5479_vm13, %v10407_v0, %v5511_v14  ;;  %v5526_v11 = vmul.f32 1.050701, %v5518_v47  ;;  %v5599_v24 = vmul.f32 1.6732632, %v6134_v17 }
 0x6a7   :  { %v5527_v44 = vmul.f32 1.050701, %v5519_v1  ;;  %v5606_v63 = vsel %vm5566_vm2, %v10416_v3, %v5598_v12 }
 0x6a8   :  { %5534 = vst [vmem:[%s10499_s8 + $0x30] sm:$0xff] %v5526_v11  ;;  %v5607_v22 = vsel %vm5567_vm11, %v10421_v25, %v5599_v24  ;;  %v5614_v0 = vmul.f32 1.050701, %v5606_v63 }
 0x6a9   :  { %5535 = vst [vmem:[%s10499_s8 + $0x38] sm:$0xff] %v5527_v44  ;;  %v5615_v15 = vmul.f32 1.050701, %v5607_v22 }
 0x6aa   :  { %6141 = vst [vmem:[%s10499_s8 + $0x70] sm:$0xff] %v5614_v0 }
 0x6ab   :  { %6142 = vst [vmem:[%s10499_s8 + $0x78] sm:$0xff] %v5615_v15 }

</bundles_post_ra>
